<compile_context>
chip_gen: v7x
topology: tpu7x:2x2x1
jax: 0.10.0
libtpu: 0.0.40
codegen_flags: <defaults>
</compile_context>

<pallas_src>
import functools

import jax
import jax.numpy as jnp
from jax import lax
from jax.experimental import pallas as pl
from jax.experimental.pallas import tpu as pltpu


_UNROLL_ROWS = 64          # fully unroll DMA issue/wait below this many rows/chunk
_MAX_ROWS_PER_STEP = 512   # cap on in-flight row-DMA descriptors per chunk


def _vmem_capacity_bytes():
    try:
        return int(pltpu.get_tpu_info().vmem_capacity_bytes)
    except Exception:
        return 64 * 1024 * 1024  # conservative fallback (v7x-sized)


def _pick_rows_per_step(n_rows, row_bytes):
    """Rows of PackedSequence.data gathered per grid step (generation-aware)."""
    row_bytes = max(1, row_bytes)
    vmem_cap = _vmem_capacity_bytes()
    # VMEM footprint ~= 2 gather slots + 2 pipelined out blocks = 4 * R * row_bytes.
    budget = min(vmem_cap // 3, 40 * 1024 * 1024)
    target_block = 2 * 1024 * 1024          # ~2 MiB blocks amortize per-step overhead
    r = min(target_block // row_bytes, budget // (4 * row_bytes), _MAX_ROWS_PER_STEP)
    r = max(8, r)
    if r >= n_rows:
        return n_rows                       # single chunk: block == full array dims
    return max(8, (r // 8) * 8)             # partial blocks need sublane dim % 8 == 0


def _pack_data_kernel(src_ref, nvalid_ref, x_hbm, out_ref, buf, sem, *, rows_per_step):
    """One grid step: gather `rows_per_step` packed-data rows straight from HBM
    (data-dependent row DMAs driven by scalar-prefetched source indices), zero
    the rows past sum(lengths), and store a (rows_per_step, Dw) output block.
    Gathers for chunk i+1 are issued before chunk i is consumed (double-buffer)."""
    R = rows_per_step
    i = pl.program_id(0)
    n_chunks = pl.num_programs(0)
    nvalid = nvalid_ref[0]                  # sum(lengths): number of valid packed rows

    def row_copy(slot, g, src_row):
        return pltpu.make_async_copy(
            x_hbm.at[pl.ds(src_row, 1), :],        # (1, Dw) row of x in HBM
            buf.at[slot, pl.ds(g, 1), :],
            sem.at[slot, g])

    def issue_one(chunk_base, slot, g):
        row = chunk_base + g

        @pl.when(row < nvalid)              # pad rows: no DMA at all
        def _():
            row_copy(slot, g, src_ref[row]).start()

    def wait_one(chunk_base, slot, g):
        row = chunk_base + g

        @pl.when(row < nvalid)              # must mirror the issue guard exactly
        def _():
            row_copy(slot, g, 0).wait()     # only shape + semaphore matter for wait

    def for_each_row(fn, chunk_base, slot):
        if R <= _UNROLL_ROWS:
            for g in range(R):              # small chunk: fully unrolled (LLO-visible)
                fn(chunk_base, slot, g)
        else:
            def body(g, carry):
                fn(chunk_base, slot, g)
                return carry
            lax.fori_loop(0, R, body, 0, unroll=8)

    slot = lax.rem(i, 2)

    @pl.when(i == 0)                        # prime slot 0 with chunk 0
    def _():
        for_each_row(issue_one, 0, 0)

    @pl.when(i + 1 < n_chunks)              # prefetch chunk i+1 into the other slot
    def _():
        for_each_row(issue_one, (i + 1) * R, 1 - slot)

    for_each_row(wait_one, i * R, slot)     # chunk i's rows (issued last step) land

    # Packed rows are fully valid; only rows >= sum(lengths) need zero-fill.
    row_ids = i * R + lax.broadcasted_iota(jnp.int32, (R, 1), 0)
    out_ref[...] = jnp.where(row_ids < nvalid, buf[slot], jnp.zeros((), buf.dtype))


def pack_sequence(x, lengths):
    """JAX/Pallas equivalent of PackSequence.forward (batch_first=True).

    Returns:
      data_padded     : (B*T, D) PackedSequence.data, zero-padded to a static size
                        (first sum(lengths) rows are valid, rest are zeros)
      batch_sizes     : (T,)     PackedSequence.batch_sizes (zero past max(lengths))
      sorted_indices  : (B,)     PackedSequence.sorted_indices
      unsorted_indices: (B,)     PackedSequence.unsorted_indices
      sorted_lengths  : (B,)     lengths[sorted_indices] (second return of forward)
    """
    B, T, D = x.shape
    N = B * T
    lengths = lengths.astype(jnp.int32)

    # NOTE: jnp.argsort is stable; torch.sort(descending=True) is not guaranteed
    # stable, so tie-breaks among equal lengths may differ from PyTorch (both are
    # valid PackedSequence orderings).
    sorted_indices = jnp.argsort(-lengths).astype(jnp.int32)
    sorted_lengths = lengths[sorted_indices]
    unsorted_indices = jnp.argsort(sorted_indices).astype(jnp.int32)
    batch_sizes = jnp.sum(
        lengths[None, :] > jnp.arange(T, dtype=jnp.int32)[:, None], axis=1
    ).astype(jnp.int32)
    # TODO(synk): PyTorch raises on zero-length sequences; here they simply
    # contribute no packed rows.  batch_sizes/data have static length T / B*T
    # (zero-padded) because JAX needs static shapes.

    # ---- O(B*T) host-side index math: packed row r -> source row of x ----
    cum_incl = jnp.cumsum(batch_sizes).astype(jnp.int32)       # (T,)
    cum_excl = cum_incl - batch_sizes
    total = cum_incl[-1]                                       # sum(lengths), dynamic
    r = jnp.arange(N, dtype=jnp.int32)
    t_of_r = jnp.minimum(
        jnp.searchsorted(cum_incl, r, side="right").astype(jnp.int32), T - 1)
    j_of_r = jnp.clip(r - cum_excl[t_of_r], 0, B - 1)
    src_row = jnp.where(r < total,
                        sorted_indices[j_of_r] * T + t_of_r,
                        0).astype(jnp.int32)

    # ---- work on 32-bit lanes: bitcast packed dtypes (bf16/fp8) to uint32 ----
    itemsize = jnp.dtype(x.dtype).itemsize
    if itemsize < 4 and (D * itemsize) % 4 == 0:
        packf = 4 // itemsize
        x_work = lax.bitcast_convert_type(
            x.reshape(N, D // packf, packf), jnp.uint32)       # (N, D//packf) u32
        work_dtype = jnp.dtype(jnp.uint32)
        did_pack = True
    else:
        # TODO(synk): sub-32-bit dtypes whose row byte size is not a multiple of 4
        # fall back to native-dtype row DMAs.
        x_work = x.reshape(N, D)
        work_dtype = jnp.dtype(x.dtype)
        did_pack = False
    Dw = x_work.shape[1]
    row_bytes = Dw * work_dtype.itemsize

    R = _pick_rows_per_step(N, row_bytes)
    num_chunks = -(-N // R)
    N_pad = num_chunks * R
    src_row_pad = jnp.pad(src_row, (0, N_pad - N))
    nvalid = total.reshape(1)                                  # (1,) scalar prefetch

    footprint = 4 * R * row_bytes
    vmem_cap = _vmem_capacity_bytes()
    vmem_limit = int(min(vmem_cap * 3 // 4, max(32 * 1024 * 1024, 3 * footprint)))

    out2d = pl.pallas_call(
        functools.partial(_pack_data_kernel, rows_per_step=R),
        out_shape=jax.ShapeDtypeStruct((N_pad, Dw), work_dtype),
        grid_spec=pltpu.PrefetchScalarGridSpec(
            num_scalar_prefetch=2,                             # src_row, nvalid -> SMEM
            grid=(num_chunks,),
            in_specs=[pl.BlockSpec(memory_space=pl.ANY)],      # x rows gathered by DMA
            out_specs=pl.BlockSpec((R, Dw), lambda i, src, nv: (i, 0)),
            scratch_shapes=[
                pltpu.VMEM((2, R, Dw), work_dtype),            # double-buffered gather
                pltpu.SemaphoreType.DMA((2, R)),
            ]),
        compiler_params=pltpu.CompilerParams(
            # "arbitrary": the cross-chunk double-buffer primes on program_id==0 and
            # carries scratch state, so the chunk loop must run in order on one core.
            # TODO(synk): on v7x, split packed rows across the 2 TensorCores with an
            # explicit leading CORE_PARALLEL axis (each core priming its own slot).
            dimension_semantics=("arbitrary",),
            vmem_limit_bytes=vmem_limit,
        ),
    )(src_row_pad, nvalid, x_work)

    out = out2d[:N]
    if did_pack:
        data_padded = lax.bitcast_convert_type(out, x.dtype).reshape(N, D)
    else:
        data_padded = out

    return data_padded, batch_sizes, sorted_indices, unsorted_indices, sorted_lengths


if __name__ == "__main__":
    import numpy as np

    key = jax.random.PRNGKey(0)
    B, T, D = 4, 8, 32
    x = jax.random.normal(key, (B, T, D), dtype=jnp.float32)
    lengths = jnp.array([5, 8, 3, 8], dtype=jnp.int32)

    pack_fn = jax.jit(pack_sequence)
    outs = jax.block_until_ready(pack_fn(x, lengths))
    data_padded, batch_sizes, sorted_indices, unsorted_indices, sorted_lengths = outs

    # ---- pure-numpy reference of pack_padded_sequence(..., enforce_sorted=False) ----
    xs, ls = np.asarray(x), np.asarray(lengths)
    order = np.argsort(-ls, kind="stable")
    xs_sorted, ls_sorted = xs[order], ls[order]
    ref_rows = []
    for t in range(int(ls.max())):
        bs = int((ls_sorted > t).sum())
        ref_rows.append(xs_sorted[:bs, t, :])
    ref_data = np.concatenate(ref_rows, axis=0)
    ref_data_padded = np.zeros((B * T, D), xs.dtype)
    ref_data_padded[: ref_data.shape[0]] = ref_data
    ref_batch_sizes = np.array([(ls > t).sum() for t in range(T)], np.int32)

    assert np.array_equal(np.asarray(sorted_indices), order), "sorted_indices mismatch"
    assert np.array_equal(np.asarray(sorted_lengths), ls_sorted), "sorted_lengths mismatch"
    assert np.array_equal(np.asarray(unsorted_indices),
                          np.argsort(order, kind="stable")), "unsorted_indices mismatch"
    assert np.array_equal(np.asarray(batch_sizes), ref_batch_sizes), "batch_sizes mismatch"
    assert np.allclose(np.asarray(data_padded), ref_data_padded), \
        "PackedSequence.data mismatch"

    print("KERNEL_OK")
</pallas_src>

<mosaic_0001>
module attributes {stable_mosaic.version = 11 : i64} {
  func.func @_pack_data_kernel(%arg0: i32, %arg1: memref<32xi32, #tpu.memory_space<smem>>, %arg2: memref<1xi32, #tpu.memory_space<smem>>, %arg3: memref<32x32xf32, #tpu.memory_space<any>>, %arg4: memref<32x32xf32, #tpu.memory_space<vmem>>, %arg5: memref<2x32x32xf32, #tpu.memory_space<vmem>>, %arg6: memref<2x32x!tpu.dma_semaphore, #tpu.memory_space<semaphore_mem>>) attributes {dimension_semantics = [#tpu.dimension_semantics<arbitrary>], iteration_bounds = array<i64: 1>, scalar_prefetch = 2 : i64, scratch_operands = 2 : i64, tpu.core_type = #tpu.core_type<tc>, window_params = [{}, {transform_indices = @transform_1, window_bounds = array<i64: 32, 32>}]} {
    %c0 = arith.constant 0 : index
    %0 = memref.load %arg2[%c0] : memref<1xi32, #tpu.memory_space<smem>>
    %c2_i32 = arith.constant 2 : i32
    %1 = arith.remsi %arg0, %c2_i32 : i32
    %c0_i32 = arith.constant 0 : i32
    %2 = arith.cmpi eq, %arg0, %c0_i32 : i32
    %3 = arith.extui %2 : i1 to i32
    %c0_i32_0 = arith.constant 0 : i32
    %4 = arith.cmpi ne, %3, %c0_i32_0 : i32
    scf.if %4 {
      %c0_i32_43 = arith.constant 0 : i32
      %152 = arith.cmpi sgt, %0, %c0_i32_43 : i32
      %153 = arith.extui %152 : i1 to i32
      %c0_i32_44 = arith.constant 0 : i32
      %154 = arith.cmpi ne, %153, %c0_i32_44 : i32
      scf.if %154 {
        %c0_107 = arith.constant 0 : index
        %248 = memref.load %arg1[%c0_107] : memref<32xi32, #tpu.memory_space<smem>>
        %c0_i32_108 = arith.constant 0 : i32
        %c0_i32_109 = arith.constant 0 : i32
        %c0_i32_110 = arith.constant 0 : i32
        %c0_i32_111 = arith.constant 0 : i32
        %249 = tpu.memref_slice %arg3[%248, %c0_i32_111] : memref<32x32xf32, #tpu.memory_space<any>> -> memref<1x32xf32, #tpu.memory_space<any>>
        %c0_i32_112 = arith.constant 0 : i32
        %c0_i32_113 = arith.constant 0 : i32
        %250 = tpu.memref_slice %arg5[%c0_i32_108, %c0_i32_112, %c0_i32_113] : memref<2x32x32xf32, #tpu.memory_space<vmem>> -> memref<1x1x32xf32, #tpu.memory_space<vmem>>
        %251 = tpu.memref_squeeze %250 : memref<1x1x32xf32, #tpu.memory_space<vmem>> -> memref<1x32xf32, #tpu.memory_space<vmem>>
        %252 = tpu.memref_slice %arg6[%c0_i32_109, %c0_i32_110] : memref<2x32x!tpu.dma_semaphore, #tpu.memory_space<semaphore_mem>> -> memref<1x1x!tpu.dma_semaphore, #tpu.memory_space<semaphore_mem>>
        %253 = tpu.memref_squeeze %252 : memref<1x1x!tpu.dma_semaphore, #tpu.memory_space<semaphore_mem>> -> memref<!tpu.dma_semaphore, #tpu.memory_space<semaphore_mem>>
        tpu.enqueue_dma source(%249 : memref<1x32xf32, #tpu.memory_space<any>>) target(%251 : memref<1x32xf32, #tpu.memory_space<vmem>>) target_semaphore(%253 : memref<!tpu.dma_semaphore, #tpu.memory_space<semaphore_mem>>)
      } else {
      }
      %c1_i32_45 = arith.constant 1 : i32
      %155 = arith.cmpi sgt, %0, %c1_i32_45 : i32
      %156 = arith.extui %155 : i1 to i32
      %c0_i32_46 = arith.constant 0 : i32
      %157 = arith.cmpi ne, %156, %c0_i32_46 : i32
      scf.if %157 {
        %c1 = arith.constant 1 : index
        %248 = memref.load %arg1[%c1] : memref<32xi32, #tpu.memory_space<smem>>
        %c0_i32_107 = arith.constant 0 : i32
        %c0_i32_108 = arith.constant 0 : i32
        %c1_i32_109 = arith.constant 1 : i32
        %c0_i32_110 = arith.constant 0 : i32
        %249 = tpu.memref_slice %arg3[%248, %c0_i32_110] : memref<32x32xf32, #tpu.memory_space<any>> -> memref<1x32xf32, #tpu.memory_space<any>>
        %c1_i32_111 = arith.constant 1 : i32
        %c0_i32_112 = arith.constant 0 : i32
        %250 = tpu.memref_slice %arg5[%c0_i32_107, %c1_i32_111, %c0_i32_112] : memref<2x32x32xf32, #tpu.memory_space<vmem>> -> memref<1x1x32xf32, #tpu.memory_space<vmem>>
        %251 = tpu.memref_squeeze %250 : memref<1x1x32xf32, #tpu.memory_space<vmem>> -> memref<1x32xf32, #tpu.memory_space<vmem>>
        %252 = tpu.memref_slice %arg6[%c0_i32_108, %c1_i32_109] : memref<2x32x!tpu.dma_semaphore, #tpu.memory_space<semaphore_mem>> -> memref<1x1x!tpu.dma_semaphore, #tpu.memory_space<semaphore_mem>>
        %253 = tpu.memref_squeeze %252 : memref<1x1x!tpu.dma_semaphore, #tpu.memory_space<semaphore_mem>> -> memref<!tpu.dma_semaphore, #tpu.memory_space<semaphore_mem>>
        tpu.enqueue_dma source(%249 : memref<1x32xf32, #tpu.memory_space<any>>) target(%251 : memref<1x32xf32, #tpu.memory_space<vmem>>) target_semaphore(%253 : memref<!tpu.dma_semaphore, #tpu.memory_space<semaphore_mem>>)
      } else {
      }
      %c2_i32_47 = arith.constant 2 : i32
      %158 = arith.cmpi sgt, %0, %c2_i32_47 : i32
      %159 = arith.extui %158 : i1 to i32
      %c0_i32_48 = arith.constant 0 : i32
      %160 = arith.cmpi ne, %159, %c0_i32_48 : i32
      scf.if %160 {
        %c2 = arith.constant 2 : index
        %248 = memref.load %arg1[%c2] : memref<32xi32, #tpu.memory_space<smem>>
        %c0_i32_107 = arith.constant 0 : i32
        %c0_i32_108 = arith.constant 0 : i32
        %c2_i32_109 = arith.constant 2 : i32
        %c0_i32_110 = arith.constant 0 : i32
        %249 = tpu.memref_slice %arg3[%248, %c0_i32_110] : memref<32x32xf32, #tpu.memory_space<any>> -> memref<1x32xf32, #tpu.memory_space<any>>
        %c2_i32_111 = arith.constant 2 : i32
        %c0_i32_112 = arith.constant 0 : i32
        %250 = tpu.memref_slice %arg5[%c0_i32_107, %c2_i32_111, %c0_i32_112] : memref<2x32x32xf32, #tpu.memory_space<vmem>> -> memref<1x1x32xf32, #tpu.memory_space<vmem>>
        %251 = tpu.memref_squeeze %250 : memref<1x1x32xf32, #tpu.memory_space<vmem>> -> memref<1x32xf32, #tpu.memory_space<vmem>>
        %252 = tpu.memref_slice %arg6[%c0_i32_108, %c2_i32_109] : memref<2x32x!tpu.dma_semaphore, #tpu.memory_space<semaphore_mem>> -> memref<1x1x!tpu.dma_semaphore, #tpu.memory_space<semaphore_mem>>
        %253 = tpu.memref_squeeze %252 : memref<1x1x!tpu.dma_semaphore, #tpu.memory_space<semaphore_mem>> -> memref<!tpu.dma_semaphore, #tpu.memory_space<semaphore_mem>>
        tpu.enqueue_dma source(%249 : memref<1x32xf32, #tpu.memory_space<any>>) target(%251 : memref<1x32xf32, #tpu.memory_space<vmem>>) target_semaphore(%253 : memref<!tpu.dma_semaphore, #tpu.memory_space<semaphore_mem>>)
      } else {
      }
      %c3_i32_49 = arith.constant 3 : i32
      %161 = arith.cmpi sgt, %0, %c3_i32_49 : i32
      %162 = arith.extui %161 : i1 to i32
      %c0_i32_50 = arith.constant 0 : i32
      %163 = arith.cmpi ne, %162, %c0_i32_50 : i32
      scf.if %163 {
        %c3 = arith.constant 3 : index
        %248 = memref.load %arg1[%c3] : memref<32xi32, #tpu.memory_space<smem>>
        %c0_i32_107 = arith.constant 0 : i32
        %c0_i32_108 = arith.constant 0 : i32
        %c3_i32_109 = arith.constant 3 : i32
        %c0_i32_110 = arith.constant 0 : i32
        %249 = tpu.memref_slice %arg3[%248, %c0_i32_110] : memref<32x32xf32, #tpu.memory_space<any>> -> memref<1x32xf32, #tpu.memory_space<any>>
        %c3_i32_111 = arith.constant 3 : i32
        %c0_i32_112 = arith.constant 0 : i32
        %250 = tpu.memref_slice %arg5[%c0_i32_107, %c3_i32_111, %c0_i32_112] : memref<2x32x32xf32, #tpu.memory_space<vmem>> -> memref<1x1x32xf32, #tpu.memory_space<vmem>>
        %251 = tpu.memref_squeeze %250 : memref<1x1x32xf32, #tpu.memory_space<vmem>> -> memref<1x32xf32, #tpu.memory_space<vmem>>
        %252 = tpu.memref_slice %arg6[%c0_i32_108, %c3_i32_109] : memref<2x32x!tpu.dma_semaphore, #tpu.memory_space<semaphore_mem>> -> memref<1x1x!tpu.dma_semaphore, #tpu.memory_space<semaphore_mem>>
        %253 = tpu.memref_squeeze %252 : memref<1x1x!tpu.dma_semaphore, #tpu.memory_space<semaphore_mem>> -> memref<!tpu.dma_semaphore, #tpu.memory_space<semaphore_mem>>
        tpu.enqueue_dma source(%249 : memref<1x32xf32, #tpu.memory_space<any>>) target(%251 : memref<1x32xf32, #tpu.memory_space<vmem>>) target_semaphore(%253 : memref<!tpu.dma_semaphore, #tpu.memory_space<semaphore_mem>>)
      } else {
      }
      %c4_i32_51 = arith.constant 4 : i32
      %164 = arith.cmpi sgt, %0, %c4_i32_51 : i32
      %165 = arith.extui %164 : i1 to i32
      %c0_i32_52 = arith.constant 0 : i32
      %166 = arith.cmpi ne, %165, %c0_i32_52 : i32
      scf.if %166 {
        %c4 = arith.constant 4 : index
        %248 = memref.load %arg1[%c4] : memref<32xi32, #tpu.memory_space<smem>>
        %c0_i32_107 = arith.constant 0 : i32
        %c0_i32_108 = arith.constant 0 : i32
        %c4_i32_109 = arith.constant 4 : i32
        %c0_i32_110 = arith.constant 0 : i32
        %249 = tpu.memref_slice %arg3[%248, %c0_i32_110] : memref<32x32xf32, #tpu.memory_space<any>> -> memref<1x32xf32, #tpu.memory_space<any>>
        %c4_i32_111 = arith.constant 4 : i32
        %c0_i32_112 = arith.constant 0 : i32
        %250 = tpu.memref_slice %arg5[%c0_i32_107, %c4_i32_111, %c0_i32_112] : memref<2x32x32xf32, #tpu.memory_space<vmem>> -> memref<1x1x32xf32, #tpu.memory_space<vmem>>
        %251 = tpu.memref_squeeze %250 : memref<1x1x32xf32, #tpu.memory_space<vmem>> -> memref<1x32xf32, #tpu.memory_space<vmem>>
        %252 = tpu.memref_slice %arg6[%c0_i32_108, %c4_i32_109] : memref<2x32x!tpu.dma_semaphore, #tpu.memory_space<semaphore_mem>> -> memref<1x1x!tpu.dma_semaphore, #tpu.memory_space<semaphore_mem>>
        %253 = tpu.memref_squeeze %252 : memref<1x1x!tpu.dma_semaphore, #tpu.memory_space<semaphore_mem>> -> memref<!tpu.dma_semaphore, #tpu.memory_space<semaphore_mem>>
        tpu.enqueue_dma source(%249 : memref<1x32xf32, #tpu.memory_space<any>>) target(%251 : memref<1x32xf32, #tpu.memory_space<vmem>>) target_semaphore(%253 : memref<!tpu.dma_semaphore, #tpu.memory_space<semaphore_mem>>)
      } else {
      }
      %c5_i32_53 = arith.constant 5 : i32
      %167 = arith.cmpi sgt, %0, %c5_i32_53 : i32
      %168 = arith.extui %167 : i1 to i32
      %c0_i32_54 = arith.constant 0 : i32
      %169 = arith.cmpi ne, %168, %c0_i32_54 : i32
      scf.if %169 {
        %c5 = arith.constant 5 : index
        %248 = memref.load %arg1[%c5] : memref<32xi32, #tpu.memory_space<smem>>
        %c0_i32_107 = arith.constant 0 : i32
        %c0_i32_108 = arith.constant 0 : i32
        %c5_i32_109 = arith.constant 5 : i32
        %c0_i32_110 = arith.constant 0 : i32
        %249 = tpu.memref_slice %arg3[%248, %c0_i32_110] : memref<32x32xf32, #tpu.memory_space<any>> -> memref<1x32xf32, #tpu.memory_space<any>>
        %c5_i32_111 = arith.constant 5 : i32
        %c0_i32_112 = arith.constant 0 : i32
        %250 = tpu.memref_slice %arg5[%c0_i32_107, %c5_i32_111, %c0_i32_112] : memref<2x32x32xf32, #tpu.memory_space<vmem>> -> memref<1x1x32xf32, #tpu.memory_space<vmem>>
        %251 = tpu.memref_squeeze %250 : memref<1x1x32xf32, #tpu.memory_space<vmem>> -> memref<1x32xf32, #tpu.memory_space<vmem>>
        %252 = tpu.memref_slice %arg6[%c0_i32_108, %c5_i32_109] : memref<2x32x!tpu.dma_semaphore, #tpu.memory_space<semaphore_mem>> -> memref<1x1x!tpu.dma_semaphore, #tpu.memory_space<semaphore_mem>>
        %253 = tpu.memref_squeeze %252 : memref<1x1x!tpu.dma_semaphore, #tpu.memory_space<semaphore_mem>> -> memref<!tpu.dma_semaphore, #tpu.memory_space<semaphore_mem>>
        tpu.enqueue_dma source(%249 : memref<1x32xf32, #tpu.memory_space<any>>) target(%251 : memref<1x32xf32, #tpu.memory_space<vmem>>) target_semaphore(%253 : memref<!tpu.dma_semaphore, #tpu.memory_space<semaphore_mem>>)
      } else {
      }
      %c6_i32_55 = arith.constant 6 : i32
      %170 = arith.cmpi sgt, %0, %c6_i32_55 : i32
      %171 = arith.extui %170 : i1 to i32
      %c0_i32_56 = arith.constant 0 : i32
      %172 = arith.cmpi ne, %171, %c0_i32_56 : i32
      scf.if %172 {
        %c6 = arith.constant 6 : index
        %248 = memref.load %arg1[%c6] : memref<32xi32, #tpu.memory_space<smem>>
        %c0_i32_107 = arith.constant 0 : i32
        %c0_i32_108 = arith.constant 0 : i32
        %c6_i32_109 = arith.constant 6 : i32
        %c0_i32_110 = arith.constant 0 : i32
        %249 = tpu.memref_slice %arg3[%248, %c0_i32_110] : memref<32x32xf32, #tpu.memory_space<any>> -> memref<1x32xf32, #tpu.memory_space<any>>
        %c6_i32_111 = arith.constant 6 : i32
        %c0_i32_112 = arith.constant 0 : i32
        %250 = tpu.memref_slice %arg5[%c0_i32_107, %c6_i32_111, %c0_i32_112] : memref<2x32x32xf32, #tpu.memory_space<vmem>> -> memref<1x1x32xf32, #tpu.memory_space<vmem>>
        %251 = tpu.memref_squeeze %250 : memref<1x1x32xf32, #tpu.memory_space<vmem>> -> memref<1x32xf32, #tpu.memory_space<vmem>>
        %252 = tpu.memref_slice %arg6[%c0_i32_108, %c6_i32_109] : memref<2x32x!tpu.dma_semaphore, #tpu.memory_space<semaphore_mem>> -> memref<1x1x!tpu.dma_semaphore, #tpu.memory_space<semaphore_mem>>
        %253 = tpu.memref_squeeze %252 : memref<1x1x!tpu.dma_semaphore, #tpu.memory_space<semaphore_mem>> -> memref<!tpu.dma_semaphore, #tpu.memory_space<semaphore_mem>>
        tpu.enqueue_dma source(%249 : memref<1x32xf32, #tpu.memory_space<any>>) target(%251 : memref<1x32xf32, #tpu.memory_space<vmem>>) target_semaphore(%253 : memref<!tpu.dma_semaphore, #tpu.memory_space<semaphore_mem>>)
      } else {
      }
      %c7_i32_57 = arith.constant 7 : i32
      %173 = arith.cmpi sgt, %0, %c7_i32_57 : i32
      %174 = arith.extui %173 : i1 to i32
      %c0_i32_58 = arith.constant 0 : i32
      %175 = arith.cmpi ne, %174, %c0_i32_58 : i32
      scf.if %175 {
        %c7 = arith.constant 7 : index
        %248 = memref.load %arg1[%c7] : memref<32xi32, #tpu.memory_space<smem>>
        %c0_i32_107 = arith.constant 0 : i32
        %c0_i32_108 = arith.constant 0 : i32
        %c7_i32_109 = arith.constant 7 : i32
        %c0_i32_110 = arith.constant 0 : i32
        %249 = tpu.memref_slice %arg3[%248, %c0_i32_110] : memref<32x32xf32, #tpu.memory_space<any>> -> memref<1x32xf32, #tpu.memory_space<any>>
        %c7_i32_111 = arith.constant 7 : i32
        %c0_i32_112 = arith.constant 0 : i32
        %250 = tpu.memref_slice %arg5[%c0_i32_107, %c7_i32_111, %c0_i32_112] : memref<2x32x32xf32, #tpu.memory_space<vmem>> -> memref<1x1x32xf32, #tpu.memory_space<vmem>>
        %251 = tpu.memref_squeeze %250 : memref<1x1x32xf32, #tpu.memory_space<vmem>> -> memref<1x32xf32, #tpu.memory_space<vmem>>
        %252 = tpu.memref_slice %arg6[%c0_i32_108, %c7_i32_109] : memref<2x32x!tpu.dma_semaphore, #tpu.memory_space<semaphore_mem>> -> memref<1x1x!tpu.dma_semaphore, #tpu.memory_space<semaphore_mem>>
        %253 = tpu.memref_squeeze %252 : memref<1x1x!tpu.dma_semaphore, #tpu.memory_space<semaphore_mem>> -> memref<!tpu.dma_semaphore, #tpu.memory_space<semaphore_mem>>
        tpu.enqueue_dma source(%249 : memref<1x32xf32, #tpu.memory_space<any>>) target(%251 : memref<1x32xf32, #tpu.memory_space<vmem>>) target_semaphore(%253 : memref<!tpu.dma_semaphore, #tpu.memory_space<semaphore_mem>>)
      } else {
      }
      %c8_i32_59 = arith.constant 8 : i32
      %176 = arith.cmpi sgt, %0, %c8_i32_59 : i32
      %177 = arith.extui %176 : i1 to i32
      %c0_i32_60 = arith.constant 0 : i32
      %178 = arith.cmpi ne, %177, %c0_i32_60 : i32
      scf.if %178 {
        %c8 = arith.constant 8 : index
        %248 = memref.load %arg1[%c8] : memref<32xi32, #tpu.memory_space<smem>>
        %c0_i32_107 = arith.constant 0 : i32
        %c0_i32_108 = arith.constant 0 : i32
        %c8_i32_109 = arith.constant 8 : i32
        %c0_i32_110 = arith.constant 0 : i32
        %249 = tpu.memref_slice %arg3[%248, %c0_i32_110] : memref<32x32xf32, #tpu.memory_space<any>> -> memref<1x32xf32, #tpu.memory_space<any>>
        %c8_i32_111 = arith.constant 8 : i32
        %c0_i32_112 = arith.constant 0 : i32
        %250 = tpu.memref_slice %arg5[%c0_i32_107, %c8_i32_111, %c0_i32_112] : memref<2x32x32xf32, #tpu.memory_space<vmem>> -> memref<1x1x32xf32, #tpu.memory_space<vmem>>
        %251 = tpu.memref_squeeze %250 : memref<1x1x32xf32, #tpu.memory_space<vmem>> -> memref<1x32xf32, #tpu.memory_space<vmem>>
        %252 = tpu.memref_slice %arg6[%c0_i32_108, %c8_i32_109] : memref<2x32x!tpu.dma_semaphore, #tpu.memory_space<semaphore_mem>> -> memref<1x1x!tpu.dma_semaphore, #tpu.memory_space<semaphore_mem>>
        %253 = tpu.memref_squeeze %252 : memref<1x1x!tpu.dma_semaphore, #tpu.memory_space<semaphore_mem>> -> memref<!tpu.dma_semaphore, #tpu.memory_space<semaphore_mem>>
        tpu.enqueue_dma source(%249 : memref<1x32xf32, #tpu.memory_space<any>>) target(%251 : memref<1x32xf32, #tpu.memory_space<vmem>>) target_semaphore(%253 : memref<!tpu.dma_semaphore, #tpu.memory_space<semaphore_mem>>)
      } else {
      }
      %c9_i32_61 = arith.constant 9 : i32
      %179 = arith.cmpi sgt, %0, %c9_i32_61 : i32
      %180 = arith.extui %179 : i1 to i32
      %c0_i32_62 = arith.constant 0 : i32
      %181 = arith.cmpi ne, %180, %c0_i32_62 : i32
      scf.if %181 {
        %c9 = arith.constant 9 : index
        %248 = memref.load %arg1[%c9] : memref<32xi32, #tpu.memory_space<smem>>
        %c0_i32_107 = arith.constant 0 : i32
        %c0_i32_108 = arith.constant 0 : i32
        %c9_i32_109 = arith.constant 9 : i32
        %c0_i32_110 = arith.constant 0 : i32
        %249 = tpu.memref_slice %arg3[%248, %c0_i32_110] : memref<32x32xf32, #tpu.memory_space<any>> -> memref<1x32xf32, #tpu.memory_space<any>>
        %c9_i32_111 = arith.constant 9 : i32
        %c0_i32_112 = arith.constant 0 : i32
        %250 = tpu.memref_slice %arg5[%c0_i32_107, %c9_i32_111, %c0_i32_112] : memref<2x32x32xf32, #tpu.memory_space<vmem>> -> memref<1x1x32xf32, #tpu.memory_space<vmem>>
        %251 = tpu.memref_squeeze %250 : memref<1x1x32xf32, #tpu.memory_space<vmem>> -> memref<1x32xf32, #tpu.memory_space<vmem>>
        %252 = tpu.memref_slice %arg6[%c0_i32_108, %c9_i32_109] : memref<2x32x!tpu.dma_semaphore, #tpu.memory_space<semaphore_mem>> -> memref<1x1x!tpu.dma_semaphore, #tpu.memory_space<semaphore_mem>>
        %253 = tpu.memref_squeeze %252 : memref<1x1x!tpu.dma_semaphore, #tpu.memory_space<semaphore_mem>> -> memref<!tpu.dma_semaphore, #tpu.memory_space<semaphore_mem>>
        tpu.enqueue_dma source(%249 : memref<1x32xf32, #tpu.memory_space<any>>) target(%251 : memref<1x32xf32, #tpu.memory_space<vmem>>) target_semaphore(%253 : memref<!tpu.dma_semaphore, #tpu.memory_space<semaphore_mem>>)
      } else {
      }
      %c10_i32_63 = arith.constant 10 : i32
      %182 = arith.cmpi sgt, %0, %c10_i32_63 : i32
      %183 = arith.extui %182 : i1 to i32
      %c0_i32_64 = arith.constant 0 : i32
      %184 = arith.cmpi ne, %183, %c0_i32_64 : i32
      scf.if %184 {
        %c10 = arith.constant 10 : index
        %248 = memref.load %arg1[%c10] : memref<32xi32, #tpu.memory_space<smem>>
        %c0_i32_107 = arith.constant 0 : i32
        %c0_i32_108 = arith.constant 0 : i32
        %c10_i32_109 = arith.constant 10 : i32
        %c0_i32_110 = arith.constant 0 : i32
        %249 = tpu.memref_slice %arg3[%248, %c0_i32_110] : memref<32x32xf32, #tpu.memory_space<any>> -> memref<1x32xf32, #tpu.memory_space<any>>
        %c10_i32_111 = arith.constant 10 : i32
        %c0_i32_112 = arith.constant 0 : i32
        %250 = tpu.memref_slice %arg5[%c0_i32_107, %c10_i32_111, %c0_i32_112] : memref<2x32x32xf32, #tpu.memory_space<vmem>> -> memref<1x1x32xf32, #tpu.memory_space<vmem>>
        %251 = tpu.memref_squeeze %250 : memref<1x1x32xf32, #tpu.memory_space<vmem>> -> memref<1x32xf32, #tpu.memory_space<vmem>>
        %252 = tpu.memref_slice %arg6[%c0_i32_108, %c10_i32_109] : memref<2x32x!tpu.dma_semaphore, #tpu.memory_space<semaphore_mem>> -> memref<1x1x!tpu.dma_semaphore, #tpu.memory_space<semaphore_mem>>
        %253 = tpu.memref_squeeze %252 : memref<1x1x!tpu.dma_semaphore, #tpu.memory_space<semaphore_mem>> -> memref<!tpu.dma_semaphore, #tpu.memory_space<semaphore_mem>>
        tpu.enqueue_dma source(%249 : memref<1x32xf32, #tpu.memory_space<any>>) target(%251 : memref<1x32xf32, #tpu.memory_space<vmem>>) target_semaphore(%253 : memref<!tpu.dma_semaphore, #tpu.memory_space<semaphore_mem>>)
      } else {
      }
      %c11_i32_65 = arith.constant 11 : i32
      %185 = arith.cmpi sgt, %0, %c11_i32_65 : i32
      %186 = arith.extui %185 : i1 to i32
      %c0_i32_66 = arith.constant 0 : i32
      %187 = arith.cmpi ne, %186, %c0_i32_66 : i32
      scf.if %187 {
        %c11 = arith.constant 11 : index
        %248 = memref.load %arg1[%c11] : memref<32xi32, #tpu.memory_space<smem>>
        %c0_i32_107 = arith.constant 0 : i32
        %c0_i32_108 = arith.constant 0 : i32
        %c11_i32_109 = arith.constant 11 : i32
        %c0_i32_110 = arith.constant 0 : i32
        %249 = tpu.memref_slice %arg3[%248, %c0_i32_110] : memref<32x32xf32, #tpu.memory_space<any>> -> memref<1x32xf32, #tpu.memory_space<any>>
        %c11_i32_111 = arith.constant 11 : i32
        %c0_i32_112 = arith.constant 0 : i32
        %250 = tpu.memref_slice %arg5[%c0_i32_107, %c11_i32_111, %c0_i32_112] : memref<2x32x32xf32, #tpu.memory_space<vmem>> -> memref<1x1x32xf32, #tpu.memory_space<vmem>>
        %251 = tpu.memref_squeeze %250 : memref<1x1x32xf32, #tpu.memory_space<vmem>> -> memref<1x32xf32, #tpu.memory_space<vmem>>
        %252 = tpu.memref_slice %arg6[%c0_i32_108, %c11_i32_109] : memref<2x32x!tpu.dma_semaphore, #tpu.memory_space<semaphore_mem>> -> memref<1x1x!tpu.dma_semaphore, #tpu.memory_space<semaphore_mem>>
        %253 = tpu.memref_squeeze %252 : memref<1x1x!tpu.dma_semaphore, #tpu.memory_space<semaphore_mem>> -> memref<!tpu.dma_semaphore, #tpu.memory_space<semaphore_mem>>
        tpu.enqueue_dma source(%249 : memref<1x32xf32, #tpu.memory_space<any>>) target(%251 : memref<1x32xf32, #tpu.memory_space<vmem>>) target_semaphore(%253 : memref<!tpu.dma_semaphore, #tpu.memory_space<semaphore_mem>>)
      } else {
      }
      %c12_i32_67 = arith.constant 12 : i32
      %188 = arith.cmpi sgt, %0, %c12_i32_67 : i32
      %189 = arith.extui %188 : i1 to i32
      %c0_i32_68 = arith.constant 0 : i32
      %190 = arith.cmpi ne, %189, %c0_i32_68 : i32
      scf.if %190 {
        %c12 = arith.constant 12 : index
        %248 = memref.load %arg1[%c12] : memref<32xi32, #tpu.memory_space<smem>>
        %c0_i32_107 = arith.constant 0 : i32
        %c0_i32_108 = arith.constant 0 : i32
        %c12_i32_109 = arith.constant 12 : i32
        %c0_i32_110 = arith.constant 0 : i32
        %249 = tpu.memref_slice %arg3[%248, %c0_i32_110] : memref<32x32xf32, #tpu.memory_space<any>> -> memref<1x32xf32, #tpu.memory_space<any>>
        %c12_i32_111 = arith.constant 12 : i32
        %c0_i32_112 = arith.constant 0 : i32
        %250 = tpu.memref_slice %arg5[%c0_i32_107, %c12_i32_111, %c0_i32_112] : memref<2x32x32xf32, #tpu.memory_space<vmem>> -> memref<1x1x32xf32, #tpu.memory_space<vmem>>
        %251 = tpu.memref_squeeze %250 : memref<1x1x32xf32, #tpu.memory_space<vmem>> -> memref<1x32xf32, #tpu.memory_space<vmem>>
        %252 = tpu.memref_slice %arg6[%c0_i32_108, %c12_i32_109] : memref<2x32x!tpu.dma_semaphore, #tpu.memory_space<semaphore_mem>> -> memref<1x1x!tpu.dma_semaphore, #tpu.memory_space<semaphore_mem>>
        %253 = tpu.memref_squeeze %252 : memref<1x1x!tpu.dma_semaphore, #tpu.memory_space<semaphore_mem>> -> memref<!tpu.dma_semaphore, #tpu.memory_space<semaphore_mem>>
        tpu.enqueue_dma source(%249 : memref<1x32xf32, #tpu.memory_space<any>>) target(%251 : memref<1x32xf32, #tpu.memory_space<vmem>>) target_semaphore(%253 : memref<!tpu.dma_semaphore, #tpu.memory_space<semaphore_mem>>)
      } else {
      }
      %c13_i32_69 = arith.constant 13 : i32
      %191 = arith.cmpi sgt, %0, %c13_i32_69 : i32
      %192 = arith.extui %191 : i1 to i32
      %c0_i32_70 = arith.constant 0 : i32
      %193 = arith.cmpi ne, %192, %c0_i32_70 : i32
      scf.if %193 {
        %c13 = arith.constant 13 : index
        %248 = memref.load %arg1[%c13] : memref<32xi32, #tpu.memory_space<smem>>
        %c0_i32_107 = arith.constant 0 : i32
        %c0_i32_108 = arith.constant 0 : i32
        %c13_i32_109 = arith.constant 13 : i32
        %c0_i32_110 = arith.constant 0 : i32
        %249 = tpu.memref_slice %arg3[%248, %c0_i32_110] : memref<32x32xf32, #tpu.memory_space<any>> -> memref<1x32xf32, #tpu.memory_space<any>>
        %c13_i32_111 = arith.constant 13 : i32
        %c0_i32_112 = arith.constant 0 : i32
        %250 = tpu.memref_slice %arg5[%c0_i32_107, %c13_i32_111, %c0_i32_112] : memref<2x32x32xf32, #tpu.memory_space<vmem>> -> memref<1x1x32xf32, #tpu.memory_space<vmem>>
        %251 = tpu.memref_squeeze %250 : memref<1x1x32xf32, #tpu.memory_space<vmem>> -> memref<1x32xf32, #tpu.memory_space<vmem>>
        %252 = tpu.memref_slice %arg6[%c0_i32_108, %c13_i32_109] : memref<2x32x!tpu.dma_semaphore, #tpu.memory_space<semaphore_mem>> -> memref<1x1x!tpu.dma_semaphore, #tpu.memory_space<semaphore_mem>>
        %253 = tpu.memref_squeeze %252 : memref<1x1x!tpu.dma_semaphore, #tpu.memory_space<semaphore_mem>> -> memref<!tpu.dma_semaphore, #tpu.memory_space<semaphore_mem>>
        tpu.enqueue_dma source(%249 : memref<1x32xf32, #tpu.memory_space<any>>) target(%251 : memref<1x32xf32, #tpu.memory_space<vmem>>) target_semaphore(%253 : memref<!tpu.dma_semaphore, #tpu.memory_space<semaphore_mem>>)
      } else {
      }
      %c14_i32_71 = arith.constant 14 : i32
      %194 = arith.cmpi sgt, %0, %c14_i32_71 : i32
      %195 = arith.extui %194 : i1 to i32
      %c0_i32_72 = arith.constant 0 : i32
      %196 = arith.cmpi ne, %195, %c0_i32_72 : i32
      scf.if %196 {
        %c14 = arith.constant 14 : index
        %248 = memref.load %arg1[%c14] : memref<32xi32, #tpu.memory_space<smem>>
        %c0_i32_107 = arith.constant 0 : i32
        %c0_i32_108 = arith.constant 0 : i32
        %c14_i32_109 = arith.constant 14 : i32
        %c0_i32_110 = arith.constant 0 : i32
        %249 = tpu.memref_slice %arg3[%248, %c0_i32_110] : memref<32x32xf32, #tpu.memory_space<any>> -> memref<1x32xf32, #tpu.memory_space<any>>
        %c14_i32_111 = arith.constant 14 : i32
        %c0_i32_112 = arith.constant 0 : i32
        %250 = tpu.memref_slice %arg5[%c0_i32_107, %c14_i32_111, %c0_i32_112] : memref<2x32x32xf32, #tpu.memory_space<vmem>> -> memref<1x1x32xf32, #tpu.memory_space<vmem>>
        %251 = tpu.memref_squeeze %250 : memref<1x1x32xf32, #tpu.memory_space<vmem>> -> memref<1x32xf32, #tpu.memory_space<vmem>>
        %252 = tpu.memref_slice %arg6[%c0_i32_108, %c14_i32_109] : memref<2x32x!tpu.dma_semaphore, #tpu.memory_space<semaphore_mem>> -> memref<1x1x!tpu.dma_semaphore, #tpu.memory_space<semaphore_mem>>
        %253 = tpu.memref_squeeze %252 : memref<1x1x!tpu.dma_semaphore, #tpu.memory_space<semaphore_mem>> -> memref<!tpu.dma_semaphore, #tpu.memory_space<semaphore_mem>>
        tpu.enqueue_dma source(%249 : memref<1x32xf32, #tpu.memory_space<any>>) target(%251 : memref<1x32xf32, #tpu.memory_space<vmem>>) target_semaphore(%253 : memref<!tpu.dma_semaphore, #tpu.memory_space<semaphore_mem>>)
      } else {
      }
      %c15_i32_73 = arith.constant 15 : i32
      %197 = arith.cmpi sgt, %0, %c15_i32_73 : i32
      %198 = arith.extui %197 : i1 to i32
      %c0_i32_74 = arith.constant 0 : i32
      %199 = arith.cmpi ne, %198, %c0_i32_74 : i32
      scf.if %199 {
        %c15 = arith.constant 15 : index
        %248 = memref.load %arg1[%c15] : memref<32xi32, #tpu.memory_space<smem>>
        %c0_i32_107 = arith.constant 0 : i32
        %c0_i32_108 = arith.constant 0 : i32
        %c15_i32_109 = arith.constant 15 : i32
        %c0_i32_110 = arith.constant 0 : i32
        %249 = tpu.memref_slice %arg3[%248, %c0_i32_110] : memref<32x32xf32, #tpu.memory_space<any>> -> memref<1x32xf32, #tpu.memory_space<any>>
        %c15_i32_111 = arith.constant 15 : i32
        %c0_i32_112 = arith.constant 0 : i32
        %250 = tpu.memref_slice %arg5[%c0_i32_107, %c15_i32_111, %c0_i32_112] : memref<2x32x32xf32, #tpu.memory_space<vmem>> -> memref<1x1x32xf32, #tpu.memory_space<vmem>>
        %251 = tpu.memref_squeeze %250 : memref<1x1x32xf32, #tpu.memory_space<vmem>> -> memref<1x32xf32, #tpu.memory_space<vmem>>
        %252 = tpu.memref_slice %arg6[%c0_i32_108, %c15_i32_109] : memref<2x32x!tpu.dma_semaphore, #tpu.memory_space<semaphore_mem>> -> memref<1x1x!tpu.dma_semaphore, #tpu.memory_space<semaphore_mem>>
        %253 = tpu.memref_squeeze %252 : memref<1x1x!tpu.dma_semaphore, #tpu.memory_space<semaphore_mem>> -> memref<!tpu.dma_semaphore, #tpu.memory_space<semaphore_mem>>
        tpu.enqueue_dma source(%249 : memref<1x32xf32, #tpu.memory_space<any>>) target(%251 : memref<1x32xf32, #tpu.memory_space<vmem>>) target_semaphore(%253 : memref<!tpu.dma_semaphore, #tpu.memory_space<semaphore_mem>>)
      } else {
      }
      %c16_i32_75 = arith.constant 16 : i32
      %200 = arith.cmpi sgt, %0, %c16_i32_75 : i32
      %201 = arith.extui %200 : i1 to i32
      %c0_i32_76 = arith.constant 0 : i32
      %202 = arith.cmpi ne, %201, %c0_i32_76 : i32
      scf.if %202 {
        %c16 = arith.constant 16 : index
        %248 = memref.load %arg1[%c16] : memref<32xi32, #tpu.memory_space<smem>>
        %c0_i32_107 = arith.constant 0 : i32
        %c0_i32_108 = arith.constant 0 : i32
        %c16_i32_109 = arith.constant 16 : i32
        %c0_i32_110 = arith.constant 0 : i32
        %249 = tpu.memref_slice %arg3[%248, %c0_i32_110] : memref<32x32xf32, #tpu.memory_space<any>> -> memref<1x32xf32, #tpu.memory_space<any>>
        %c16_i32_111 = arith.constant 16 : i32
        %c0_i32_112 = arith.constant 0 : i32
        %250 = tpu.memref_slice %arg5[%c0_i32_107, %c16_i32_111, %c0_i32_112] : memref<2x32x32xf32, #tpu.memory_space<vmem>> -> memref<1x1x32xf32, #tpu.memory_space<vmem>>
        %251 = tpu.memref_squeeze %250 : memref<1x1x32xf32, #tpu.memory_space<vmem>> -> memref<1x32xf32, #tpu.memory_space<vmem>>
        %252 = tpu.memref_slice %arg6[%c0_i32_108, %c16_i32_109] : memref<2x32x!tpu.dma_semaphore, #tpu.memory_space<semaphore_mem>> -> memref<1x1x!tpu.dma_semaphore, #tpu.memory_space<semaphore_mem>>
        %253 = tpu.memref_squeeze %252 : memref<1x1x!tpu.dma_semaphore, #tpu.memory_space<semaphore_mem>> -> memref<!tpu.dma_semaphore, #tpu.memory_space<semaphore_mem>>
        tpu.enqueue_dma source(%249 : memref<1x32xf32, #tpu.memory_space<any>>) target(%251 : memref<1x32xf32, #tpu.memory_space<vmem>>) target_semaphore(%253 : memref<!tpu.dma_semaphore, #tpu.memory_space<semaphore_mem>>)
      } else {
      }
      %c17_i32_77 = arith.constant 17 : i32
      %203 = arith.cmpi sgt, %0, %c17_i32_77 : i32
      %204 = arith.extui %203 : i1 to i32
      %c0_i32_78 = arith.constant 0 : i32
      %205 = arith.cmpi ne, %204, %c0_i32_78 : i32
      scf.if %205 {
        %c17 = arith.constant 17 : index
        %248 = memref.load %arg1[%c17] : memref<32xi32, #tpu.memory_space<smem>>
        %c0_i32_107 = arith.constant 0 : i32
        %c0_i32_108 = arith.constant 0 : i32
        %c17_i32_109 = arith.constant 17 : i32
        %c0_i32_110 = arith.constant 0 : i32
        %249 = tpu.memref_slice %arg3[%248, %c0_i32_110] : memref<32x32xf32, #tpu.memory_space<any>> -> memref<1x32xf32, #tpu.memory_space<any>>
        %c17_i32_111 = arith.constant 17 : i32
        %c0_i32_112 = arith.constant 0 : i32
        %250 = tpu.memref_slice %arg5[%c0_i32_107, %c17_i32_111, %c0_i32_112] : memref<2x32x32xf32, #tpu.memory_space<vmem>> -> memref<1x1x32xf32, #tpu.memory_space<vmem>>
        %251 = tpu.memref_squeeze %250 : memref<1x1x32xf32, #tpu.memory_space<vmem>> -> memref<1x32xf32, #tpu.memory_space<vmem>>
        %252 = tpu.memref_slice %arg6[%c0_i32_108, %c17_i32_109] : memref<2x32x!tpu.dma_semaphore, #tpu.memory_space<semaphore_mem>> -> memref<1x1x!tpu.dma_semaphore, #tpu.memory_space<semaphore_mem>>
        %253 = tpu.memref_squeeze %252 : memref<1x1x!tpu.dma_semaphore, #tpu.memory_space<semaphore_mem>> -> memref<!tpu.dma_semaphore, #tpu.memory_space<semaphore_mem>>
        tpu.enqueue_dma source(%249 : memref<1x32xf32, #tpu.memory_space<any>>) target(%251 : memref<1x32xf32, #tpu.memory_space<vmem>>) target_semaphore(%253 : memref<!tpu.dma_semaphore, #tpu.memory_space<semaphore_mem>>)
      } else {
      }
      %c18_i32_79 = arith.constant 18 : i32
      %206 = arith.cmpi sgt, %0, %c18_i32_79 : i32
      %207 = arith.extui %206 : i1 to i32
      %c0_i32_80 = arith.constant 0 : i32
      %208 = arith.cmpi ne, %207, %c0_i32_80 : i32
      scf.if %208 {
        %c18 = arith.constant 18 : index
        %248 = memref.load %arg1[%c18] : memref<32xi32, #tpu.memory_space<smem>>
        %c0_i32_107 = arith.constant 0 : i32
        %c0_i32_108 = arith.constant 0 : i32
        %c18_i32_109 = arith.constant 18 : i32
        %c0_i32_110 = arith.constant 0 : i32
        %249 = tpu.memref_slice %arg3[%248, %c0_i32_110] : memref<32x32xf32, #tpu.memory_space<any>> -> memref<1x32xf32, #tpu.memory_space<any>>
        %c18_i32_111 = arith.constant 18 : i32
        %c0_i32_112 = arith.constant 0 : i32
        %250 = tpu.memref_slice %arg5[%c0_i32_107, %c18_i32_111, %c0_i32_112] : memref<2x32x32xf32, #tpu.memory_space<vmem>> -> memref<1x1x32xf32, #tpu.memory_space<vmem>>
        %251 = tpu.memref_squeeze %250 : memref<1x1x32xf32, #tpu.memory_space<vmem>> -> memref<1x32xf32, #tpu.memory_space<vmem>>
        %252 = tpu.memref_slice %arg6[%c0_i32_108, %c18_i32_109] : memref<2x32x!tpu.dma_semaphore, #tpu.memory_space<semaphore_mem>> -> memref<1x1x!tpu.dma_semaphore, #tpu.memory_space<semaphore_mem>>
        %253 = tpu.memref_squeeze %252 : memref<1x1x!tpu.dma_semaphore, #tpu.memory_space<semaphore_mem>> -> memref<!tpu.dma_semaphore, #tpu.memory_space<semaphore_mem>>
        tpu.enqueue_dma source(%249 : memref<1x32xf32, #tpu.memory_space<any>>) target(%251 : memref<1x32xf32, #tpu.memory_space<vmem>>) target_semaphore(%253 : memref<!tpu.dma_semaphore, #tpu.memory_space<semaphore_mem>>)
      } else {
      }
      %c19_i32_81 = arith.constant 19 : i32
      %209 = arith.cmpi sgt, %0, %c19_i32_81 : i32
      %210 = arith.extui %209 : i1 to i32
      %c0_i32_82 = arith.constant 0 : i32
      %211 = arith.cmpi ne, %210, %c0_i32_82 : i32
      scf.if %211 {
        %c19 = arith.constant 19 : index
        %248 = memref.load %arg1[%c19] : memref<32xi32, #tpu.memory_space<smem>>
        %c0_i32_107 = arith.constant 0 : i32
        %c0_i32_108 = arith.constant 0 : i32
        %c19_i32_109 = arith.constant 19 : i32
        %c0_i32_110 = arith.constant 0 : i32
        %249 = tpu.memref_slice %arg3[%248, %c0_i32_110] : memref<32x32xf32, #tpu.memory_space<any>> -> memref<1x32xf32, #tpu.memory_space<any>>
        %c19_i32_111 = arith.constant 19 : i32
        %c0_i32_112 = arith.constant 0 : i32
        %250 = tpu.memref_slice %arg5[%c0_i32_107, %c19_i32_111, %c0_i32_112] : memref<2x32x32xf32, #tpu.memory_space<vmem>> -> memref<1x1x32xf32, #tpu.memory_space<vmem>>
        %251 = tpu.memref_squeeze %250 : memref<1x1x32xf32, #tpu.memory_space<vmem>> -> memref<1x32xf32, #tpu.memory_space<vmem>>
        %252 = tpu.memref_slice %arg6[%c0_i32_108, %c19_i32_109] : memref<2x32x!tpu.dma_semaphore, #tpu.memory_space<semaphore_mem>> -> memref<1x1x!tpu.dma_semaphore, #tpu.memory_space<semaphore_mem>>
        %253 = tpu.memref_squeeze %252 : memref<1x1x!tpu.dma_semaphore, #tpu.memory_space<semaphore_mem>> -> memref<!tpu.dma_semaphore, #tpu.memory_space<semaphore_mem>>
        tpu.enqueue_dma source(%249 : memref<1x32xf32, #tpu.memory_space<any>>) target(%251 : memref<1x32xf32, #tpu.memory_space<vmem>>) target_semaphore(%253 : memref<!tpu.dma_semaphore, #tpu.memory_space<semaphore_mem>>)
      } else {
      }
      %c20_i32_83 = arith.constant 20 : i32
      %212 = arith.cmpi sgt, %0, %c20_i32_83 : i32
      %213 = arith.extui %212 : i1 to i32
      %c0_i32_84 = arith.constant 0 : i32
      %214 = arith.cmpi ne, %213, %c0_i32_84 : i32
      scf.if %214 {
        %c20 = arith.constant 20 : index
        %248 = memref.load %arg1[%c20] : memref<32xi32, #tpu.memory_space<smem>>
        %c0_i32_107 = arith.constant 0 : i32
        %c0_i32_108 = arith.constant 0 : i32
        %c20_i32_109 = arith.constant 20 : i32
        %c0_i32_110 = arith.constant 0 : i32
        %249 = tpu.memref_slice %arg3[%248, %c0_i32_110] : memref<32x32xf32, #tpu.memory_space<any>> -> memref<1x32xf32, #tpu.memory_space<any>>
        %c20_i32_111 = arith.constant 20 : i32
        %c0_i32_112 = arith.constant 0 : i32
        %250 = tpu.memref_slice %arg5[%c0_i32_107, %c20_i32_111, %c0_i32_112] : memref<2x32x32xf32, #tpu.memory_space<vmem>> -> memref<1x1x32xf32, #tpu.memory_space<vmem>>
        %251 = tpu.memref_squeeze %250 : memref<1x1x32xf32, #tpu.memory_space<vmem>> -> memref<1x32xf32, #tpu.memory_space<vmem>>
        %252 = tpu.memref_slice %arg6[%c0_i32_108, %c20_i32_109] : memref<2x32x!tpu.dma_semaphore, #tpu.memory_space<semaphore_mem>> -> memref<1x1x!tpu.dma_semaphore, #tpu.memory_space<semaphore_mem>>
        %253 = tpu.memref_squeeze %252 : memref<1x1x!tpu.dma_semaphore, #tpu.memory_space<semaphore_mem>> -> memref<!tpu.dma_semaphore, #tpu.memory_space<semaphore_mem>>
        tpu.enqueue_dma source(%249 : memref<1x32xf32, #tpu.memory_space<any>>) target(%251 : memref<1x32xf32, #tpu.memory_space<vmem>>) target_semaphore(%253 : memref<!tpu.dma_semaphore, #tpu.memory_space<semaphore_mem>>)
      } else {
      }
      %c21_i32_85 = arith.constant 21 : i32
      %215 = arith.cmpi sgt, %0, %c21_i32_85 : i32
      %216 = arith.extui %215 : i1 to i32
      %c0_i32_86 = arith.constant 0 : i32
      %217 = arith.cmpi ne, %216, %c0_i32_86 : i32
      scf.if %217 {
        %c21 = arith.constant 21 : index
        %248 = memref.load %arg1[%c21] : memref<32xi32, #tpu.memory_space<smem>>
        %c0_i32_107 = arith.constant 0 : i32
        %c0_i32_108 = arith.constant 0 : i32
        %c21_i32_109 = arith.constant 21 : i32
        %c0_i32_110 = arith.constant 0 : i32
        %249 = tpu.memref_slice %arg3[%248, %c0_i32_110] : memref<32x32xf32, #tpu.memory_space<any>> -> memref<1x32xf32, #tpu.memory_space<any>>
        %c21_i32_111 = arith.constant 21 : i32
        %c0_i32_112 = arith.constant 0 : i32
        %250 = tpu.memref_slice %arg5[%c0_i32_107, %c21_i32_111, %c0_i32_112] : memref<2x32x32xf32, #tpu.memory_space<vmem>> -> memref<1x1x32xf32, #tpu.memory_space<vmem>>
        %251 = tpu.memref_squeeze %250 : memref<1x1x32xf32, #tpu.memory_space<vmem>> -> memref<1x32xf32, #tpu.memory_space<vmem>>
        %252 = tpu.memref_slice %arg6[%c0_i32_108, %c21_i32_109] : memref<2x32x!tpu.dma_semaphore, #tpu.memory_space<semaphore_mem>> -> memref<1x1x!tpu.dma_semaphore, #tpu.memory_space<semaphore_mem>>
        %253 = tpu.memref_squeeze %252 : memref<1x1x!tpu.dma_semaphore, #tpu.memory_space<semaphore_mem>> -> memref<!tpu.dma_semaphore, #tpu.memory_space<semaphore_mem>>
        tpu.enqueue_dma source(%249 : memref<1x32xf32, #tpu.memory_space<any>>) target(%251 : memref<1x32xf32, #tpu.memory_space<vmem>>) target_semaphore(%253 : memref<!tpu.dma_semaphore, #tpu.memory_space<semaphore_mem>>)
      } else {
      }
      %c22_i32_87 = arith.constant 22 : i32
      %218 = arith.cmpi sgt, %0, %c22_i32_87 : i32
      %219 = arith.extui %218 : i1 to i32
      %c0_i32_88 = arith.constant 0 : i32
      %220 = arith.cmpi ne, %219, %c0_i32_88 : i32
      scf.if %220 {
        %c22 = arith.constant 22 : index
        %248 = memref.load %arg1[%c22] : memref<32xi32, #tpu.memory_space<smem>>
        %c0_i32_107 = arith.constant 0 : i32
        %c0_i32_108 = arith.constant 0 : i32
        %c22_i32_109 = arith.constant 22 : i32
        %c0_i32_110 = arith.constant 0 : i32
        %249 = tpu.memref_slice %arg3[%248, %c0_i32_110] : memref<32x32xf32, #tpu.memory_space<any>> -> memref<1x32xf32, #tpu.memory_space<any>>
        %c22_i32_111 = arith.constant 22 : i32
        %c0_i32_112 = arith.constant 0 : i32
        %250 = tpu.memref_slice %arg5[%c0_i32_107, %c22_i32_111, %c0_i32_112] : memref<2x32x32xf32, #tpu.memory_space<vmem>> -> memref<1x1x32xf32, #tpu.memory_space<vmem>>
        %251 = tpu.memref_squeeze %250 : memref<1x1x32xf32, #tpu.memory_space<vmem>> -> memref<1x32xf32, #tpu.memory_space<vmem>>
        %252 = tpu.memref_slice %arg6[%c0_i32_108, %c22_i32_109] : memref<2x32x!tpu.dma_semaphore, #tpu.memory_space<semaphore_mem>> -> memref<1x1x!tpu.dma_semaphore, #tpu.memory_space<semaphore_mem>>
        %253 = tpu.memref_squeeze %252 : memref<1x1x!tpu.dma_semaphore, #tpu.memory_space<semaphore_mem>> -> memref<!tpu.dma_semaphore, #tpu.memory_space<semaphore_mem>>
        tpu.enqueue_dma source(%249 : memref<1x32xf32, #tpu.memory_space<any>>) target(%251 : memref<1x32xf32, #tpu.memory_space<vmem>>) target_semaphore(%253 : memref<!tpu.dma_semaphore, #tpu.memory_space<semaphore_mem>>)
      } else {
      }
      %c23_i32_89 = arith.constant 23 : i32
      %221 = arith.cmpi sgt, %0, %c23_i32_89 : i32
      %222 = arith.extui %221 : i1 to i32
      %c0_i32_90 = arith.constant 0 : i32
      %223 = arith.cmpi ne, %222, %c0_i32_90 : i32
      scf.if %223 {
        %c23 = arith.constant 23 : index
        %248 = memref.load %arg1[%c23] : memref<32xi32, #tpu.memory_space<smem>>
        %c0_i32_107 = arith.constant 0 : i32
        %c0_i32_108 = arith.constant 0 : i32
        %c23_i32_109 = arith.constant 23 : i32
        %c0_i32_110 = arith.constant 0 : i32
        %249 = tpu.memref_slice %arg3[%248, %c0_i32_110] : memref<32x32xf32, #tpu.memory_space<any>> -> memref<1x32xf32, #tpu.memory_space<any>>
        %c23_i32_111 = arith.constant 23 : i32
        %c0_i32_112 = arith.constant 0 : i32
        %250 = tpu.memref_slice %arg5[%c0_i32_107, %c23_i32_111, %c0_i32_112] : memref<2x32x32xf32, #tpu.memory_space<vmem>> -> memref<1x1x32xf32, #tpu.memory_space<vmem>>
        %251 = tpu.memref_squeeze %250 : memref<1x1x32xf32, #tpu.memory_space<vmem>> -> memref<1x32xf32, #tpu.memory_space<vmem>>
        %252 = tpu.memref_slice %arg6[%c0_i32_108, %c23_i32_109] : memref<2x32x!tpu.dma_semaphore, #tpu.memory_space<semaphore_mem>> -> memref<1x1x!tpu.dma_semaphore, #tpu.memory_space<semaphore_mem>>
        %253 = tpu.memref_squeeze %252 : memref<1x1x!tpu.dma_semaphore, #tpu.memory_space<semaphore_mem>> -> memref<!tpu.dma_semaphore, #tpu.memory_space<semaphore_mem>>
        tpu.enqueue_dma source(%249 : memref<1x32xf32, #tpu.memory_space<any>>) target(%251 : memref<1x32xf32, #tpu.memory_space<vmem>>) target_semaphore(%253 : memref<!tpu.dma_semaphore, #tpu.memory_space<semaphore_mem>>)
      } else {
      }
      %c24_i32_91 = arith.constant 24 : i32
      %224 = arith.cmpi sgt, %0, %c24_i32_91 : i32
      %225 = arith.extui %224 : i1 to i32
      %c0_i32_92 = arith.constant 0 : i32
      %226 = arith.cmpi ne, %225, %c0_i32_92 : i32
      scf.if %226 {
        %c24 = arith.constant 24 : index
        %248 = memref.load %arg1[%c24] : memref<32xi32, #tpu.memory_space<smem>>
        %c0_i32_107 = arith.constant 0 : i32
        %c0_i32_108 = arith.constant 0 : i32
        %c24_i32_109 = arith.constant 24 : i32
        %c0_i32_110 = arith.constant 0 : i32
        %249 = tpu.memref_slice %arg3[%248, %c0_i32_110] : memref<32x32xf32, #tpu.memory_space<any>> -> memref<1x32xf32, #tpu.memory_space<any>>
        %c24_i32_111 = arith.constant 24 : i32
        %c0_i32_112 = arith.constant 0 : i32
        %250 = tpu.memref_slice %arg5[%c0_i32_107, %c24_i32_111, %c0_i32_112] : memref<2x32x32xf32, #tpu.memory_space<vmem>> -> memref<1x1x32xf32, #tpu.memory_space<vmem>>
        %251 = tpu.memref_squeeze %250 : memref<1x1x32xf32, #tpu.memory_space<vmem>> -> memref<1x32xf32, #tpu.memory_space<vmem>>
        %252 = tpu.memref_slice %arg6[%c0_i32_108, %c24_i32_109] : memref<2x32x!tpu.dma_semaphore, #tpu.memory_space<semaphore_mem>> -> memref<1x1x!tpu.dma_semaphore, #tpu.memory_space<semaphore_mem>>
        %253 = tpu.memref_squeeze %252 : memref<1x1x!tpu.dma_semaphore, #tpu.memory_space<semaphore_mem>> -> memref<!tpu.dma_semaphore, #tpu.memory_space<semaphore_mem>>
        tpu.enqueue_dma source(%249 : memref<1x32xf32, #tpu.memory_space<any>>) target(%251 : memref<1x32xf32, #tpu.memory_space<vmem>>) target_semaphore(%253 : memref<!tpu.dma_semaphore, #tpu.memory_space<semaphore_mem>>)
      } else {
      }
      %c25_i32_93 = arith.constant 25 : i32
      %227 = arith.cmpi sgt, %0, %c25_i32_93 : i32
      %228 = arith.extui %227 : i1 to i32
      %c0_i32_94 = arith.constant 0 : i32
      %229 = arith.cmpi ne, %228, %c0_i32_94 : i32
      scf.if %229 {
        %c25 = arith.constant 25 : index
        %248 = memref.load %arg1[%c25] : memref<32xi32, #tpu.memory_space<smem>>
        %c0_i32_107 = arith.constant 0 : i32
        %c0_i32_108 = arith.constant 0 : i32
        %c25_i32_109 = arith.constant 25 : i32
        %c0_i32_110 = arith.constant 0 : i32
        %249 = tpu.memref_slice %arg3[%248, %c0_i32_110] : memref<32x32xf32, #tpu.memory_space<any>> -> memref<1x32xf32, #tpu.memory_space<any>>
        %c25_i32_111 = arith.constant 25 : i32
        %c0_i32_112 = arith.constant 0 : i32
        %250 = tpu.memref_slice %arg5[%c0_i32_107, %c25_i32_111, %c0_i32_112] : memref<2x32x32xf32, #tpu.memory_space<vmem>> -> memref<1x1x32xf32, #tpu.memory_space<vmem>>
        %251 = tpu.memref_squeeze %250 : memref<1x1x32xf32, #tpu.memory_space<vmem>> -> memref<1x32xf32, #tpu.memory_space<vmem>>
        %252 = tpu.memref_slice %arg6[%c0_i32_108, %c25_i32_109] : memref<2x32x!tpu.dma_semaphore, #tpu.memory_space<semaphore_mem>> -> memref<1x1x!tpu.dma_semaphore, #tpu.memory_space<semaphore_mem>>
        %253 = tpu.memref_squeeze %252 : memref<1x1x!tpu.dma_semaphore, #tpu.memory_space<semaphore_mem>> -> memref<!tpu.dma_semaphore, #tpu.memory_space<semaphore_mem>>
        tpu.enqueue_dma source(%249 : memref<1x32xf32, #tpu.memory_space<any>>) target(%251 : memref<1x32xf32, #tpu.memory_space<vmem>>) target_semaphore(%253 : memref<!tpu.dma_semaphore, #tpu.memory_space<semaphore_mem>>)
      } else {
      }
      %c26_i32_95 = arith.constant 26 : i32
      %230 = arith.cmpi sgt, %0, %c26_i32_95 : i32
      %231 = arith.extui %230 : i1 to i32
      %c0_i32_96 = arith.constant 0 : i32
      %232 = arith.cmpi ne, %231, %c0_i32_96 : i32
      scf.if %232 {
        %c26 = arith.constant 26 : index
        %248 = memref.load %arg1[%c26] : memref<32xi32, #tpu.memory_space<smem>>
        %c0_i32_107 = arith.constant 0 : i32
        %c0_i32_108 = arith.constant 0 : i32
        %c26_i32_109 = arith.constant 26 : i32
        %c0_i32_110 = arith.constant 0 : i32
        %249 = tpu.memref_slice %arg3[%248, %c0_i32_110] : memref<32x32xf32, #tpu.memory_space<any>> -> memref<1x32xf32, #tpu.memory_space<any>>
        %c26_i32_111 = arith.constant 26 : i32
        %c0_i32_112 = arith.constant 0 : i32
        %250 = tpu.memref_slice %arg5[%c0_i32_107, %c26_i32_111, %c0_i32_112] : memref<2x32x32xf32, #tpu.memory_space<vmem>> -> memref<1x1x32xf32, #tpu.memory_space<vmem>>
        %251 = tpu.memref_squeeze %250 : memref<1x1x32xf32, #tpu.memory_space<vmem>> -> memref<1x32xf32, #tpu.memory_space<vmem>>
        %252 = tpu.memref_slice %arg6[%c0_i32_108, %c26_i32_109] : memref<2x32x!tpu.dma_semaphore, #tpu.memory_space<semaphore_mem>> -> memref<1x1x!tpu.dma_semaphore, #tpu.memory_space<semaphore_mem>>
        %253 = tpu.memref_squeeze %252 : memref<1x1x!tpu.dma_semaphore, #tpu.memory_space<semaphore_mem>> -> memref<!tpu.dma_semaphore, #tpu.memory_space<semaphore_mem>>
        tpu.enqueue_dma source(%249 : memref<1x32xf32, #tpu.memory_space<any>>) target(%251 : memref<1x32xf32, #tpu.memory_space<vmem>>) target_semaphore(%253 : memref<!tpu.dma_semaphore, #tpu.memory_space<semaphore_mem>>)
      } else {
      }
      %c27_i32_97 = arith.constant 27 : i32
      %233 = arith.cmpi sgt, %0, %c27_i32_97 : i32
      %234 = arith.extui %233 : i1 to i32
      %c0_i32_98 = arith.constant 0 : i32
      %235 = arith.cmpi ne, %234, %c0_i32_98 : i32
      scf.if %235 {
        %c27 = arith.constant 27 : index
        %248 = memref.load %arg1[%c27] : memref<32xi32, #tpu.memory_space<smem>>
        %c0_i32_107 = arith.constant 0 : i32
        %c0_i32_108 = arith.constant 0 : i32
        %c27_i32_109 = arith.constant 27 : i32
        %c0_i32_110 = arith.constant 0 : i32
        %249 = tpu.memref_slice %arg3[%248, %c0_i32_110] : memref<32x32xf32, #tpu.memory_space<any>> -> memref<1x32xf32, #tpu.memory_space<any>>
        %c27_i32_111 = arith.constant 27 : i32
        %c0_i32_112 = arith.constant 0 : i32
        %250 = tpu.memref_slice %arg5[%c0_i32_107, %c27_i32_111, %c0_i32_112] : memref<2x32x32xf32, #tpu.memory_space<vmem>> -> memref<1x1x32xf32, #tpu.memory_space<vmem>>
        %251 = tpu.memref_squeeze %250 : memref<1x1x32xf32, #tpu.memory_space<vmem>> -> memref<1x32xf32, #tpu.memory_space<vmem>>
        %252 = tpu.memref_slice %arg6[%c0_i32_108, %c27_i32_109] : memref<2x32x!tpu.dma_semaphore, #tpu.memory_space<semaphore_mem>> -> memref<1x1x!tpu.dma_semaphore, #tpu.memory_space<semaphore_mem>>
        %253 = tpu.memref_squeeze %252 : memref<1x1x!tpu.dma_semaphore, #tpu.memory_space<semaphore_mem>> -> memref<!tpu.dma_semaphore, #tpu.memory_space<semaphore_mem>>
        tpu.enqueue_dma source(%249 : memref<1x32xf32, #tpu.memory_space<any>>) target(%251 : memref<1x32xf32, #tpu.memory_space<vmem>>) target_semaphore(%253 : memref<!tpu.dma_semaphore, #tpu.memory_space<semaphore_mem>>)
      } else {
      }
      %c28_i32_99 = arith.constant 28 : i32
      %236 = arith.cmpi sgt, %0, %c28_i32_99 : i32
      %237 = arith.extui %236 : i1 to i32
      %c0_i32_100 = arith.constant 0 : i32
      %238 = arith.cmpi ne, %237, %c0_i32_100 : i32
      scf.if %238 {
        %c28 = arith.constant 28 : index
        %248 = memref.load %arg1[%c28] : memref<32xi32, #tpu.memory_space<smem>>
        %c0_i32_107 = arith.constant 0 : i32
        %c0_i32_108 = arith.constant 0 : i32
        %c28_i32_109 = arith.constant 28 : i32
        %c0_i32_110 = arith.constant 0 : i32
        %249 = tpu.memref_slice %arg3[%248, %c0_i32_110] : memref<32x32xf32, #tpu.memory_space<any>> -> memref<1x32xf32, #tpu.memory_space<any>>
        %c28_i32_111 = arith.constant 28 : i32
        %c0_i32_112 = arith.constant 0 : i32
        %250 = tpu.memref_slice %arg5[%c0_i32_107, %c28_i32_111, %c0_i32_112] : memref<2x32x32xf32, #tpu.memory_space<vmem>> -> memref<1x1x32xf32, #tpu.memory_space<vmem>>
        %251 = tpu.memref_squeeze %250 : memref<1x1x32xf32, #tpu.memory_space<vmem>> -> memref<1x32xf32, #tpu.memory_space<vmem>>
        %252 = tpu.memref_slice %arg6[%c0_i32_108, %c28_i32_109] : memref<2x32x!tpu.dma_semaphore, #tpu.memory_space<semaphore_mem>> -> memref<1x1x!tpu.dma_semaphore, #tpu.memory_space<semaphore_mem>>
        %253 = tpu.memref_squeeze %252 : memref<1x1x!tpu.dma_semaphore, #tpu.memory_space<semaphore_mem>> -> memref<!tpu.dma_semaphore, #tpu.memory_space<semaphore_mem>>
        tpu.enqueue_dma source(%249 : memref<1x32xf32, #tpu.memory_space<any>>) target(%251 : memref<1x32xf32, #tpu.memory_space<vmem>>) target_semaphore(%253 : memref<!tpu.dma_semaphore, #tpu.memory_space<semaphore_mem>>)
      } else {
      }
      %c29_i32_101 = arith.constant 29 : i32
      %239 = arith.cmpi sgt, %0, %c29_i32_101 : i32
      %240 = arith.extui %239 : i1 to i32
      %c0_i32_102 = arith.constant 0 : i32
      %241 = arith.cmpi ne, %240, %c0_i32_102 : i32
      scf.if %241 {
        %c29 = arith.constant 29 : index
        %248 = memref.load %arg1[%c29] : memref<32xi32, #tpu.memory_space<smem>>
        %c0_i32_107 = arith.constant 0 : i32
        %c0_i32_108 = arith.constant 0 : i32
        %c29_i32_109 = arith.constant 29 : i32
        %c0_i32_110 = arith.constant 0 : i32
        %249 = tpu.memref_slice %arg3[%248, %c0_i32_110] : memref<32x32xf32, #tpu.memory_space<any>> -> memref<1x32xf32, #tpu.memory_space<any>>
        %c29_i32_111 = arith.constant 29 : i32
        %c0_i32_112 = arith.constant 0 : i32
        %250 = tpu.memref_slice %arg5[%c0_i32_107, %c29_i32_111, %c0_i32_112] : memref<2x32x32xf32, #tpu.memory_space<vmem>> -> memref<1x1x32xf32, #tpu.memory_space<vmem>>
        %251 = tpu.memref_squeeze %250 : memref<1x1x32xf32, #tpu.memory_space<vmem>> -> memref<1x32xf32, #tpu.memory_space<vmem>>
        %252 = tpu.memref_slice %arg6[%c0_i32_108, %c29_i32_109] : memref<2x32x!tpu.dma_semaphore, #tpu.memory_space<semaphore_mem>> -> memref<1x1x!tpu.dma_semaphore, #tpu.memory_space<semaphore_mem>>
        %253 = tpu.memref_squeeze %252 : memref<1x1x!tpu.dma_semaphore, #tpu.memory_space<semaphore_mem>> -> memref<!tpu.dma_semaphore, #tpu.memory_space<semaphore_mem>>
        tpu.enqueue_dma source(%249 : memref<1x32xf32, #tpu.memory_space<any>>) target(%251 : memref<1x32xf32, #tpu.memory_space<vmem>>) target_semaphore(%253 : memref<!tpu.dma_semaphore, #tpu.memory_space<semaphore_mem>>)
      } else {
      }
      %c30_i32_103 = arith.constant 30 : i32
      %242 = arith.cmpi sgt, %0, %c30_i32_103 : i32
      %243 = arith.extui %242 : i1 to i32
      %c0_i32_104 = arith.constant 0 : i32
      %244 = arith.cmpi ne, %243, %c0_i32_104 : i32
      scf.if %244 {
        %c30 = arith.constant 30 : index
        %248 = memref.load %arg1[%c30] : memref<32xi32, #tpu.memory_space<smem>>
        %c0_i32_107 = arith.constant 0 : i32
        %c0_i32_108 = arith.constant 0 : i32
        %c30_i32_109 = arith.constant 30 : i32
        %c0_i32_110 = arith.constant 0 : i32
        %249 = tpu.memref_slice %arg3[%248, %c0_i32_110] : memref<32x32xf32, #tpu.memory_space<any>> -> memref<1x32xf32, #tpu.memory_space<any>>
        %c30_i32_111 = arith.constant 30 : i32
        %c0_i32_112 = arith.constant 0 : i32
        %250 = tpu.memref_slice %arg5[%c0_i32_107, %c30_i32_111, %c0_i32_112] : memref<2x32x32xf32, #tpu.memory_space<vmem>> -> memref<1x1x32xf32, #tpu.memory_space<vmem>>
        %251 = tpu.memref_squeeze %250 : memref<1x1x32xf32, #tpu.memory_space<vmem>> -> memref<1x32xf32, #tpu.memory_space<vmem>>
        %252 = tpu.memref_slice %arg6[%c0_i32_108, %c30_i32_109] : memref<2x32x!tpu.dma_semaphore, #tpu.memory_space<semaphore_mem>> -> memref<1x1x!tpu.dma_semaphore, #tpu.memory_space<semaphore_mem>>
        %253 = tpu.memref_squeeze %252 : memref<1x1x!tpu.dma_semaphore, #tpu.memory_space<semaphore_mem>> -> memref<!tpu.dma_semaphore, #tpu.memory_space<semaphore_mem>>
        tpu.enqueue_dma source(%249 : memref<1x32xf32, #tpu.memory_space<any>>) target(%251 : memref<1x32xf32, #tpu.memory_space<vmem>>) target_semaphore(%253 : memref<!tpu.dma_semaphore, #tpu.memory_space<semaphore_mem>>)
      } else {
      }
      %c31_i32_105 = arith.constant 31 : i32
      %245 = arith.cmpi sgt, %0, %c31_i32_105 : i32
      %246 = arith.extui %245 : i1 to i32
      %c0_i32_106 = arith.constant 0 : i32
      %247 = arith.cmpi ne, %246, %c0_i32_106 : i32
      scf.if %247 {
        %c31 = arith.constant 31 : index
        %248 = memref.load %arg1[%c31] : memref<32xi32, #tpu.memory_space<smem>>
        %c0_i32_107 = arith.constant 0 : i32
        %c0_i32_108 = arith.constant 0 : i32
        %c31_i32_109 = arith.constant 31 : i32
        %c0_i32_110 = arith.constant 0 : i32
        %249 = tpu.memref_slice %arg3[%248, %c0_i32_110] : memref<32x32xf32, #tpu.memory_space<any>> -> memref<1x32xf32, #tpu.memory_space<any>>
        %c31_i32_111 = arith.constant 31 : i32
        %c0_i32_112 = arith.constant 0 : i32
        %250 = tpu.memref_slice %arg5[%c0_i32_107, %c31_i32_111, %c0_i32_112] : memref<2x32x32xf32, #tpu.memory_space<vmem>> -> memref<1x1x32xf32, #tpu.memory_space<vmem>>
        %251 = tpu.memref_squeeze %250 : memref<1x1x32xf32, #tpu.memory_space<vmem>> -> memref<1x32xf32, #tpu.memory_space<vmem>>
        %252 = tpu.memref_slice %arg6[%c0_i32_108, %c31_i32_109] : memref<2x32x!tpu.dma_semaphore, #tpu.memory_space<semaphore_mem>> -> memref<1x1x!tpu.dma_semaphore, #tpu.memory_space<semaphore_mem>>
        %253 = tpu.memref_squeeze %252 : memref<1x1x!tpu.dma_semaphore, #tpu.memory_space<semaphore_mem>> -> memref<!tpu.dma_semaphore, #tpu.memory_space<semaphore_mem>>
        tpu.enqueue_dma source(%249 : memref<1x32xf32, #tpu.memory_space<any>>) target(%251 : memref<1x32xf32, #tpu.memory_space<vmem>>) target_semaphore(%253 : memref<!tpu.dma_semaphore, #tpu.memory_space<semaphore_mem>>)
      } else {
      }
    } else {
    }
    %c1_i32 = arith.constant 1 : i32
    %5 = arith.addi %arg0, %c1_i32 : i32
    %c1_i32_1 = arith.constant 1 : i32
    %6 = arith.cmpi slt, %5, %c1_i32_1 : i32
    %7 = arith.extui %6 : i1 to i32
    %c0_i32_2 = arith.constant 0 : i32
    %8 = arith.cmpi ne, %7, %c0_i32_2 : i32
    scf.if %8 {
      %c1_i32_43 = arith.constant 1 : i32
      %152 = arith.addi %arg0, %c1_i32_43 : i32
      %c32_i32_44 = arith.constant 32 : i32
      %153 = arith.muli %152, %c32_i32_44 : i32
      %c1_i32_45 = arith.constant 1 : i32
      %154 = arith.subi %c1_i32_45, %1 : i32
      %c0_i32_46 = arith.constant 0 : i32
      %155 = arith.addi %153, %c0_i32_46 : i32
      %156 = arith.cmpi slt, %155, %0 : i32
      %157 = arith.extui %156 : i1 to i32
      %c0_i32_47 = arith.constant 0 : i32
      %158 = arith.cmpi ne, %157, %c0_i32_47 : i32
      scf.if %158 {
        %283 = arith.index_cast %155 : i32 to index
        %284 = memref.load %arg1[%283] : memref<32xi32, #tpu.memory_space<smem>>
        %c0_i32_110 = arith.constant 0 : i32
        %c0_i32_111 = arith.constant 0 : i32
        %285 = tpu.memref_slice %arg3[%284, %c0_i32_111] : memref<32x32xf32, #tpu.memory_space<any>> -> memref<1x32xf32, #tpu.memory_space<any>>
        %c0_i32_112 = arith.constant 0 : i32
        %c0_i32_113 = arith.constant 0 : i32
        %286 = tpu.memref_slice %arg5[%154, %c0_i32_112, %c0_i32_113] : memref<2x32x32xf32, #tpu.memory_space<vmem>> -> memref<1x1x32xf32, #tpu.memory_space<vmem>>
        %287 = tpu.memref_squeeze %286 : memref<1x1x32xf32, #tpu.memory_space<vmem>> -> memref<1x32xf32, #tpu.memory_space<vmem>>
        %288 = tpu.memref_slice %arg6[%154, %c0_i32_110] : memref<2x32x!tpu.dma_semaphore, #tpu.memory_space<semaphore_mem>> -> memref<1x1x!tpu.dma_semaphore, #tpu.memory_space<semaphore_mem>>
        %289 = tpu.memref_squeeze %288 : memref<1x1x!tpu.dma_semaphore, #tpu.memory_space<semaphore_mem>> -> memref<!tpu.dma_semaphore, #tpu.memory_space<semaphore_mem>>
        tpu.enqueue_dma source(%285 : memref<1x32xf32, #tpu.memory_space<any>>) target(%287 : memref<1x32xf32, #tpu.memory_space<vmem>>) target_semaphore(%289 : memref<!tpu.dma_semaphore, #tpu.memory_space<semaphore_mem>>)
      } else {
      }
      %c1_i32_48 = arith.constant 1 : i32
      %159 = arith.addi %153, %c1_i32_48 : i32
      %160 = arith.cmpi slt, %159, %0 : i32
      %161 = arith.extui %160 : i1 to i32
      %c0_i32_49 = arith.constant 0 : i32
      %162 = arith.cmpi ne, %161, %c0_i32_49 : i32
      scf.if %162 {
        %283 = arith.index_cast %159 : i32 to index
        %284 = memref.load %arg1[%283] : memref<32xi32, #tpu.memory_space<smem>>
        %c1_i32_110 = arith.constant 1 : i32
        %c0_i32_111 = arith.constant 0 : i32
        %285 = tpu.memref_slice %arg3[%284, %c0_i32_111] : memref<32x32xf32, #tpu.memory_space<any>> -> memref<1x32xf32, #tpu.memory_space<any>>
        %c1_i32_112 = arith.constant 1 : i32
        %c0_i32_113 = arith.constant 0 : i32
        %286 = tpu.memref_slice %arg5[%154, %c1_i32_112, %c0_i32_113] : memref<2x32x32xf32, #tpu.memory_space<vmem>> -> memref<1x1x32xf32, #tpu.memory_space<vmem>>
        %287 = tpu.memref_squeeze %286 : memref<1x1x32xf32, #tpu.memory_space<vmem>> -> memref<1x32xf32, #tpu.memory_space<vmem>>
        %288 = tpu.memref_slice %arg6[%154, %c1_i32_110] : memref<2x32x!tpu.dma_semaphore, #tpu.memory_space<semaphore_mem>> -> memref<1x1x!tpu.dma_semaphore, #tpu.memory_space<semaphore_mem>>
        %289 = tpu.memref_squeeze %288 : memref<1x1x!tpu.dma_semaphore, #tpu.memory_space<semaphore_mem>> -> memref<!tpu.dma_semaphore, #tpu.memory_space<semaphore_mem>>
        tpu.enqueue_dma source(%285 : memref<1x32xf32, #tpu.memory_space<any>>) target(%287 : memref<1x32xf32, #tpu.memory_space<vmem>>) target_semaphore(%289 : memref<!tpu.dma_semaphore, #tpu.memory_space<semaphore_mem>>)
      } else {
      }
      %c2_i32_50 = arith.constant 2 : i32
      %163 = arith.addi %153, %c2_i32_50 : i32
      %164 = arith.cmpi slt, %163, %0 : i32
      %165 = arith.extui %164 : i1 to i32
      %c0_i32_51 = arith.constant 0 : i32
      %166 = arith.cmpi ne, %165, %c0_i32_51 : i32
      scf.if %166 {
        %283 = arith.index_cast %163 : i32 to index
        %284 = memref.load %arg1[%283] : memref<32xi32, #tpu.memory_space<smem>>
        %c2_i32_110 = arith.constant 2 : i32
        %c0_i32_111 = arith.constant 0 : i32
        %285 = tpu.memref_slice %arg3[%284, %c0_i32_111] : memref<32x32xf32, #tpu.memory_space<any>> -> memref<1x32xf32, #tpu.memory_space<any>>
        %c2_i32_112 = arith.constant 2 : i32
        %c0_i32_113 = arith.constant 0 : i32
        %286 = tpu.memref_slice %arg5[%154, %c2_i32_112, %c0_i32_113] : memref<2x32x32xf32, #tpu.memory_space<vmem>> -> memref<1x1x32xf32, #tpu.memory_space<vmem>>
        %287 = tpu.memref_squeeze %286 : memref<1x1x32xf32, #tpu.memory_space<vmem>> -> memref<1x32xf32, #tpu.memory_space<vmem>>
        %288 = tpu.memref_slice %arg6[%154, %c2_i32_110] : memref<2x32x!tpu.dma_semaphore, #tpu.memory_space<semaphore_mem>> -> memref<1x1x!tpu.dma_semaphore, #tpu.memory_space<semaphore_mem>>
        %289 = tpu.memref_squeeze %288 : memref<1x1x!tpu.dma_semaphore, #tpu.memory_space<semaphore_mem>> -> memref<!tpu.dma_semaphore, #tpu.memory_space<semaphore_mem>>
        tpu.enqueue_dma source(%285 : memref<1x32xf32, #tpu.memory_space<any>>) target(%287 : memref<1x32xf32, #tpu.memory_space<vmem>>) target_semaphore(%289 : memref<!tpu.dma_semaphore, #tpu.memory_space<semaphore_mem>>)
      } else {
      }
      %c3_i32_52 = arith.constant 3 : i32
      %167 = arith.addi %153, %c3_i32_52 : i32
      %168 = arith.cmpi slt, %167, %0 : i32
      %169 = arith.extui %168 : i1 to i32
      %c0_i32_53 = arith.constant 0 : i32
      %170 = arith.cmpi ne, %169, %c0_i32_53 : i32
      scf.if %170 {
        %283 = arith.index_cast %167 : i32 to index
        %284 = memref.load %arg1[%283] : memref<32xi32, #tpu.memory_space<smem>>
        %c3_i32_110 = arith.constant 3 : i32
        %c0_i32_111 = arith.constant 0 : i32
        %285 = tpu.memref_slice %arg3[%284, %c0_i32_111] : memref<32x32xf32, #tpu.memory_space<any>> -> memref<1x32xf32, #tpu.memory_space<any>>
        %c3_i32_112 = arith.constant 3 : i32
        %c0_i32_113 = arith.constant 0 : i32
        %286 = tpu.memref_slice %arg5[%154, %c3_i32_112, %c0_i32_113] : memref<2x32x32xf32, #tpu.memory_space<vmem>> -> memref<1x1x32xf32, #tpu.memory_space<vmem>>
        %287 = tpu.memref_squeeze %286 : memref<1x1x32xf32, #tpu.memory_space<vmem>> -> memref<1x32xf32, #tpu.memory_space<vmem>>
        %288 = tpu.memref_slice %arg6[%154, %c3_i32_110] : memref<2x32x!tpu.dma_semaphore, #tpu.memory_space<semaphore_mem>> -> memref<1x1x!tpu.dma_semaphore, #tpu.memory_space<semaphore_mem>>
        %289 = tpu.memref_squeeze %288 : memref<1x1x!tpu.dma_semaphore, #tpu.memory_space<semaphore_mem>> -> memref<!tpu.dma_semaphore, #tpu.memory_space<semaphore_mem>>
        tpu.enqueue_dma source(%285 : memref<1x32xf32, #tpu.memory_space<any>>) target(%287 : memref<1x32xf32, #tpu.memory_space<vmem>>) target_semaphore(%289 : memref<!tpu.dma_semaphore, #tpu.memory_space<semaphore_mem>>)
      } else {
      }
      %c4_i32_54 = arith.constant 4 : i32
      %171 = arith.addi %153, %c4_i32_54 : i32
      %172 = arith.cmpi slt, %171, %0 : i32
      %173 = arith.extui %172 : i1 to i32
      %c0_i32_55 = arith.constant 0 : i32
      %174 = arith.cmpi ne, %173, %c0_i32_55 : i32
      scf.if %174 {
        %283 = arith.index_cast %171 : i32 to index
        %284 = memref.load %arg1[%283] : memref<32xi32, #tpu.memory_space<smem>>
        %c4_i32_110 = arith.constant 4 : i32
        %c0_i32_111 = arith.constant 0 : i32
        %285 = tpu.memref_slice %arg3[%284, %c0_i32_111] : memref<32x32xf32, #tpu.memory_space<any>> -> memref<1x32xf32, #tpu.memory_space<any>>
        %c4_i32_112 = arith.constant 4 : i32
        %c0_i32_113 = arith.constant 0 : i32
        %286 = tpu.memref_slice %arg5[%154, %c4_i32_112, %c0_i32_113] : memref<2x32x32xf32, #tpu.memory_space<vmem>> -> memref<1x1x32xf32, #tpu.memory_space<vmem>>
        %287 = tpu.memref_squeeze %286 : memref<1x1x32xf32, #tpu.memory_space<vmem>> -> memref<1x32xf32, #tpu.memory_space<vmem>>
        %288 = tpu.memref_slice %arg6[%154, %c4_i32_110] : memref<2x32x!tpu.dma_semaphore, #tpu.memory_space<semaphore_mem>> -> memref<1x1x!tpu.dma_semaphore, #tpu.memory_space<semaphore_mem>>
        %289 = tpu.memref_squeeze %288 : memref<1x1x!tpu.dma_semaphore, #tpu.memory_space<semaphore_mem>> -> memref<!tpu.dma_semaphore, #tpu.memory_space<semaphore_mem>>
        tpu.enqueue_dma source(%285 : memref<1x32xf32, #tpu.memory_space<any>>) target(%287 : memref<1x32xf32, #tpu.memory_space<vmem>>) target_semaphore(%289 : memref<!tpu.dma_semaphore, #tpu.memory_space<semaphore_mem>>)
      } else {
      }
      %c5_i32_56 = arith.constant 5 : i32
      %175 = arith.addi %153, %c5_i32_56 : i32
      %176 = arith.cmpi slt, %175, %0 : i32
      %177 = arith.extui %176 : i1 to i32
      %c0_i32_57 = arith.constant 0 : i32
      %178 = arith.cmpi ne, %177, %c0_i32_57 : i32
      scf.if %178 {
        %283 = arith.index_cast %175 : i32 to index
        %284 = memref.load %arg1[%283] : memref<32xi32, #tpu.memory_space<smem>>
        %c5_i32_110 = arith.constant 5 : i32
        %c0_i32_111 = arith.constant 0 : i32
        %285 = tpu.memref_slice %arg3[%284, %c0_i32_111] : memref<32x32xf32, #tpu.memory_space<any>> -> memref<1x32xf32, #tpu.memory_space<any>>
        %c5_i32_112 = arith.constant 5 : i32
        %c0_i32_113 = arith.constant 0 : i32
        %286 = tpu.memref_slice %arg5[%154, %c5_i32_112, %c0_i32_113] : memref<2x32x32xf32, #tpu.memory_space<vmem>> -> memref<1x1x32xf32, #tpu.memory_space<vmem>>
        %287 = tpu.memref_squeeze %286 : memref<1x1x32xf32, #tpu.memory_space<vmem>> -> memref<1x32xf32, #tpu.memory_space<vmem>>
        %288 = tpu.memref_slice %arg6[%154, %c5_i32_110] : memref<2x32x!tpu.dma_semaphore, #tpu.memory_space<semaphore_mem>> -> memref<1x1x!tpu.dma_semaphore, #tpu.memory_space<semaphore_mem>>
        %289 = tpu.memref_squeeze %288 : memref<1x1x!tpu.dma_semaphore, #tpu.memory_space<semaphore_mem>> -> memref<!tpu.dma_semaphore, #tpu.memory_space<semaphore_mem>>
        tpu.enqueue_dma source(%285 : memref<1x32xf32, #tpu.memory_space<any>>) target(%287 : memref<1x32xf32, #tpu.memory_space<vmem>>) target_semaphore(%289 : memref<!tpu.dma_semaphore, #tpu.memory_space<semaphore_mem>>)
      } else {
      }
      %c6_i32_58 = arith.constant 6 : i32
      %179 = arith.addi %153, %c6_i32_58 : i32
      %180 = arith.cmpi slt, %179, %0 : i32
      %181 = arith.extui %180 : i1 to i32
      %c0_i32_59 = arith.constant 0 : i32
      %182 = arith.cmpi ne, %181, %c0_i32_59 : i32
      scf.if %182 {
        %283 = arith.index_cast %179 : i32 to index
        %284 = memref.load %arg1[%283] : memref<32xi32, #tpu.memory_space<smem>>
        %c6_i32_110 = arith.constant 6 : i32
        %c0_i32_111 = arith.constant 0 : i32
        %285 = tpu.memref_slice %arg3[%284, %c0_i32_111] : memref<32x32xf32, #tpu.memory_space<any>> -> memref<1x32xf32, #tpu.memory_space<any>>
        %c6_i32_112 = arith.constant 6 : i32
        %c0_i32_113 = arith.constant 0 : i32
        %286 = tpu.memref_slice %arg5[%154, %c6_i32_112, %c0_i32_113] : memref<2x32x32xf32, #tpu.memory_space<vmem>> -> memref<1x1x32xf32, #tpu.memory_space<vmem>>
        %287 = tpu.memref_squeeze %286 : memref<1x1x32xf32, #tpu.memory_space<vmem>> -> memref<1x32xf32, #tpu.memory_space<vmem>>
        %288 = tpu.memref_slice %arg6[%154, %c6_i32_110] : memref<2x32x!tpu.dma_semaphore, #tpu.memory_space<semaphore_mem>> -> memref<1x1x!tpu.dma_semaphore, #tpu.memory_space<semaphore_mem>>
        %289 = tpu.memref_squeeze %288 : memref<1x1x!tpu.dma_semaphore, #tpu.memory_space<semaphore_mem>> -> memref<!tpu.dma_semaphore, #tpu.memory_space<semaphore_mem>>
        tpu.enqueue_dma source(%285 : memref<1x32xf32, #tpu.memory_space<any>>) target(%287 : memref<1x32xf32, #tpu.memory_space<vmem>>) target_semaphore(%289 : memref<!tpu.dma_semaphore, #tpu.memory_space<semaphore_mem>>)
      } else {
      }
      %c7_i32_60 = arith.constant 7 : i32
      %183 = arith.addi %153, %c7_i32_60 : i32
      %184 = arith.cmpi slt, %183, %0 : i32
      %185 = arith.extui %184 : i1 to i32
      %c0_i32_61 = arith.constant 0 : i32
      %186 = arith.cmpi ne, %185, %c0_i32_61 : i32
      scf.if %186 {
        %283 = arith.index_cast %183 : i32 to index
        %284 = memref.load %arg1[%283] : memref<32xi32, #tpu.memory_space<smem>>
        %c7_i32_110 = arith.constant 7 : i32
        %c0_i32_111 = arith.constant 0 : i32
        %285 = tpu.memref_slice %arg3[%284, %c0_i32_111] : memref<32x32xf32, #tpu.memory_space<any>> -> memref<1x32xf32, #tpu.memory_space<any>>
        %c7_i32_112 = arith.constant 7 : i32
        %c0_i32_113 = arith.constant 0 : i32
        %286 = tpu.memref_slice %arg5[%154, %c7_i32_112, %c0_i32_113] : memref<2x32x32xf32, #tpu.memory_space<vmem>> -> memref<1x1x32xf32, #tpu.memory_space<vmem>>
        %287 = tpu.memref_squeeze %286 : memref<1x1x32xf32, #tpu.memory_space<vmem>> -> memref<1x32xf32, #tpu.memory_space<vmem>>
        %288 = tpu.memref_slice %arg6[%154, %c7_i32_110] : memref<2x32x!tpu.dma_semaphore, #tpu.memory_space<semaphore_mem>> -> memref<1x1x!tpu.dma_semaphore, #tpu.memory_space<semaphore_mem>>
        %289 = tpu.memref_squeeze %288 : memref<1x1x!tpu.dma_semaphore, #tpu.memory_space<semaphore_mem>> -> memref<!tpu.dma_semaphore, #tpu.memory_space<semaphore_mem>>
        tpu.enqueue_dma source(%285 : memref<1x32xf32, #tpu.memory_space<any>>) target(%287 : memref<1x32xf32, #tpu.memory_space<vmem>>) target_semaphore(%289 : memref<!tpu.dma_semaphore, #tpu.memory_space<semaphore_mem>>)
      } else {
      }
      %c8_i32_62 = arith.constant 8 : i32
      %187 = arith.addi %153, %c8_i32_62 : i32
      %188 = arith.cmpi slt, %187, %0 : i32
      %189 = arith.extui %188 : i1 to i32
      %c0_i32_63 = arith.constant 0 : i32
      %190 = arith.cmpi ne, %189, %c0_i32_63 : i32
      scf.if %190 {
        %283 = arith.index_cast %187 : i32 to index
        %284 = memref.load %arg1[%283] : memref<32xi32, #tpu.memory_space<smem>>
        %c8_i32_110 = arith.constant 8 : i32
        %c0_i32_111 = arith.constant 0 : i32
        %285 = tpu.memref_slice %arg3[%284, %c0_i32_111] : memref<32x32xf32, #tpu.memory_space<any>> -> memref<1x32xf32, #tpu.memory_space<any>>
        %c8_i32_112 = arith.constant 8 : i32
        %c0_i32_113 = arith.constant 0 : i32
        %286 = tpu.memref_slice %arg5[%154, %c8_i32_112, %c0_i32_113] : memref<2x32x32xf32, #tpu.memory_space<vmem>> -> memref<1x1x32xf32, #tpu.memory_space<vmem>>
        %287 = tpu.memref_squeeze %286 : memref<1x1x32xf32, #tpu.memory_space<vmem>> -> memref<1x32xf32, #tpu.memory_space<vmem>>
        %288 = tpu.memref_slice %arg6[%154, %c8_i32_110] : memref<2x32x!tpu.dma_semaphore, #tpu.memory_space<semaphore_mem>> -> memref<1x1x!tpu.dma_semaphore, #tpu.memory_space<semaphore_mem>>
        %289 = tpu.memref_squeeze %288 : memref<1x1x!tpu.dma_semaphore, #tpu.memory_space<semaphore_mem>> -> memref<!tpu.dma_semaphore, #tpu.memory_space<semaphore_mem>>
        tpu.enqueue_dma source(%285 : memref<1x32xf32, #tpu.memory_space<any>>) target(%287 : memref<1x32xf32, #tpu.memory_space<vmem>>) target_semaphore(%289 : memref<!tpu.dma_semaphore, #tpu.memory_space<semaphore_mem>>)
      } else {
      }
      %c9_i32_64 = arith.constant 9 : i32
      %191 = arith.addi %153, %c9_i32_64 : i32
      %192 = arith.cmpi slt, %191, %0 : i32
      %193 = arith.extui %192 : i1 to i32
      %c0_i32_65 = arith.constant 0 : i32
      %194 = arith.cmpi ne, %193, %c0_i32_65 : i32
      scf.if %194 {
        %283 = arith.index_cast %191 : i32 to index
        %284 = memref.load %arg1[%283] : memref<32xi32, #tpu.memory_space<smem>>
        %c9_i32_110 = arith.constant 9 : i32
        %c0_i32_111 = arith.constant 0 : i32
        %285 = tpu.memref_slice %arg3[%284, %c0_i32_111] : memref<32x32xf32, #tpu.memory_space<any>> -> memref<1x32xf32, #tpu.memory_space<any>>
        %c9_i32_112 = arith.constant 9 : i32
        %c0_i32_113 = arith.constant 0 : i32
        %286 = tpu.memref_slice %arg5[%154, %c9_i32_112, %c0_i32_113] : memref<2x32x32xf32, #tpu.memory_space<vmem>> -> memref<1x1x32xf32, #tpu.memory_space<vmem>>
        %287 = tpu.memref_squeeze %286 : memref<1x1x32xf32, #tpu.memory_space<vmem>> -> memref<1x32xf32, #tpu.memory_space<vmem>>
        %288 = tpu.memref_slice %arg6[%154, %c9_i32_110] : memref<2x32x!tpu.dma_semaphore, #tpu.memory_space<semaphore_mem>> -> memref<1x1x!tpu.dma_semaphore, #tpu.memory_space<semaphore_mem>>
        %289 = tpu.memref_squeeze %288 : memref<1x1x!tpu.dma_semaphore, #tpu.memory_space<semaphore_mem>> -> memref<!tpu.dma_semaphore, #tpu.memory_space<semaphore_mem>>
        tpu.enqueue_dma source(%285 : memref<1x32xf32, #tpu.memory_space<any>>) target(%287 : memref<1x32xf32, #tpu.memory_space<vmem>>) target_semaphore(%289 : memref<!tpu.dma_semaphore, #tpu.memory_space<semaphore_mem>>)
      } else {
      }
      %c10_i32_66 = arith.constant 10 : i32
      %195 = arith.addi %153, %c10_i32_66 : i32
      %196 = arith.cmpi slt, %195, %0 : i32
      %197 = arith.extui %196 : i1 to i32
      %c0_i32_67 = arith.constant 0 : i32
      %198 = arith.cmpi ne, %197, %c0_i32_67 : i32
      scf.if %198 {
        %283 = arith.index_cast %195 : i32 to index
        %284 = memref.load %arg1[%283] : memref<32xi32, #tpu.memory_space<smem>>
        %c10_i32_110 = arith.constant 10 : i32
        %c0_i32_111 = arith.constant 0 : i32
        %285 = tpu.memref_slice %arg3[%284, %c0_i32_111] : memref<32x32xf32, #tpu.memory_space<any>> -> memref<1x32xf32, #tpu.memory_space<any>>
        %c10_i32_112 = arith.constant 10 : i32
        %c0_i32_113 = arith.constant 0 : i32
        %286 = tpu.memref_slice %arg5[%154, %c10_i32_112, %c0_i32_113] : memref<2x32x32xf32, #tpu.memory_space<vmem>> -> memref<1x1x32xf32, #tpu.memory_space<vmem>>
        %287 = tpu.memref_squeeze %286 : memref<1x1x32xf32, #tpu.memory_space<vmem>> -> memref<1x32xf32, #tpu.memory_space<vmem>>
        %288 = tpu.memref_slice %arg6[%154, %c10_i32_110] : memref<2x32x!tpu.dma_semaphore, #tpu.memory_space<semaphore_mem>> -> memref<1x1x!tpu.dma_semaphore, #tpu.memory_space<semaphore_mem>>
        %289 = tpu.memref_squeeze %288 : memref<1x1x!tpu.dma_semaphore, #tpu.memory_space<semaphore_mem>> -> memref<!tpu.dma_semaphore, #tpu.memory_space<semaphore_mem>>
        tpu.enqueue_dma source(%285 : memref<1x32xf32, #tpu.memory_space<any>>) target(%287 : memref<1x32xf32, #tpu.memory_space<vmem>>) target_semaphore(%289 : memref<!tpu.dma_semaphore, #tpu.memory_space<semaphore_mem>>)
      } else {
      }
      %c11_i32_68 = arith.constant 11 : i32
      %199 = arith.addi %153, %c11_i32_68 : i32
      %200 = arith.cmpi slt, %199, %0 : i32
      %201 = arith.extui %200 : i1 to i32
      %c0_i32_69 = arith.constant 0 : i32
      %202 = arith.cmpi ne, %201, %c0_i32_69 : i32
      scf.if %202 {
        %283 = arith.index_cast %199 : i32 to index
        %284 = memref.load %arg1[%283] : memref<32xi32, #tpu.memory_space<smem>>
        %c11_i32_110 = arith.constant 11 : i32
        %c0_i32_111 = arith.constant 0 : i32
        %285 = tpu.memref_slice %arg3[%284, %c0_i32_111] : memref<32x32xf32, #tpu.memory_space<any>> -> memref<1x32xf32, #tpu.memory_space<any>>
        %c11_i32_112 = arith.constant 11 : i32
        %c0_i32_113 = arith.constant 0 : i32
        %286 = tpu.memref_slice %arg5[%154, %c11_i32_112, %c0_i32_113] : memref<2x32x32xf32, #tpu.memory_space<vmem>> -> memref<1x1x32xf32, #tpu.memory_space<vmem>>
        %287 = tpu.memref_squeeze %286 : memref<1x1x32xf32, #tpu.memory_space<vmem>> -> memref<1x32xf32, #tpu.memory_space<vmem>>
        %288 = tpu.memref_slice %arg6[%154, %c11_i32_110] : memref<2x32x!tpu.dma_semaphore, #tpu.memory_space<semaphore_mem>> -> memref<1x1x!tpu.dma_semaphore, #tpu.memory_space<semaphore_mem>>
        %289 = tpu.memref_squeeze %288 : memref<1x1x!tpu.dma_semaphore, #tpu.memory_space<semaphore_mem>> -> memref<!tpu.dma_semaphore, #tpu.memory_space<semaphore_mem>>
        tpu.enqueue_dma source(%285 : memref<1x32xf32, #tpu.memory_space<any>>) target(%287 : memref<1x32xf32, #tpu.memory_space<vmem>>) target_semaphore(%289 : memref<!tpu.dma_semaphore, #tpu.memory_space<semaphore_mem>>)
      } else {
      }
      %c12_i32_70 = arith.constant 12 : i32
      %203 = arith.addi %153, %c12_i32_70 : i32
      %204 = arith.cmpi slt, %203, %0 : i32
      %205 = arith.extui %204 : i1 to i32
      %c0_i32_71 = arith.constant 0 : i32
      %206 = arith.cmpi ne, %205, %c0_i32_71 : i32
      scf.if %206 {
        %283 = arith.index_cast %203 : i32 to index
        %284 = memref.load %arg1[%283] : memref<32xi32, #tpu.memory_space<smem>>
        %c12_i32_110 = arith.constant 12 : i32
        %c0_i32_111 = arith.constant 0 : i32
        %285 = tpu.memref_slice %arg3[%284, %c0_i32_111] : memref<32x32xf32, #tpu.memory_space<any>> -> memref<1x32xf32, #tpu.memory_space<any>>
        %c12_i32_112 = arith.constant 12 : i32
        %c0_i32_113 = arith.constant 0 : i32
        %286 = tpu.memref_slice %arg5[%154, %c12_i32_112, %c0_i32_113] : memref<2x32x32xf32, #tpu.memory_space<vmem>> -> memref<1x1x32xf32, #tpu.memory_space<vmem>>
        %287 = tpu.memref_squeeze %286 : memref<1x1x32xf32, #tpu.memory_space<vmem>> -> memref<1x32xf32, #tpu.memory_space<vmem>>
        %288 = tpu.memref_slice %arg6[%154, %c12_i32_110] : memref<2x32x!tpu.dma_semaphore, #tpu.memory_space<semaphore_mem>> -> memref<1x1x!tpu.dma_semaphore, #tpu.memory_space<semaphore_mem>>
        %289 = tpu.memref_squeeze %288 : memref<1x1x!tpu.dma_semaphore, #tpu.memory_space<semaphore_mem>> -> memref<!tpu.dma_semaphore, #tpu.memory_space<semaphore_mem>>
        tpu.enqueue_dma source(%285 : memref<1x32xf32, #tpu.memory_space<any>>) target(%287 : memref<1x32xf32, #tpu.memory_space<vmem>>) target_semaphore(%289 : memref<!tpu.dma_semaphore, #tpu.memory_space<semaphore_mem>>)
      } else {
      }
      %c13_i32_72 = arith.constant 13 : i32
      %207 = arith.addi %153, %c13_i32_72 : i32
      %208 = arith.cmpi slt, %207, %0 : i32
      %209 = arith.extui %208 : i1 to i32
      %c0_i32_73 = arith.constant 0 : i32
      %210 = arith.cmpi ne, %209, %c0_i32_73 : i32
      scf.if %210 {
        %283 = arith.index_cast %207 : i32 to index
        %284 = memref.load %arg1[%283] : memref<32xi32, #tpu.memory_space<smem>>
        %c13_i32_110 = arith.constant 13 : i32
        %c0_i32_111 = arith.constant 0 : i32
        %285 = tpu.memref_slice %arg3[%284, %c0_i32_111] : memref<32x32xf32, #tpu.memory_space<any>> -> memref<1x32xf32, #tpu.memory_space<any>>
        %c13_i32_112 = arith.constant 13 : i32
        %c0_i32_113 = arith.constant 0 : i32
        %286 = tpu.memref_slice %arg5[%154, %c13_i32_112, %c0_i32_113] : memref<2x32x32xf32, #tpu.memory_space<vmem>> -> memref<1x1x32xf32, #tpu.memory_space<vmem>>
        %287 = tpu.memref_squeeze %286 : memref<1x1x32xf32, #tpu.memory_space<vmem>> -> memref<1x32xf32, #tpu.memory_space<vmem>>
        %288 = tpu.memref_slice %arg6[%154, %c13_i32_110] : memref<2x32x!tpu.dma_semaphore, #tpu.memory_space<semaphore_mem>> -> memref<1x1x!tpu.dma_semaphore, #tpu.memory_space<semaphore_mem>>
        %289 = tpu.memref_squeeze %288 : memref<1x1x!tpu.dma_semaphore, #tpu.memory_space<semaphore_mem>> -> memref<!tpu.dma_semaphore, #tpu.memory_space<semaphore_mem>>
        tpu.enqueue_dma source(%285 : memref<1x32xf32, #tpu.memory_space<any>>) target(%287 : memref<1x32xf32, #tpu.memory_space<vmem>>) target_semaphore(%289 : memref<!tpu.dma_semaphore, #tpu.memory_space<semaphore_mem>>)
      } else {
      }
      %c14_i32_74 = arith.constant 14 : i32
      %211 = arith.addi %153, %c14_i32_74 : i32
      %212 = arith.cmpi slt, %211, %0 : i32
      %213 = arith.extui %212 : i1 to i32
      %c0_i32_75 = arith.constant 0 : i32
      %214 = arith.cmpi ne, %213, %c0_i32_75 : i32
      scf.if %214 {
        %283 = arith.index_cast %211 : i32 to index
        %284 = memref.load %arg1[%283] : memref<32xi32, #tpu.memory_space<smem>>
        %c14_i32_110 = arith.constant 14 : i32
        %c0_i32_111 = arith.constant 0 : i32
        %285 = tpu.memref_slice %arg3[%284, %c0_i32_111] : memref<32x32xf32, #tpu.memory_space<any>> -> memref<1x32xf32, #tpu.memory_space<any>>
        %c14_i32_112 = arith.constant 14 : i32
        %c0_i32_113 = arith.constant 0 : i32
        %286 = tpu.memref_slice %arg5[%154, %c14_i32_112, %c0_i32_113] : memref<2x32x32xf32, #tpu.memory_space<vmem>> -> memref<1x1x32xf32, #tpu.memory_space<vmem>>
        %287 = tpu.memref_squeeze %286 : memref<1x1x32xf32, #tpu.memory_space<vmem>> -> memref<1x32xf32, #tpu.memory_space<vmem>>
        %288 = tpu.memref_slice %arg6[%154, %c14_i32_110] : memref<2x32x!tpu.dma_semaphore, #tpu.memory_space<semaphore_mem>> -> memref<1x1x!tpu.dma_semaphore, #tpu.memory_space<semaphore_mem>>
        %289 = tpu.memref_squeeze %288 : memref<1x1x!tpu.dma_semaphore, #tpu.memory_space<semaphore_mem>> -> memref<!tpu.dma_semaphore, #tpu.memory_space<semaphore_mem>>
        tpu.enqueue_dma source(%285 : memref<1x32xf32, #tpu.memory_space<any>>) target(%287 : memref<1x32xf32, #tpu.memory_space<vmem>>) target_semaphore(%289 : memref<!tpu.dma_semaphore, #tpu.memory_space<semaphore_mem>>)
      } else {
      }
      %c15_i32_76 = arith.constant 15 : i32
      %215 = arith.addi %153, %c15_i32_76 : i32
      %216 = arith.cmpi slt, %215, %0 : i32
      %217 = arith.extui %216 : i1 to i32
      %c0_i32_77 = arith.constant 0 : i32
      %218 = arith.cmpi ne, %217, %c0_i32_77 : i32
      scf.if %218 {
        %283 = arith.index_cast %215 : i32 to index
        %284 = memref.load %arg1[%283] : memref<32xi32, #tpu.memory_space<smem>>
        %c15_i32_110 = arith.constant 15 : i32
        %c0_i32_111 = arith.constant 0 : i32
        %285 = tpu.memref_slice %arg3[%284, %c0_i32_111] : memref<32x32xf32, #tpu.memory_space<any>> -> memref<1x32xf32, #tpu.memory_space<any>>
        %c15_i32_112 = arith.constant 15 : i32
        %c0_i32_113 = arith.constant 0 : i32
        %286 = tpu.memref_slice %arg5[%154, %c15_i32_112, %c0_i32_113] : memref<2x32x32xf32, #tpu.memory_space<vmem>> -> memref<1x1x32xf32, #tpu.memory_space<vmem>>
        %287 = tpu.memref_squeeze %286 : memref<1x1x32xf32, #tpu.memory_space<vmem>> -> memref<1x32xf32, #tpu.memory_space<vmem>>
        %288 = tpu.memref_slice %arg6[%154, %c15_i32_110] : memref<2x32x!tpu.dma_semaphore, #tpu.memory_space<semaphore_mem>> -> memref<1x1x!tpu.dma_semaphore, #tpu.memory_space<semaphore_mem>>
        %289 = tpu.memref_squeeze %288 : memref<1x1x!tpu.dma_semaphore, #tpu.memory_space<semaphore_mem>> -> memref<!tpu.dma_semaphore, #tpu.memory_space<semaphore_mem>>
        tpu.enqueue_dma source(%285 : memref<1x32xf32, #tpu.memory_space<any>>) target(%287 : memref<1x32xf32, #tpu.memory_space<vmem>>) target_semaphore(%289 : memref<!tpu.dma_semaphore, #tpu.memory_space<semaphore_mem>>)
      } else {
      }
      %c16_i32_78 = arith.constant 16 : i32
      %219 = arith.addi %153, %c16_i32_78 : i32
      %220 = arith.cmpi slt, %219, %0 : i32
      %221 = arith.extui %220 : i1 to i32
      %c0_i32_79 = arith.constant 0 : i32
      %222 = arith.cmpi ne, %221, %c0_i32_79 : i32
      scf.if %222 {
        %283 = arith.index_cast %219 : i32 to index
        %284 = memref.load %arg1[%283] : memref<32xi32, #tpu.memory_space<smem>>
        %c16_i32_110 = arith.constant 16 : i32
        %c0_i32_111 = arith.constant 0 : i32
        %285 = tpu.memref_slice %arg3[%284, %c0_i32_111] : memref<32x32xf32, #tpu.memory_space<any>> -> memref<1x32xf32, #tpu.memory_space<any>>
        %c16_i32_112 = arith.constant 16 : i32
        %c0_i32_113 = arith.constant 0 : i32
        %286 = tpu.memref_slice %arg5[%154, %c16_i32_112, %c0_i32_113] : memref<2x32x32xf32, #tpu.memory_space<vmem>> -> memref<1x1x32xf32, #tpu.memory_space<vmem>>
        %287 = tpu.memref_squeeze %286 : memref<1x1x32xf32, #tpu.memory_space<vmem>> -> memref<1x32xf32, #tpu.memory_space<vmem>>
        %288 = tpu.memref_slice %arg6[%154, %c16_i32_110] : memref<2x32x!tpu.dma_semaphore, #tpu.memory_space<semaphore_mem>> -> memref<1x1x!tpu.dma_semaphore, #tpu.memory_space<semaphore_mem>>
        %289 = tpu.memref_squeeze %288 : memref<1x1x!tpu.dma_semaphore, #tpu.memory_space<semaphore_mem>> -> memref<!tpu.dma_semaphore, #tpu.memory_space<semaphore_mem>>
        tpu.enqueue_dma source(%285 : memref<1x32xf32, #tpu.memory_space<any>>) target(%287 : memref<1x32xf32, #tpu.memory_space<vmem>>) target_semaphore(%289 : memref<!tpu.dma_semaphore, #tpu.memory_space<semaphore_mem>>)
      } else {
      }
      %c17_i32_80 = arith.constant 17 : i32
      %223 = arith.addi %153, %c17_i32_80 : i32
      %224 = arith.cmpi slt, %223, %0 : i32
      %225 = arith.extui %224 : i1 to i32
      %c0_i32_81 = arith.constant 0 : i32
      %226 = arith.cmpi ne, %225, %c0_i32_81 : i32
      scf.if %226 {
        %283 = arith.index_cast %223 : i32 to index
        %284 = memref.load %arg1[%283] : memref<32xi32, #tpu.memory_space<smem>>
        %c17_i32_110 = arith.constant 17 : i32
        %c0_i32_111 = arith.constant 0 : i32
        %285 = tpu.memref_slice %arg3[%284, %c0_i32_111] : memref<32x32xf32, #tpu.memory_space<any>> -> memref<1x32xf32, #tpu.memory_space<any>>
        %c17_i32_112 = arith.constant 17 : i32
        %c0_i32_113 = arith.constant 0 : i32
        %286 = tpu.memref_slice %arg5[%154, %c17_i32_112, %c0_i32_113] : memref<2x32x32xf32, #tpu.memory_space<vmem>> -> memref<1x1x32xf32, #tpu.memory_space<vmem>>
        %287 = tpu.memref_squeeze %286 : memref<1x1x32xf32, #tpu.memory_space<vmem>> -> memref<1x32xf32, #tpu.memory_space<vmem>>
        %288 = tpu.memref_slice %arg6[%154, %c17_i32_110] : memref<2x32x!tpu.dma_semaphore, #tpu.memory_space<semaphore_mem>> -> memref<1x1x!tpu.dma_semaphore, #tpu.memory_space<semaphore_mem>>
        %289 = tpu.memref_squeeze %288 : memref<1x1x!tpu.dma_semaphore, #tpu.memory_space<semaphore_mem>> -> memref<!tpu.dma_semaphore, #tpu.memory_space<semaphore_mem>>
        tpu.enqueue_dma source(%285 : memref<1x32xf32, #tpu.memory_space<any>>) target(%287 : memref<1x32xf32, #tpu.memory_space<vmem>>) target_semaphore(%289 : memref<!tpu.dma_semaphore, #tpu.memory_space<semaphore_mem>>)
      } else {
      }
      %c18_i32_82 = arith.constant 18 : i32
      %227 = arith.addi %153, %c18_i32_82 : i32
      %228 = arith.cmpi slt, %227, %0 : i32
      %229 = arith.extui %228 : i1 to i32
      %c0_i32_83 = arith.constant 0 : i32
      %230 = arith.cmpi ne, %229, %c0_i32_83 : i32
      scf.if %230 {
        %283 = arith.index_cast %227 : i32 to index
        %284 = memref.load %arg1[%283] : memref<32xi32, #tpu.memory_space<smem>>
        %c18_i32_110 = arith.constant 18 : i32
        %c0_i32_111 = arith.constant 0 : i32
        %285 = tpu.memref_slice %arg3[%284, %c0_i32_111] : memref<32x32xf32, #tpu.memory_space<any>> -> memref<1x32xf32, #tpu.memory_space<any>>
        %c18_i32_112 = arith.constant 18 : i32
        %c0_i32_113 = arith.constant 0 : i32
        %286 = tpu.memref_slice %arg5[%154, %c18_i32_112, %c0_i32_113] : memref<2x32x32xf32, #tpu.memory_space<vmem>> -> memref<1x1x32xf32, #tpu.memory_space<vmem>>
        %287 = tpu.memref_squeeze %286 : memref<1x1x32xf32, #tpu.memory_space<vmem>> -> memref<1x32xf32, #tpu.memory_space<vmem>>
        %288 = tpu.memref_slice %arg6[%154, %c18_i32_110] : memref<2x32x!tpu.dma_semaphore, #tpu.memory_space<semaphore_mem>> -> memref<1x1x!tpu.dma_semaphore, #tpu.memory_space<semaphore_mem>>
        %289 = tpu.memref_squeeze %288 : memref<1x1x!tpu.dma_semaphore, #tpu.memory_space<semaphore_mem>> -> memref<!tpu.dma_semaphore, #tpu.memory_space<semaphore_mem>>
        tpu.enqueue_dma source(%285 : memref<1x32xf32, #tpu.memory_space<any>>) target(%287 : memref<1x32xf32, #tpu.memory_space<vmem>>) target_semaphore(%289 : memref<!tpu.dma_semaphore, #tpu.memory_space<semaphore_mem>>)
      } else {
      }
      %c19_i32_84 = arith.constant 19 : i32
      %231 = arith.addi %153, %c19_i32_84 : i32
      %232 = arith.cmpi slt, %231, %0 : i32
      %233 = arith.extui %232 : i1 to i32
      %c0_i32_85 = arith.constant 0 : i32
      %234 = arith.cmpi ne, %233, %c0_i32_85 : i32
      scf.if %234 {
        %283 = arith.index_cast %231 : i32 to index
        %284 = memref.load %arg1[%283] : memref<32xi32, #tpu.memory_space<smem>>
        %c19_i32_110 = arith.constant 19 : i32
        %c0_i32_111 = arith.constant 0 : i32
        %285 = tpu.memref_slice %arg3[%284, %c0_i32_111] : memref<32x32xf32, #tpu.memory_space<any>> -> memref<1x32xf32, #tpu.memory_space<any>>
        %c19_i32_112 = arith.constant 19 : i32
        %c0_i32_113 = arith.constant 0 : i32
        %286 = tpu.memref_slice %arg5[%154, %c19_i32_112, %c0_i32_113] : memref<2x32x32xf32, #tpu.memory_space<vmem>> -> memref<1x1x32xf32, #tpu.memory_space<vmem>>
        %287 = tpu.memref_squeeze %286 : memref<1x1x32xf32, #tpu.memory_space<vmem>> -> memref<1x32xf32, #tpu.memory_space<vmem>>
        %288 = tpu.memref_slice %arg6[%154, %c19_i32_110] : memref<2x32x!tpu.dma_semaphore, #tpu.memory_space<semaphore_mem>> -> memref<1x1x!tpu.dma_semaphore, #tpu.memory_space<semaphore_mem>>
        %289 = tpu.memref_squeeze %288 : memref<1x1x!tpu.dma_semaphore, #tpu.memory_space<semaphore_mem>> -> memref<!tpu.dma_semaphore, #tpu.memory_space<semaphore_mem>>
        tpu.enqueue_dma source(%285 : memref<1x32xf32, #tpu.memory_space<any>>) target(%287 : memref<1x32xf32, #tpu.memory_space<vmem>>) target_semaphore(%289 : memref<!tpu.dma_semaphore, #tpu.memory_space<semaphore_mem>>)
      } else {
      }
      %c20_i32_86 = arith.constant 20 : i32
      %235 = arith.addi %153, %c20_i32_86 : i32
      %236 = arith.cmpi slt, %235, %0 : i32
      %237 = arith.extui %236 : i1 to i32
      %c0_i32_87 = arith.constant 0 : i32
      %238 = arith.cmpi ne, %237, %c0_i32_87 : i32
      scf.if %238 {
        %283 = arith.index_cast %235 : i32 to index
        %284 = memref.load %arg1[%283] : memref<32xi32, #tpu.memory_space<smem>>
        %c20_i32_110 = arith.constant 20 : i32
        %c0_i32_111 = arith.constant 0 : i32
        %285 = tpu.memref_slice %arg3[%284, %c0_i32_111] : memref<32x32xf32, #tpu.memory_space<any>> -> memref<1x32xf32, #tpu.memory_space<any>>
        %c20_i32_112 = arith.constant 20 : i32
        %c0_i32_113 = arith.constant 0 : i32
        %286 = tpu.memref_slice %arg5[%154, %c20_i32_112, %c0_i32_113] : memref<2x32x32xf32, #tpu.memory_space<vmem>> -> memref<1x1x32xf32, #tpu.memory_space<vmem>>
        %287 = tpu.memref_squeeze %286 : memref<1x1x32xf32, #tpu.memory_space<vmem>> -> memref<1x32xf32, #tpu.memory_space<vmem>>
        %288 = tpu.memref_slice %arg6[%154, %c20_i32_110] : memref<2x32x!tpu.dma_semaphore, #tpu.memory_space<semaphore_mem>> -> memref<1x1x!tpu.dma_semaphore, #tpu.memory_space<semaphore_mem>>
        %289 = tpu.memref_squeeze %288 : memref<1x1x!tpu.dma_semaphore, #tpu.memory_space<semaphore_mem>> -> memref<!tpu.dma_semaphore, #tpu.memory_space<semaphore_mem>>
        tpu.enqueue_dma source(%285 : memref<1x32xf32, #tpu.memory_space<any>>) target(%287 : memref<1x32xf32, #tpu.memory_space<vmem>>) target_semaphore(%289 : memref<!tpu.dma_semaphore, #tpu.memory_space<semaphore_mem>>)
      } else {
      }
      %c21_i32_88 = arith.constant 21 : i32
      %239 = arith.addi %153, %c21_i32_88 : i32
      %240 = arith.cmpi slt, %239, %0 : i32
      %241 = arith.extui %240 : i1 to i32
      %c0_i32_89 = arith.constant 0 : i32
      %242 = arith.cmpi ne, %241, %c0_i32_89 : i32
      scf.if %242 {
        %283 = arith.index_cast %239 : i32 to index
        %284 = memref.load %arg1[%283] : memref<32xi32, #tpu.memory_space<smem>>
        %c21_i32_110 = arith.constant 21 : i32
        %c0_i32_111 = arith.constant 0 : i32
        %285 = tpu.memref_slice %arg3[%284, %c0_i32_111] : memref<32x32xf32, #tpu.memory_space<any>> -> memref<1x32xf32, #tpu.memory_space<any>>
        %c21_i32_112 = arith.constant 21 : i32
        %c0_i32_113 = arith.constant 0 : i32
        %286 = tpu.memref_slice %arg5[%154, %c21_i32_112, %c0_i32_113] : memref<2x32x32xf32, #tpu.memory_space<vmem>> -> memref<1x1x32xf32, #tpu.memory_space<vmem>>
        %287 = tpu.memref_squeeze %286 : memref<1x1x32xf32, #tpu.memory_space<vmem>> -> memref<1x32xf32, #tpu.memory_space<vmem>>
        %288 = tpu.memref_slice %arg6[%154, %c21_i32_110] : memref<2x32x!tpu.dma_semaphore, #tpu.memory_space<semaphore_mem>> -> memref<1x1x!tpu.dma_semaphore, #tpu.memory_space<semaphore_mem>>
        %289 = tpu.memref_squeeze %288 : memref<1x1x!tpu.dma_semaphore, #tpu.memory_space<semaphore_mem>> -> memref<!tpu.dma_semaphore, #tpu.memory_space<semaphore_mem>>
        tpu.enqueue_dma source(%285 : memref<1x32xf32, #tpu.memory_space<any>>) target(%287 : memref<1x32xf32, #tpu.memory_space<vmem>>) target_semaphore(%289 : memref<!tpu.dma_semaphore, #tpu.memory_space<semaphore_mem>>)
      } else {
      }
      %c22_i32_90 = arith.constant 22 : i32
      %243 = arith.addi %153, %c22_i32_90 : i32
      %244 = arith.cmpi slt, %243, %0 : i32
      %245 = arith.extui %244 : i1 to i32
      %c0_i32_91 = arith.constant 0 : i32
      %246 = arith.cmpi ne, %245, %c0_i32_91 : i32
      scf.if %246 {
        %283 = arith.index_cast %243 : i32 to index
        %284 = memref.load %arg1[%283] : memref<32xi32, #tpu.memory_space<smem>>
        %c22_i32_110 = arith.constant 22 : i32
        %c0_i32_111 = arith.constant 0 : i32
        %285 = tpu.memref_slice %arg3[%284, %c0_i32_111] : memref<32x32xf32, #tpu.memory_space<any>> -> memref<1x32xf32, #tpu.memory_space<any>>
        %c22_i32_112 = arith.constant 22 : i32
        %c0_i32_113 = arith.constant 0 : i32
        %286 = tpu.memref_slice %arg5[%154, %c22_i32_112, %c0_i32_113] : memref<2x32x32xf32, #tpu.memory_space<vmem>> -> memref<1x1x32xf32, #tpu.memory_space<vmem>>
        %287 = tpu.memref_squeeze %286 : memref<1x1x32xf32, #tpu.memory_space<vmem>> -> memref<1x32xf32, #tpu.memory_space<vmem>>
        %288 = tpu.memref_slice %arg6[%154, %c22_i32_110] : memref<2x32x!tpu.dma_semaphore, #tpu.memory_space<semaphore_mem>> -> memref<1x1x!tpu.dma_semaphore, #tpu.memory_space<semaphore_mem>>
        %289 = tpu.memref_squeeze %288 : memref<1x1x!tpu.dma_semaphore, #tpu.memory_space<semaphore_mem>> -> memref<!tpu.dma_semaphore, #tpu.memory_space<semaphore_mem>>
        tpu.enqueue_dma source(%285 : memref<1x32xf32, #tpu.memory_space<any>>) target(%287 : memref<1x32xf32, #tpu.memory_space<vmem>>) target_semaphore(%289 : memref<!tpu.dma_semaphore, #tpu.memory_space<semaphore_mem>>)
      } else {
      }
      %c23_i32_92 = arith.constant 23 : i32
      %247 = arith.addi %153, %c23_i32_92 : i32
      %248 = arith.cmpi slt, %247, %0 : i32
      %249 = arith.extui %248 : i1 to i32
      %c0_i32_93 = arith.constant 0 : i32
      %250 = arith.cmpi ne, %249, %c0_i32_93 : i32
      scf.if %250 {
        %283 = arith.index_cast %247 : i32 to index
        %284 = memref.load %arg1[%283] : memref<32xi32, #tpu.memory_space<smem>>
        %c23_i32_110 = arith.constant 23 : i32
        %c0_i32_111 = arith.constant 0 : i32
        %285 = tpu.memref_slice %arg3[%284, %c0_i32_111] : memref<32x32xf32, #tpu.memory_space<any>> -> memref<1x32xf32, #tpu.memory_space<any>>
        %c23_i32_112 = arith.constant 23 : i32
        %c0_i32_113 = arith.constant 0 : i32
        %286 = tpu.memref_slice %arg5[%154, %c23_i32_112, %c0_i32_113] : memref<2x32x32xf32, #tpu.memory_space<vmem>> -> memref<1x1x32xf32, #tpu.memory_space<vmem>>
        %287 = tpu.memref_squeeze %286 : memref<1x1x32xf32, #tpu.memory_space<vmem>> -> memref<1x32xf32, #tpu.memory_space<vmem>>
        %288 = tpu.memref_slice %arg6[%154, %c23_i32_110] : memref<2x32x!tpu.dma_semaphore, #tpu.memory_space<semaphore_mem>> -> memref<1x1x!tpu.dma_semaphore, #tpu.memory_space<semaphore_mem>>
        %289 = tpu.memref_squeeze %288 : memref<1x1x!tpu.dma_semaphore, #tpu.memory_space<semaphore_mem>> -> memref<!tpu.dma_semaphore, #tpu.memory_space<semaphore_mem>>
        tpu.enqueue_dma source(%285 : memref<1x32xf32, #tpu.memory_space<any>>) target(%287 : memref<1x32xf32, #tpu.memory_space<vmem>>) target_semaphore(%289 : memref<!tpu.dma_semaphore, #tpu.memory_space<semaphore_mem>>)
      } else {
      }
      %c24_i32_94 = arith.constant 24 : i32
      %251 = arith.addi %153, %c24_i32_94 : i32
      %252 = arith.cmpi slt, %251, %0 : i32
      %253 = arith.extui %252 : i1 to i32
      %c0_i32_95 = arith.constant 0 : i32
      %254 = arith.cmpi ne, %253, %c0_i32_95 : i32
      scf.if %254 {
        %283 = arith.index_cast %251 : i32 to index
        %284 = memref.load %arg1[%283] : memref<32xi32, #tpu.memory_space<smem>>
        %c24_i32_110 = arith.constant 24 : i32
        %c0_i32_111 = arith.constant 0 : i32
        %285 = tpu.memref_slice %arg3[%284, %c0_i32_111] : memref<32x32xf32, #tpu.memory_space<any>> -> memref<1x32xf32, #tpu.memory_space<any>>
        %c24_i32_112 = arith.constant 24 : i32
        %c0_i32_113 = arith.constant 0 : i32
        %286 = tpu.memref_slice %arg5[%154, %c24_i32_112, %c0_i32_113] : memref<2x32x32xf32, #tpu.memory_space<vmem>> -> memref<1x1x32xf32, #tpu.memory_space<vmem>>
        %287 = tpu.memref_squeeze %286 : memref<1x1x32xf32, #tpu.memory_space<vmem>> -> memref<1x32xf32, #tpu.memory_space<vmem>>
        %288 = tpu.memref_slice %arg6[%154, %c24_i32_110] : memref<2x32x!tpu.dma_semaphore, #tpu.memory_space<semaphore_mem>> -> memref<1x1x!tpu.dma_semaphore, #tpu.memory_space<semaphore_mem>>
        %289 = tpu.memref_squeeze %288 : memref<1x1x!tpu.dma_semaphore, #tpu.memory_space<semaphore_mem>> -> memref<!tpu.dma_semaphore, #tpu.memory_space<semaphore_mem>>
        tpu.enqueue_dma source(%285 : memref<1x32xf32, #tpu.memory_space<any>>) target(%287 : memref<1x32xf32, #tpu.memory_space<vmem>>) target_semaphore(%289 : memref<!tpu.dma_semaphore, #tpu.memory_space<semaphore_mem>>)
      } else {
      }
      %c25_i32_96 = arith.constant 25 : i32
      %255 = arith.addi %153, %c25_i32_96 : i32
      %256 = arith.cmpi slt, %255, %0 : i32
      %257 = arith.extui %256 : i1 to i32
      %c0_i32_97 = arith.constant 0 : i32
      %258 = arith.cmpi ne, %257, %c0_i32_97 : i32
      scf.if %258 {
        %283 = arith.index_cast %255 : i32 to index
        %284 = memref.load %arg1[%283] : memref<32xi32, #tpu.memory_space<smem>>
        %c25_i32_110 = arith.constant 25 : i32
        %c0_i32_111 = arith.constant 0 : i32
        %285 = tpu.memref_slice %arg3[%284, %c0_i32_111] : memref<32x32xf32, #tpu.memory_space<any>> -> memref<1x32xf32, #tpu.memory_space<any>>
        %c25_i32_112 = arith.constant 25 : i32
        %c0_i32_113 = arith.constant 0 : i32
        %286 = tpu.memref_slice %arg5[%154, %c25_i32_112, %c0_i32_113] : memref<2x32x32xf32, #tpu.memory_space<vmem>> -> memref<1x1x32xf32, #tpu.memory_space<vmem>>
        %287 = tpu.memref_squeeze %286 : memref<1x1x32xf32, #tpu.memory_space<vmem>> -> memref<1x32xf32, #tpu.memory_space<vmem>>
        %288 = tpu.memref_slice %arg6[%154, %c25_i32_110] : memref<2x32x!tpu.dma_semaphore, #tpu.memory_space<semaphore_mem>> -> memref<1x1x!tpu.dma_semaphore, #tpu.memory_space<semaphore_mem>>
        %289 = tpu.memref_squeeze %288 : memref<1x1x!tpu.dma_semaphore, #tpu.memory_space<semaphore_mem>> -> memref<!tpu.dma_semaphore, #tpu.memory_space<semaphore_mem>>
        tpu.enqueue_dma source(%285 : memref<1x32xf32, #tpu.memory_space<any>>) target(%287 : memref<1x32xf32, #tpu.memory_space<vmem>>) target_semaphore(%289 : memref<!tpu.dma_semaphore, #tpu.memory_space<semaphore_mem>>)
      } else {
      }
      %c26_i32_98 = arith.constant 26 : i32
      %259 = arith.addi %153, %c26_i32_98 : i32
      %260 = arith.cmpi slt, %259, %0 : i32
      %261 = arith.extui %260 : i1 to i32
      %c0_i32_99 = arith.constant 0 : i32
      %262 = arith.cmpi ne, %261, %c0_i32_99 : i32
      scf.if %262 {
        %283 = arith.index_cast %259 : i32 to index
        %284 = memref.load %arg1[%283] : memref<32xi32, #tpu.memory_space<smem>>
        %c26_i32_110 = arith.constant 26 : i32
        %c0_i32_111 = arith.constant 0 : i32
        %285 = tpu.memref_slice %arg3[%284, %c0_i32_111] : memref<32x32xf32, #tpu.memory_space<any>> -> memref<1x32xf32, #tpu.memory_space<any>>
        %c26_i32_112 = arith.constant 26 : i32
        %c0_i32_113 = arith.constant 0 : i32
        %286 = tpu.memref_slice %arg5[%154, %c26_i32_112, %c0_i32_113] : memref<2x32x32xf32, #tpu.memory_space<vmem>> -> memref<1x1x32xf32, #tpu.memory_space<vmem>>
        %287 = tpu.memref_squeeze %286 : memref<1x1x32xf32, #tpu.memory_space<vmem>> -> memref<1x32xf32, #tpu.memory_space<vmem>>
        %288 = tpu.memref_slice %arg6[%154, %c26_i32_110] : memref<2x32x!tpu.dma_semaphore, #tpu.memory_space<semaphore_mem>> -> memref<1x1x!tpu.dma_semaphore, #tpu.memory_space<semaphore_mem>>
        %289 = tpu.memref_squeeze %288 : memref<1x1x!tpu.dma_semaphore, #tpu.memory_space<semaphore_mem>> -> memref<!tpu.dma_semaphore, #tpu.memory_space<semaphore_mem>>
        tpu.enqueue_dma source(%285 : memref<1x32xf32, #tpu.memory_space<any>>) target(%287 : memref<1x32xf32, #tpu.memory_space<vmem>>) target_semaphore(%289 : memref<!tpu.dma_semaphore, #tpu.memory_space<semaphore_mem>>)
      } else {
      }
      %c27_i32_100 = arith.constant 27 : i32
      %263 = arith.addi %153, %c27_i32_100 : i32
      %264 = arith.cmpi slt, %263, %0 : i32
      %265 = arith.extui %264 : i1 to i32
      %c0_i32_101 = arith.constant 0 : i32
      %266 = arith.cmpi ne, %265, %c0_i32_101 : i32
      scf.if %266 {
        %283 = arith.index_cast %263 : i32 to index
        %284 = memref.load %arg1[%283] : memref<32xi32, #tpu.memory_space<smem>>
        %c27_i32_110 = arith.constant 27 : i32
        %c0_i32_111 = arith.constant 0 : i32
        %285 = tpu.memref_slice %arg3[%284, %c0_i32_111] : memref<32x32xf32, #tpu.memory_space<any>> -> memref<1x32xf32, #tpu.memory_space<any>>
        %c27_i32_112 = arith.constant 27 : i32
        %c0_i32_113 = arith.constant 0 : i32
        %286 = tpu.memref_slice %arg5[%154, %c27_i32_112, %c0_i32_113] : memref<2x32x32xf32, #tpu.memory_space<vmem>> -> memref<1x1x32xf32, #tpu.memory_space<vmem>>
        %287 = tpu.memref_squeeze %286 : memref<1x1x32xf32, #tpu.memory_space<vmem>> -> memref<1x32xf32, #tpu.memory_space<vmem>>
        %288 = tpu.memref_slice %arg6[%154, %c27_i32_110] : memref<2x32x!tpu.dma_semaphore, #tpu.memory_space<semaphore_mem>> -> memref<1x1x!tpu.dma_semaphore, #tpu.memory_space<semaphore_mem>>
        %289 = tpu.memref_squeeze %288 : memref<1x1x!tpu.dma_semaphore, #tpu.memory_space<semaphore_mem>> -> memref<!tpu.dma_semaphore, #tpu.memory_space<semaphore_mem>>
        tpu.enqueue_dma source(%285 : memref<1x32xf32, #tpu.memory_space<any>>) target(%287 : memref<1x32xf32, #tpu.memory_space<vmem>>) target_semaphore(%289 : memref<!tpu.dma_semaphore, #tpu.memory_space<semaphore_mem>>)
      } else {
      }
      %c28_i32_102 = arith.constant 28 : i32
      %267 = arith.addi %153, %c28_i32_102 : i32
      %268 = arith.cmpi slt, %267, %0 : i32
      %269 = arith.extui %268 : i1 to i32
      %c0_i32_103 = arith.constant 0 : i32
      %270 = arith.cmpi ne, %269, %c0_i32_103 : i32
      scf.if %270 {
        %283 = arith.index_cast %267 : i32 to index
        %284 = memref.load %arg1[%283] : memref<32xi32, #tpu.memory_space<smem>>
        %c28_i32_110 = arith.constant 28 : i32
        %c0_i32_111 = arith.constant 0 : i32
        %285 = tpu.memref_slice %arg3[%284, %c0_i32_111] : memref<32x32xf32, #tpu.memory_space<any>> -> memref<1x32xf32, #tpu.memory_space<any>>
        %c28_i32_112 = arith.constant 28 : i32
        %c0_i32_113 = arith.constant 0 : i32
        %286 = tpu.memref_slice %arg5[%154, %c28_i32_112, %c0_i32_113] : memref<2x32x32xf32, #tpu.memory_space<vmem>> -> memref<1x1x32xf32, #tpu.memory_space<vmem>>
        %287 = tpu.memref_squeeze %286 : memref<1x1x32xf32, #tpu.memory_space<vmem>> -> memref<1x32xf32, #tpu.memory_space<vmem>>
        %288 = tpu.memref_slice %arg6[%154, %c28_i32_110] : memref<2x32x!tpu.dma_semaphore, #tpu.memory_space<semaphore_mem>> -> memref<1x1x!tpu.dma_semaphore, #tpu.memory_space<semaphore_mem>>
        %289 = tpu.memref_squeeze %288 : memref<1x1x!tpu.dma_semaphore, #tpu.memory_space<semaphore_mem>> -> memref<!tpu.dma_semaphore, #tpu.memory_space<semaphore_mem>>
        tpu.enqueue_dma source(%285 : memref<1x32xf32, #tpu.memory_space<any>>) target(%287 : memref<1x32xf32, #tpu.memory_space<vmem>>) target_semaphore(%289 : memref<!tpu.dma_semaphore, #tpu.memory_space<semaphore_mem>>)
      } else {
      }
      %c29_i32_104 = arith.constant 29 : i32
      %271 = arith.addi %153, %c29_i32_104 : i32
      %272 = arith.cmpi slt, %271, %0 : i32
      %273 = arith.extui %272 : i1 to i32
      %c0_i32_105 = arith.constant 0 : i32
      %274 = arith.cmpi ne, %273, %c0_i32_105 : i32
      scf.if %274 {
        %283 = arith.index_cast %271 : i32 to index
        %284 = memref.load %arg1[%283] : memref<32xi32, #tpu.memory_space<smem>>
        %c29_i32_110 = arith.constant 29 : i32
        %c0_i32_111 = arith.constant 0 : i32
        %285 = tpu.memref_slice %arg3[%284, %c0_i32_111] : memref<32x32xf32, #tpu.memory_space<any>> -> memref<1x32xf32, #tpu.memory_space<any>>
        %c29_i32_112 = arith.constant 29 : i32
        %c0_i32_113 = arith.constant 0 : i32
        %286 = tpu.memref_slice %arg5[%154, %c29_i32_112, %c0_i32_113] : memref<2x32x32xf32, #tpu.memory_space<vmem>> -> memref<1x1x32xf32, #tpu.memory_space<vmem>>
        %287 = tpu.memref_squeeze %286 : memref<1x1x32xf32, #tpu.memory_space<vmem>> -> memref<1x32xf32, #tpu.memory_space<vmem>>
        %288 = tpu.memref_slice %arg6[%154, %c29_i32_110] : memref<2x32x!tpu.dma_semaphore, #tpu.memory_space<semaphore_mem>> -> memref<1x1x!tpu.dma_semaphore, #tpu.memory_space<semaphore_mem>>
        %289 = tpu.memref_squeeze %288 : memref<1x1x!tpu.dma_semaphore, #tpu.memory_space<semaphore_mem>> -> memref<!tpu.dma_semaphore, #tpu.memory_space<semaphore_mem>>
        tpu.enqueue_dma source(%285 : memref<1x32xf32, #tpu.memory_space<any>>) target(%287 : memref<1x32xf32, #tpu.memory_space<vmem>>) target_semaphore(%289 : memref<!tpu.dma_semaphore, #tpu.memory_space<semaphore_mem>>)
      } else {
      }
      %c30_i32_106 = arith.constant 30 : i32
      %275 = arith.addi %153, %c30_i32_106 : i32
      %276 = arith.cmpi slt, %275, %0 : i32
      %277 = arith.extui %276 : i1 to i32
      %c0_i32_107 = arith.constant 0 : i32
      %278 = arith.cmpi ne, %277, %c0_i32_107 : i32
      scf.if %278 {
        %283 = arith.index_cast %275 : i32 to index
        %284 = memref.load %arg1[%283] : memref<32xi32, #tpu.memory_space<smem>>
        %c30_i32_110 = arith.constant 30 : i32
        %c0_i32_111 = arith.constant 0 : i32
        %285 = tpu.memref_slice %arg3[%284, %c0_i32_111] : memref<32x32xf32, #tpu.memory_space<any>> -> memref<1x32xf32, #tpu.memory_space<any>>
        %c30_i32_112 = arith.constant 30 : i32
        %c0_i32_113 = arith.constant 0 : i32
        %286 = tpu.memref_slice %arg5[%154, %c30_i32_112, %c0_i32_113] : memref<2x32x32xf32, #tpu.memory_space<vmem>> -> memref<1x1x32xf32, #tpu.memory_space<vmem>>
        %287 = tpu.memref_squeeze %286 : memref<1x1x32xf32, #tpu.memory_space<vmem>> -> memref<1x32xf32, #tpu.memory_space<vmem>>
        %288 = tpu.memref_slice %arg6[%154, %c30_i32_110] : memref<2x32x!tpu.dma_semaphore, #tpu.memory_space<semaphore_mem>> -> memref<1x1x!tpu.dma_semaphore, #tpu.memory_space<semaphore_mem>>
        %289 = tpu.memref_squeeze %288 : memref<1x1x!tpu.dma_semaphore, #tpu.memory_space<semaphore_mem>> -> memref<!tpu.dma_semaphore, #tpu.memory_space<semaphore_mem>>
        tpu.enqueue_dma source(%285 : memref<1x32xf32, #tpu.memory_space<any>>) target(%287 : memref<1x32xf32, #tpu.memory_space<vmem>>) target_semaphore(%289 : memref<!tpu.dma_semaphore, #tpu.memory_space<semaphore_mem>>)
      } else {
      }
      %c31_i32_108 = arith.constant 31 : i32
      %279 = arith.addi %153, %c31_i32_108 : i32
      %280 = arith.cmpi slt, %279, %0 : i32
      %281 = arith.extui %280 : i1 to i32
      %c0_i32_109 = arith.constant 0 : i32
      %282 = arith.cmpi ne, %281, %c0_i32_109 : i32
      scf.if %282 {
        %283 = arith.index_cast %279 : i32 to index
        %284 = memref.load %arg1[%283] : memref<32xi32, #tpu.memory_space<smem>>
        %c31_i32_110 = arith.constant 31 : i32
        %c0_i32_111 = arith.constant 0 : i32
        %285 = tpu.memref_slice %arg3[%284, %c0_i32_111] : memref<32x32xf32, #tpu.memory_space<any>> -> memref<1x32xf32, #tpu.memory_space<any>>
        %c31_i32_112 = arith.constant 31 : i32
        %c0_i32_113 = arith.constant 0 : i32
        %286 = tpu.memref_slice %arg5[%154, %c31_i32_112, %c0_i32_113] : memref<2x32x32xf32, #tpu.memory_space<vmem>> -> memref<1x1x32xf32, #tpu.memory_space<vmem>>
        %287 = tpu.memref_squeeze %286 : memref<1x1x32xf32, #tpu.memory_space<vmem>> -> memref<1x32xf32, #tpu.memory_space<vmem>>
        %288 = tpu.memref_slice %arg6[%154, %c31_i32_110] : memref<2x32x!tpu.dma_semaphore, #tpu.memory_space<semaphore_mem>> -> memref<1x1x!tpu.dma_semaphore, #tpu.memory_space<semaphore_mem>>
        %289 = tpu.memref_squeeze %288 : memref<1x1x!tpu.dma_semaphore, #tpu.memory_space<semaphore_mem>> -> memref<!tpu.dma_semaphore, #tpu.memory_space<semaphore_mem>>
        tpu.enqueue_dma source(%285 : memref<1x32xf32, #tpu.memory_space<any>>) target(%287 : memref<1x32xf32, #tpu.memory_space<vmem>>) target_semaphore(%289 : memref<!tpu.dma_semaphore, #tpu.memory_space<semaphore_mem>>)
      } else {
      }
    } else {
    }
    %c32_i32 = arith.constant 32 : i32
    %9 = arith.muli %arg0, %c32_i32 : i32
    %c0_i32_3 = arith.constant 0 : i32
    %10 = arith.addi %9, %c0_i32_3 : i32
    %11 = arith.cmpi slt, %10, %0 : i32
    %12 = arith.extui %11 : i1 to i32
    %c0_i32_4 = arith.constant 0 : i32
    %13 = arith.cmpi ne, %12, %c0_i32_4 : i32
    scf.if %13 {
      %c0_i32_43 = arith.constant 0 : i32
      %c0_i32_44 = arith.constant 0 : i32
      %c0_i32_45 = arith.constant 0 : i32
      %152 = tpu.memref_slice %arg3[%c0_i32_44, %c0_i32_45] : memref<32x32xf32, #tpu.memory_space<any>> -> memref<1x32xf32, #tpu.memory_space<any>>
      %c0_i32_46 = arith.constant 0 : i32
      %c0_i32_47 = arith.constant 0 : i32
      %153 = tpu.memref_slice %arg5[%1, %c0_i32_46, %c0_i32_47] : memref<2x32x32xf32, #tpu.memory_space<vmem>> -> memref<1x1x32xf32, #tpu.memory_space<vmem>>
      %154 = tpu.memref_squeeze %153 : memref<1x1x32xf32, #tpu.memory_space<vmem>> -> memref<1x32xf32, #tpu.memory_space<vmem>>
      %155 = tpu.memref_slice %arg6[%1, %c0_i32_43] : memref<2x32x!tpu.dma_semaphore, #tpu.memory_space<semaphore_mem>> -> memref<1x1x!tpu.dma_semaphore, #tpu.memory_space<semaphore_mem>>
      %156 = tpu.memref_squeeze %155 : memref<1x1x!tpu.dma_semaphore, #tpu.memory_space<semaphore_mem>> -> memref<!tpu.dma_semaphore, #tpu.memory_space<semaphore_mem>>
      tpu.wait_dma2 semaphore(%156 : memref<!tpu.dma_semaphore, #tpu.memory_space<semaphore_mem>>) src(%152 : memref<1x32xf32, #tpu.memory_space<any>>) dst(%154 : memref<1x32xf32, #tpu.memory_space<vmem>>)
    } else {
    }
    %c1_i32_5 = arith.constant 1 : i32
    %14 = arith.addi %9, %c1_i32_5 : i32
    %15 = arith.cmpi slt, %14, %0 : i32
    %16 = arith.extui %15 : i1 to i32
    %c0_i32_6 = arith.constant 0 : i32
    %17 = arith.cmpi ne, %16, %c0_i32_6 : i32
    scf.if %17 {
      %c1_i32_43 = arith.constant 1 : i32
      %c0_i32_44 = arith.constant 0 : i32
      %c0_i32_45 = arith.constant 0 : i32
      %152 = tpu.memref_slice %arg3[%c0_i32_44, %c0_i32_45] : memref<32x32xf32, #tpu.memory_space<any>> -> memref<1x32xf32, #tpu.memory_space<any>>
      %c1_i32_46 = arith.constant 1 : i32
      %c0_i32_47 = arith.constant 0 : i32
      %153 = tpu.memref_slice %arg5[%1, %c1_i32_46, %c0_i32_47] : memref<2x32x32xf32, #tpu.memory_space<vmem>> -> memref<1x1x32xf32, #tpu.memory_space<vmem>>
      %154 = tpu.memref_squeeze %153 : memref<1x1x32xf32, #tpu.memory_space<vmem>> -> memref<1x32xf32, #tpu.memory_space<vmem>>
      %155 = tpu.memref_slice %arg6[%1, %c1_i32_43] : memref<2x32x!tpu.dma_semaphore, #tpu.memory_space<semaphore_mem>> -> memref<1x1x!tpu.dma_semaphore, #tpu.memory_space<semaphore_mem>>
      %156 = tpu.memref_squeeze %155 : memref<1x1x!tpu.dma_semaphore, #tpu.memory_space<semaphore_mem>> -> memref<!tpu.dma_semaphore, #tpu.memory_space<semaphore_mem>>
      tpu.wait_dma2 semaphore(%156 : memref<!tpu.dma_semaphore, #tpu.memory_space<semaphore_mem>>) src(%152 : memref<1x32xf32, #tpu.memory_space<any>>) dst(%154 : memref<1x32xf32, #tpu.memory_space<vmem>>)
    } else {
    }
    %c2_i32_7 = arith.constant 2 : i32
    %18 = arith.addi %9, %c2_i32_7 : i32
    %19 = arith.cmpi slt, %18, %0 : i32
    %20 = arith.extui %19 : i1 to i32
    %c0_i32_8 = arith.constant 0 : i32
    %21 = arith.cmpi ne, %20, %c0_i32_8 : i32
    scf.if %21 {
      %c2_i32_43 = arith.constant 2 : i32
      %c0_i32_44 = arith.constant 0 : i32
      %c0_i32_45 = arith.constant 0 : i32
      %152 = tpu.memref_slice %arg3[%c0_i32_44, %c0_i32_45] : memref<32x32xf32, #tpu.memory_space<any>> -> memref<1x32xf32, #tpu.memory_space<any>>
      %c2_i32_46 = arith.constant 2 : i32
      %c0_i32_47 = arith.constant 0 : i32
      %153 = tpu.memref_slice %arg5[%1, %c2_i32_46, %c0_i32_47] : memref<2x32x32xf32, #tpu.memory_space<vmem>> -> memref<1x1x32xf32, #tpu.memory_space<vmem>>
      %154 = tpu.memref_squeeze %153 : memref<1x1x32xf32, #tpu.memory_space<vmem>> -> memref<1x32xf32, #tpu.memory_space<vmem>>
      %155 = tpu.memref_slice %arg6[%1, %c2_i32_43] : memref<2x32x!tpu.dma_semaphore, #tpu.memory_space<semaphore_mem>> -> memref<1x1x!tpu.dma_semaphore, #tpu.memory_space<semaphore_mem>>
      %156 = tpu.memref_squeeze %155 : memref<1x1x!tpu.dma_semaphore, #tpu.memory_space<semaphore_mem>> -> memref<!tpu.dma_semaphore, #tpu.memory_space<semaphore_mem>>
      tpu.wait_dma2 semaphore(%156 : memref<!tpu.dma_semaphore, #tpu.memory_space<semaphore_mem>>) src(%152 : memref<1x32xf32, #tpu.memory_space<any>>) dst(%154 : memref<1x32xf32, #tpu.memory_space<vmem>>)
    } else {
    }
    %c3_i32 = arith.constant 3 : i32
    %22 = arith.addi %9, %c3_i32 : i32
    %23 = arith.cmpi slt, %22, %0 : i32
    %24 = arith.extui %23 : i1 to i32
    %c0_i32_9 = arith.constant 0 : i32
    %25 = arith.cmpi ne, %24, %c0_i32_9 : i32
    scf.if %25 {
      %c3_i32_43 = arith.constant 3 : i32
      %c0_i32_44 = arith.constant 0 : i32
      %c0_i32_45 = arith.constant 0 : i32
      %152 = tpu.memref_slice %arg3[%c0_i32_44, %c0_i32_45] : memref<32x32xf32, #tpu.memory_space<any>> -> memref<1x32xf32, #tpu.memory_space<any>>
      %c3_i32_46 = arith.constant 3 : i32
      %c0_i32_47 = arith.constant 0 : i32
      %153 = tpu.memref_slice %arg5[%1, %c3_i32_46, %c0_i32_47] : memref<2x32x32xf32, #tpu.memory_space<vmem>> -> memref<1x1x32xf32, #tpu.memory_space<vmem>>
      %154 = tpu.memref_squeeze %153 : memref<1x1x32xf32, #tpu.memory_space<vmem>> -> memref<1x32xf32, #tpu.memory_space<vmem>>
      %155 = tpu.memref_slice %arg6[%1, %c3_i32_43] : memref<2x32x!tpu.dma_semaphore, #tpu.memory_space<semaphore_mem>> -> memref<1x1x!tpu.dma_semaphore, #tpu.memory_space<semaphore_mem>>
      %156 = tpu.memref_squeeze %155 : memref<1x1x!tpu.dma_semaphore, #tpu.memory_space<semaphore_mem>> -> memref<!tpu.dma_semaphore, #tpu.memory_space<semaphore_mem>>
      tpu.wait_dma2 semaphore(%156 : memref<!tpu.dma_semaphore, #tpu.memory_space<semaphore_mem>>) src(%152 : memref<1x32xf32, #tpu.memory_space<any>>) dst(%154 : memref<1x32xf32, #tpu.memory_space<vmem>>)
    } else {
    }
    %c4_i32 = arith.constant 4 : i32
    %26 = arith.addi %9, %c4_i32 : i32
    %27 = arith.cmpi slt, %26, %0 : i32
    %28 = arith.extui %27 : i1 to i32
    %c0_i32_10 = arith.constant 0 : i32
    %29 = arith.cmpi ne, %28, %c0_i32_10 : i32
    scf.if %29 {
      %c4_i32_43 = arith.constant 4 : i32
      %c0_i32_44 = arith.constant 0 : i32
      %c0_i32_45 = arith.constant 0 : i32
      %152 = tpu.memref_slice %arg3[%c0_i32_44, %c0_i32_45] : memref<32x32xf32, #tpu.memory_space<any>> -> memref<1x32xf32, #tpu.memory_space<any>>
      %c4_i32_46 = arith.constant 4 : i32
      %c0_i32_47 = arith.constant 0 : i32
      %153 = tpu.memref_slice %arg5[%1, %c4_i32_46, %c0_i32_47] : memref<2x32x32xf32, #tpu.memory_space<vmem>> -> memref<1x1x32xf32, #tpu.memory_space<vmem>>
      %154 = tpu.memref_squeeze %153 : memref<1x1x32xf32, #tpu.memory_space<vmem>> -> memref<1x32xf32, #tpu.memory_space<vmem>>
      %155 = tpu.memref_slice %arg6[%1, %c4_i32_43] : memref<2x32x!tpu.dma_semaphore, #tpu.memory_space<semaphore_mem>> -> memref<1x1x!tpu.dma_semaphore, #tpu.memory_space<semaphore_mem>>
      %156 = tpu.memref_squeeze %155 : memref<1x1x!tpu.dma_semaphore, #tpu.memory_space<semaphore_mem>> -> memref<!tpu.dma_semaphore, #tpu.memory_space<semaphore_mem>>
      tpu.wait_dma2 semaphore(%156 : memref<!tpu.dma_semaphore, #tpu.memory_space<semaphore_mem>>) src(%152 : memref<1x32xf32, #tpu.memory_space<any>>) dst(%154 : memref<1x32xf32, #tpu.memory_space<vmem>>)
    } else {
    }
    %c5_i32 = arith.constant 5 : i32
    %30 = arith.addi %9, %c5_i32 : i32
    %31 = arith.cmpi slt, %30, %0 : i32
    %32 = arith.extui %31 : i1 to i32
    %c0_i32_11 = arith.constant 0 : i32
    %33 = arith.cmpi ne, %32, %c0_i32_11 : i32
    scf.if %33 {
      %c5_i32_43 = arith.constant 5 : i32
      %c0_i32_44 = arith.constant 0 : i32
      %c0_i32_45 = arith.constant 0 : i32
      %152 = tpu.memref_slice %arg3[%c0_i32_44, %c0_i32_45] : memref<32x32xf32, #tpu.memory_space<any>> -> memref<1x32xf32, #tpu.memory_space<any>>
      %c5_i32_46 = arith.constant 5 : i32
      %c0_i32_47 = arith.constant 0 : i32
      %153 = tpu.memref_slice %arg5[%1, %c5_i32_46, %c0_i32_47] : memref<2x32x32xf32, #tpu.memory_space<vmem>> -> memref<1x1x32xf32, #tpu.memory_space<vmem>>
      %154 = tpu.memref_squeeze %153 : memref<1x1x32xf32, #tpu.memory_space<vmem>> -> memref<1x32xf32, #tpu.memory_space<vmem>>
      %155 = tpu.memref_slice %arg6[%1, %c5_i32_43] : memref<2x32x!tpu.dma_semaphore, #tpu.memory_space<semaphore_mem>> -> memref<1x1x!tpu.dma_semaphore, #tpu.memory_space<semaphore_mem>>
      %156 = tpu.memref_squeeze %155 : memref<1x1x!tpu.dma_semaphore, #tpu.memory_space<semaphore_mem>> -> memref<!tpu.dma_semaphore, #tpu.memory_space<semaphore_mem>>
      tpu.wait_dma2 semaphore(%156 : memref<!tpu.dma_semaphore, #tpu.memory_space<semaphore_mem>>) src(%152 : memref<1x32xf32, #tpu.memory_space<any>>) dst(%154 : memref<1x32xf32, #tpu.memory_space<vmem>>)
    } else {
    }
    %c6_i32 = arith.constant 6 : i32
    %34 = arith.addi %9, %c6_i32 : i32
    %35 = arith.cmpi slt, %34, %0 : i32
    %36 = arith.extui %35 : i1 to i32
    %c0_i32_12 = arith.constant 0 : i32
    %37 = arith.cmpi ne, %36, %c0_i32_12 : i32
    scf.if %37 {
      %c6_i32_43 = arith.constant 6 : i32
      %c0_i32_44 = arith.constant 0 : i32
      %c0_i32_45 = arith.constant 0 : i32
      %152 = tpu.memref_slice %arg3[%c0_i32_44, %c0_i32_45] : memref<32x32xf32, #tpu.memory_space<any>> -> memref<1x32xf32, #tpu.memory_space<any>>
      %c6_i32_46 = arith.constant 6 : i32
      %c0_i32_47 = arith.constant 0 : i32
      %153 = tpu.memref_slice %arg5[%1, %c6_i32_46, %c0_i32_47] : memref<2x32x32xf32, #tpu.memory_space<vmem>> -> memref<1x1x32xf32, #tpu.memory_space<vmem>>
      %154 = tpu.memref_squeeze %153 : memref<1x1x32xf32, #tpu.memory_space<vmem>> -> memref<1x32xf32, #tpu.memory_space<vmem>>
      %155 = tpu.memref_slice %arg6[%1, %c6_i32_43] : memref<2x32x!tpu.dma_semaphore, #tpu.memory_space<semaphore_mem>> -> memref<1x1x!tpu.dma_semaphore, #tpu.memory_space<semaphore_mem>>
      %156 = tpu.memref_squeeze %155 : memref<1x1x!tpu.dma_semaphore, #tpu.memory_space<semaphore_mem>> -> memref<!tpu.dma_semaphore, #tpu.memory_space<semaphore_mem>>
      tpu.wait_dma2 semaphore(%156 : memref<!tpu.dma_semaphore, #tpu.memory_space<semaphore_mem>>) src(%152 : memref<1x32xf32, #tpu.memory_space<any>>) dst(%154 : memref<1x32xf32, #tpu.memory_space<vmem>>)
    } else {
    }
    %c7_i32 = arith.constant 7 : i32
    %38 = arith.addi %9, %c7_i32 : i32
    %39 = arith.cmpi slt, %38, %0 : i32
    %40 = arith.extui %39 : i1 to i32
    %c0_i32_13 = arith.constant 0 : i32
    %41 = arith.cmpi ne, %40, %c0_i32_13 : i32
    scf.if %41 {
      %c7_i32_43 = arith.constant 7 : i32
      %c0_i32_44 = arith.constant 0 : i32
      %c0_i32_45 = arith.constant 0 : i32
      %152 = tpu.memref_slice %arg3[%c0_i32_44, %c0_i32_45] : memref<32x32xf32, #tpu.memory_space<any>> -> memref<1x32xf32, #tpu.memory_space<any>>
      %c7_i32_46 = arith.constant 7 : i32
      %c0_i32_47 = arith.constant 0 : i32
      %153 = tpu.memref_slice %arg5[%1, %c7_i32_46, %c0_i32_47] : memref<2x32x32xf32, #tpu.memory_space<vmem>> -> memref<1x1x32xf32, #tpu.memory_space<vmem>>
      %154 = tpu.memref_squeeze %153 : memref<1x1x32xf32, #tpu.memory_space<vmem>> -> memref<1x32xf32, #tpu.memory_space<vmem>>
      %155 = tpu.memref_slice %arg6[%1, %c7_i32_43] : memref<2x32x!tpu.dma_semaphore, #tpu.memory_space<semaphore_mem>> -> memref<1x1x!tpu.dma_semaphore, #tpu.memory_space<semaphore_mem>>
      %156 = tpu.memref_squeeze %155 : memref<1x1x!tpu.dma_semaphore, #tpu.memory_space<semaphore_mem>> -> memref<!tpu.dma_semaphore, #tpu.memory_space<semaphore_mem>>
      tpu.wait_dma2 semaphore(%156 : memref<!tpu.dma_semaphore, #tpu.memory_space<semaphore_mem>>) src(%152 : memref<1x32xf32, #tpu.memory_space<any>>) dst(%154 : memref<1x32xf32, #tpu.memory_space<vmem>>)
    } else {
    }
    %c8_i32 = arith.constant 8 : i32
    %42 = arith.addi %9, %c8_i32 : i32
    %43 = arith.cmpi slt, %42, %0 : i32
    %44 = arith.extui %43 : i1 to i32
    %c0_i32_14 = arith.constant 0 : i32
    %45 = arith.cmpi ne, %44, %c0_i32_14 : i32
    scf.if %45 {
      %c8_i32_43 = arith.constant 8 : i32
      %c0_i32_44 = arith.constant 0 : i32
      %c0_i32_45 = arith.constant 0 : i32
      %152 = tpu.memref_slice %arg3[%c0_i32_44, %c0_i32_45] : memref<32x32xf32, #tpu.memory_space<any>> -> memref<1x32xf32, #tpu.memory_space<any>>
      %c8_i32_46 = arith.constant 8 : i32
      %c0_i32_47 = arith.constant 0 : i32
      %153 = tpu.memref_slice %arg5[%1, %c8_i32_46, %c0_i32_47] : memref<2x32x32xf32, #tpu.memory_space<vmem>> -> memref<1x1x32xf32, #tpu.memory_space<vmem>>
      %154 = tpu.memref_squeeze %153 : memref<1x1x32xf32, #tpu.memory_space<vmem>> -> memref<1x32xf32, #tpu.memory_space<vmem>>
      %155 = tpu.memref_slice %arg6[%1, %c8_i32_43] : memref<2x32x!tpu.dma_semaphore, #tpu.memory_space<semaphore_mem>> -> memref<1x1x!tpu.dma_semaphore, #tpu.memory_space<semaphore_mem>>
      %156 = tpu.memref_squeeze %155 : memref<1x1x!tpu.dma_semaphore, #tpu.memory_space<semaphore_mem>> -> memref<!tpu.dma_semaphore, #tpu.memory_space<semaphore_mem>>
      tpu.wait_dma2 semaphore(%156 : memref<!tpu.dma_semaphore, #tpu.memory_space<semaphore_mem>>) src(%152 : memref<1x32xf32, #tpu.memory_space<any>>) dst(%154 : memref<1x32xf32, #tpu.memory_space<vmem>>)
    } else {
    }
    %c9_i32 = arith.constant 9 : i32
    %46 = arith.addi %9, %c9_i32 : i32
    %47 = arith.cmpi slt, %46, %0 : i32
    %48 = arith.extui %47 : i1 to i32
    %c0_i32_15 = arith.constant 0 : i32
    %49 = arith.cmpi ne, %48, %c0_i32_15 : i32
    scf.if %49 {
      %c9_i32_43 = arith.constant 9 : i32
      %c0_i32_44 = arith.constant 0 : i32
      %c0_i32_45 = arith.constant 0 : i32
      %152 = tpu.memref_slice %arg3[%c0_i32_44, %c0_i32_45] : memref<32x32xf32, #tpu.memory_space<any>> -> memref<1x32xf32, #tpu.memory_space<any>>
      %c9_i32_46 = arith.constant 9 : i32
      %c0_i32_47 = arith.constant 0 : i32
      %153 = tpu.memref_slice %arg5[%1, %c9_i32_46, %c0_i32_47] : memref<2x32x32xf32, #tpu.memory_space<vmem>> -> memref<1x1x32xf32, #tpu.memory_space<vmem>>
      %154 = tpu.memref_squeeze %153 : memref<1x1x32xf32, #tpu.memory_space<vmem>> -> memref<1x32xf32, #tpu.memory_space<vmem>>
      %155 = tpu.memref_slice %arg6[%1, %c9_i32_43] : memref<2x32x!tpu.dma_semaphore, #tpu.memory_space<semaphore_mem>> -> memref<1x1x!tpu.dma_semaphore, #tpu.memory_space<semaphore_mem>>
      %156 = tpu.memref_squeeze %155 : memref<1x1x!tpu.dma_semaphore, #tpu.memory_space<semaphore_mem>> -> memref<!tpu.dma_semaphore, #tpu.memory_space<semaphore_mem>>
      tpu.wait_dma2 semaphore(%156 : memref<!tpu.dma_semaphore, #tpu.memory_space<semaphore_mem>>) src(%152 : memref<1x32xf32, #tpu.memory_space<any>>) dst(%154 : memref<1x32xf32, #tpu.memory_space<vmem>>)
    } else {
    }
    %c10_i32 = arith.constant 10 : i32
    %50 = arith.addi %9, %c10_i32 : i32
    %51 = arith.cmpi slt, %50, %0 : i32
    %52 = arith.extui %51 : i1 to i32
    %c0_i32_16 = arith.constant 0 : i32
    %53 = arith.cmpi ne, %52, %c0_i32_16 : i32
    scf.if %53 {
      %c10_i32_43 = arith.constant 10 : i32
      %c0_i32_44 = arith.constant 0 : i32
      %c0_i32_45 = arith.constant 0 : i32
      %152 = tpu.memref_slice %arg3[%c0_i32_44, %c0_i32_45] : memref<32x32xf32, #tpu.memory_space<any>> -> memref<1x32xf32, #tpu.memory_space<any>>
      %c10_i32_46 = arith.constant 10 : i32
      %c0_i32_47 = arith.constant 0 : i32
      %153 = tpu.memref_slice %arg5[%1, %c10_i32_46, %c0_i32_47] : memref<2x32x32xf32, #tpu.memory_space<vmem>> -> memref<1x1x32xf32, #tpu.memory_space<vmem>>
      %154 = tpu.memref_squeeze %153 : memref<1x1x32xf32, #tpu.memory_space<vmem>> -> memref<1x32xf32, #tpu.memory_space<vmem>>
      %155 = tpu.memref_slice %arg6[%1, %c10_i32_43] : memref<2x32x!tpu.dma_semaphore, #tpu.memory_space<semaphore_mem>> -> memref<1x1x!tpu.dma_semaphore, #tpu.memory_space<semaphore_mem>>
      %156 = tpu.memref_squeeze %155 : memref<1x1x!tpu.dma_semaphore, #tpu.memory_space<semaphore_mem>> -> memref<!tpu.dma_semaphore, #tpu.memory_space<semaphore_mem>>
      tpu.wait_dma2 semaphore(%156 : memref<!tpu.dma_semaphore, #tpu.memory_space<semaphore_mem>>) src(%152 : memref<1x32xf32, #tpu.memory_space<any>>) dst(%154 : memref<1x32xf32, #tpu.memory_space<vmem>>)
    } else {
    }
    %c11_i32 = arith.constant 11 : i32
    %54 = arith.addi %9, %c11_i32 : i32
    %55 = arith.cmpi slt, %54, %0 : i32
    %56 = arith.extui %55 : i1 to i32
    %c0_i32_17 = arith.constant 0 : i32
    %57 = arith.cmpi ne, %56, %c0_i32_17 : i32
    scf.if %57 {
      %c11_i32_43 = arith.constant 11 : i32
      %c0_i32_44 = arith.constant 0 : i32
      %c0_i32_45 = arith.constant 0 : i32
      %152 = tpu.memref_slice %arg3[%c0_i32_44, %c0_i32_45] : memref<32x32xf32, #tpu.memory_space<any>> -> memref<1x32xf32, #tpu.memory_space<any>>
      %c11_i32_46 = arith.constant 11 : i32
      %c0_i32_47 = arith.constant 0 : i32
      %153 = tpu.memref_slice %arg5[%1, %c11_i32_46, %c0_i32_47] : memref<2x32x32xf32, #tpu.memory_space<vmem>> -> memref<1x1x32xf32, #tpu.memory_space<vmem>>
      %154 = tpu.memref_squeeze %153 : memref<1x1x32xf32, #tpu.memory_space<vmem>> -> memref<1x32xf32, #tpu.memory_space<vmem>>
      %155 = tpu.memref_slice %arg6[%1, %c11_i32_43] : memref<2x32x!tpu.dma_semaphore, #tpu.memory_space<semaphore_mem>> -> memref<1x1x!tpu.dma_semaphore, #tpu.memory_space<semaphore_mem>>
      %156 = tpu.memref_squeeze %155 : memref<1x1x!tpu.dma_semaphore, #tpu.memory_space<semaphore_mem>> -> memref<!tpu.dma_semaphore, #tpu.memory_space<semaphore_mem>>
      tpu.wait_dma2 semaphore(%156 : memref<!tpu.dma_semaphore, #tpu.memory_space<semaphore_mem>>) src(%152 : memref<1x32xf32, #tpu.memory_space<any>>) dst(%154 : memref<1x32xf32, #tpu.memory_space<vmem>>)
    } else {
    }
    %c12_i32 = arith.constant 12 : i32
    %58 = arith.addi %9, %c12_i32 : i32
    %59 = arith.cmpi slt, %58, %0 : i32
    %60 = arith.extui %59 : i1 to i32
    %c0_i32_18 = arith.constant 0 : i32
    %61 = arith.cmpi ne, %60, %c0_i32_18 : i32
    scf.if %61 {
      %c12_i32_43 = arith.constant 12 : i32
      %c0_i32_44 = arith.constant 0 : i32
      %c0_i32_45 = arith.constant 0 : i32
      %152 = tpu.memref_slice %arg3[%c0_i32_44, %c0_i32_45] : memref<32x32xf32, #tpu.memory_space<any>> -> memref<1x32xf32, #tpu.memory_space<any>>
      %c12_i32_46 = arith.constant 12 : i32
      %c0_i32_47 = arith.constant 0 : i32
      %153 = tpu.memref_slice %arg5[%1, %c12_i32_46, %c0_i32_47] : memref<2x32x32xf32, #tpu.memory_space<vmem>> -> memref<1x1x32xf32, #tpu.memory_space<vmem>>
      %154 = tpu.memref_squeeze %153 : memref<1x1x32xf32, #tpu.memory_space<vmem>> -> memref<1x32xf32, #tpu.memory_space<vmem>>
      %155 = tpu.memref_slice %arg6[%1, %c12_i32_43] : memref<2x32x!tpu.dma_semaphore, #tpu.memory_space<semaphore_mem>> -> memref<1x1x!tpu.dma_semaphore, #tpu.memory_space<semaphore_mem>>
      %156 = tpu.memref_squeeze %155 : memref<1x1x!tpu.dma_semaphore, #tpu.memory_space<semaphore_mem>> -> memref<!tpu.dma_semaphore, #tpu.memory_space<semaphore_mem>>
      tpu.wait_dma2 semaphore(%156 : memref<!tpu.dma_semaphore, #tpu.memory_space<semaphore_mem>>) src(%152 : memref<1x32xf32, #tpu.memory_space<any>>) dst(%154 : memref<1x32xf32, #tpu.memory_space<vmem>>)
    } else {
    }
    %c13_i32 = arith.constant 13 : i32
    %62 = arith.addi %9, %c13_i32 : i32
    %63 = arith.cmpi slt, %62, %0 : i32
    %64 = arith.extui %63 : i1 to i32
    %c0_i32_19 = arith.constant 0 : i32
    %65 = arith.cmpi ne, %64, %c0_i32_19 : i32
    scf.if %65 {
      %c13_i32_43 = arith.constant 13 : i32
      %c0_i32_44 = arith.constant 0 : i32
      %c0_i32_45 = arith.constant 0 : i32
      %152 = tpu.memref_slice %arg3[%c0_i32_44, %c0_i32_45] : memref<32x32xf32, #tpu.memory_space<any>> -> memref<1x32xf32, #tpu.memory_space<any>>
      %c13_i32_46 = arith.constant 13 : i32
      %c0_i32_47 = arith.constant 0 : i32
      %153 = tpu.memref_slice %arg5[%1, %c13_i32_46, %c0_i32_47] : memref<2x32x32xf32, #tpu.memory_space<vmem>> -> memref<1x1x32xf32, #tpu.memory_space<vmem>>
      %154 = tpu.memref_squeeze %153 : memref<1x1x32xf32, #tpu.memory_space<vmem>> -> memref<1x32xf32, #tpu.memory_space<vmem>>
      %155 = tpu.memref_slice %arg6[%1, %c13_i32_43] : memref<2x32x!tpu.dma_semaphore, #tpu.memory_space<semaphore_mem>> -> memref<1x1x!tpu.dma_semaphore, #tpu.memory_space<semaphore_mem>>
      %156 = tpu.memref_squeeze %155 : memref<1x1x!tpu.dma_semaphore, #tpu.memory_space<semaphore_mem>> -> memref<!tpu.dma_semaphore, #tpu.memory_space<semaphore_mem>>
      tpu.wait_dma2 semaphore(%156 : memref<!tpu.dma_semaphore, #tpu.memory_space<semaphore_mem>>) src(%152 : memref<1x32xf32, #tpu.memory_space<any>>) dst(%154 : memref<1x32xf32, #tpu.memory_space<vmem>>)
    } else {
    }
    %c14_i32 = arith.constant 14 : i32
    %66 = arith.addi %9, %c14_i32 : i32
    %67 = arith.cmpi slt, %66, %0 : i32
    %68 = arith.extui %67 : i1 to i32
    %c0_i32_20 = arith.constant 0 : i32
    %69 = arith.cmpi ne, %68, %c0_i32_20 : i32
    scf.if %69 {
      %c14_i32_43 = arith.constant 14 : i32
      %c0_i32_44 = arith.constant 0 : i32
      %c0_i32_45 = arith.constant 0 : i32
      %152 = tpu.memref_slice %arg3[%c0_i32_44, %c0_i32_45] : memref<32x32xf32, #tpu.memory_space<any>> -> memref<1x32xf32, #tpu.memory_space<any>>
      %c14_i32_46 = arith.constant 14 : i32
      %c0_i32_47 = arith.constant 0 : i32
      %153 = tpu.memref_slice %arg5[%1, %c14_i32_46, %c0_i32_47] : memref<2x32x32xf32, #tpu.memory_space<vmem>> -> memref<1x1x32xf32, #tpu.memory_space<vmem>>
      %154 = tpu.memref_squeeze %153 : memref<1x1x32xf32, #tpu.memory_space<vmem>> -> memref<1x32xf32, #tpu.memory_space<vmem>>
      %155 = tpu.memref_slice %arg6[%1, %c14_i32_43] : memref<2x32x!tpu.dma_semaphore, #tpu.memory_space<semaphore_mem>> -> memref<1x1x!tpu.dma_semaphore, #tpu.memory_space<semaphore_mem>>
      %156 = tpu.memref_squeeze %155 : memref<1x1x!tpu.dma_semaphore, #tpu.memory_space<semaphore_mem>> -> memref<!tpu.dma_semaphore, #tpu.memory_space<semaphore_mem>>
      tpu.wait_dma2 semaphore(%156 : memref<!tpu.dma_semaphore, #tpu.memory_space<semaphore_mem>>) src(%152 : memref<1x32xf32, #tpu.memory_space<any>>) dst(%154 : memref<1x32xf32, #tpu.memory_space<vmem>>)
    } else {
    }
    %c15_i32 = arith.constant 15 : i32
    %70 = arith.addi %9, %c15_i32 : i32
    %71 = arith.cmpi slt, %70, %0 : i32
    %72 = arith.extui %71 : i1 to i32
    %c0_i32_21 = arith.constant 0 : i32
    %73 = arith.cmpi ne, %72, %c0_i32_21 : i32
    scf.if %73 {
      %c15_i32_43 = arith.constant 15 : i32
      %c0_i32_44 = arith.constant 0 : i32
      %c0_i32_45 = arith.constant 0 : i32
      %152 = tpu.memref_slice %arg3[%c0_i32_44, %c0_i32_45] : memref<32x32xf32, #tpu.memory_space<any>> -> memref<1x32xf32, #tpu.memory_space<any>>
      %c15_i32_46 = arith.constant 15 : i32
      %c0_i32_47 = arith.constant 0 : i32
      %153 = tpu.memref_slice %arg5[%1, %c15_i32_46, %c0_i32_47] : memref<2x32x32xf32, #tpu.memory_space<vmem>> -> memref<1x1x32xf32, #tpu.memory_space<vmem>>
      %154 = tpu.memref_squeeze %153 : memref<1x1x32xf32, #tpu.memory_space<vmem>> -> memref<1x32xf32, #tpu.memory_space<vmem>>
      %155 = tpu.memref_slice %arg6[%1, %c15_i32_43] : memref<2x32x!tpu.dma_semaphore, #tpu.memory_space<semaphore_mem>> -> memref<1x1x!tpu.dma_semaphore, #tpu.memory_space<semaphore_mem>>
      %156 = tpu.memref_squeeze %155 : memref<1x1x!tpu.dma_semaphore, #tpu.memory_space<semaphore_mem>> -> memref<!tpu.dma_semaphore, #tpu.memory_space<semaphore_mem>>
      tpu.wait_dma2 semaphore(%156 : memref<!tpu.dma_semaphore, #tpu.memory_space<semaphore_mem>>) src(%152 : memref<1x32xf32, #tpu.memory_space<any>>) dst(%154 : memref<1x32xf32, #tpu.memory_space<vmem>>)
    } else {
    }
    %c16_i32 = arith.constant 16 : i32
    %74 = arith.addi %9, %c16_i32 : i32
    %75 = arith.cmpi slt, %74, %0 : i32
    %76 = arith.extui %75 : i1 to i32
    %c0_i32_22 = arith.constant 0 : i32
    %77 = arith.cmpi ne, %76, %c0_i32_22 : i32
    scf.if %77 {
      %c16_i32_43 = arith.constant 16 : i32
      %c0_i32_44 = arith.constant 0 : i32
      %c0_i32_45 = arith.constant 0 : i32
      %152 = tpu.memref_slice %arg3[%c0_i32_44, %c0_i32_45] : memref<32x32xf32, #tpu.memory_space<any>> -> memref<1x32xf32, #tpu.memory_space<any>>
      %c16_i32_46 = arith.constant 16 : i32
      %c0_i32_47 = arith.constant 0 : i32
      %153 = tpu.memref_slice %arg5[%1, %c16_i32_46, %c0_i32_47] : memref<2x32x32xf32, #tpu.memory_space<vmem>> -> memref<1x1x32xf32, #tpu.memory_space<vmem>>
      %154 = tpu.memref_squeeze %153 : memref<1x1x32xf32, #tpu.memory_space<vmem>> -> memref<1x32xf32, #tpu.memory_space<vmem>>
      %155 = tpu.memref_slice %arg6[%1, %c16_i32_43] : memref<2x32x!tpu.dma_semaphore, #tpu.memory_space<semaphore_mem>> -> memref<1x1x!tpu.dma_semaphore, #tpu.memory_space<semaphore_mem>>
      %156 = tpu.memref_squeeze %155 : memref<1x1x!tpu.dma_semaphore, #tpu.memory_space<semaphore_mem>> -> memref<!tpu.dma_semaphore, #tpu.memory_space<semaphore_mem>>
      tpu.wait_dma2 semaphore(%156 : memref<!tpu.dma_semaphore, #tpu.memory_space<semaphore_mem>>) src(%152 : memref<1x32xf32, #tpu.memory_space<any>>) dst(%154 : memref<1x32xf32, #tpu.memory_space<vmem>>)
    } else {
    }
    %c17_i32 = arith.constant 17 : i32
    %78 = arith.addi %9, %c17_i32 : i32
    %79 = arith.cmpi slt, %78, %0 : i32
    %80 = arith.extui %79 : i1 to i32
    %c0_i32_23 = arith.constant 0 : i32
    %81 = arith.cmpi ne, %80, %c0_i32_23 : i32
    scf.if %81 {
      %c17_i32_43 = arith.constant 17 : i32
      %c0_i32_44 = arith.constant 0 : i32
      %c0_i32_45 = arith.constant 0 : i32
      %152 = tpu.memref_slice %arg3[%c0_i32_44, %c0_i32_45] : memref<32x32xf32, #tpu.memory_space<any>> -> memref<1x32xf32, #tpu.memory_space<any>>
      %c17_i32_46 = arith.constant 17 : i32
      %c0_i32_47 = arith.constant 0 : i32
      %153 = tpu.memref_slice %arg5[%1, %c17_i32_46, %c0_i32_47] : memref<2x32x32xf32, #tpu.memory_space<vmem>> -> memref<1x1x32xf32, #tpu.memory_space<vmem>>
      %154 = tpu.memref_squeeze %153 : memref<1x1x32xf32, #tpu.memory_space<vmem>> -> memref<1x32xf32, #tpu.memory_space<vmem>>
      %155 = tpu.memref_slice %arg6[%1, %c17_i32_43] : memref<2x32x!tpu.dma_semaphore, #tpu.memory_space<semaphore_mem>> -> memref<1x1x!tpu.dma_semaphore, #tpu.memory_space<semaphore_mem>>
      %156 = tpu.memref_squeeze %155 : memref<1x1x!tpu.dma_semaphore, #tpu.memory_space<semaphore_mem>> -> memref<!tpu.dma_semaphore, #tpu.memory_space<semaphore_mem>>
      tpu.wait_dma2 semaphore(%156 : memref<!tpu.dma_semaphore, #tpu.memory_space<semaphore_mem>>) src(%152 : memref<1x32xf32, #tpu.memory_space<any>>) dst(%154 : memref<1x32xf32, #tpu.memory_space<vmem>>)
    } else {
    }
    %c18_i32 = arith.constant 18 : i32
    %82 = arith.addi %9, %c18_i32 : i32
    %83 = arith.cmpi slt, %82, %0 : i32
    %84 = arith.extui %83 : i1 to i32
    %c0_i32_24 = arith.constant 0 : i32
    %85 = arith.cmpi ne, %84, %c0_i32_24 : i32
    scf.if %85 {
      %c18_i32_43 = arith.constant 18 : i32
      %c0_i32_44 = arith.constant 0 : i32
      %c0_i32_45 = arith.constant 0 : i32
      %152 = tpu.memref_slice %arg3[%c0_i32_44, %c0_i32_45] : memref<32x32xf32, #tpu.memory_space<any>> -> memref<1x32xf32, #tpu.memory_space<any>>
      %c18_i32_46 = arith.constant 18 : i32
      %c0_i32_47 = arith.constant 0 : i32
      %153 = tpu.memref_slice %arg5[%1, %c18_i32_46, %c0_i32_47] : memref<2x32x32xf32, #tpu.memory_space<vmem>> -> memref<1x1x32xf32, #tpu.memory_space<vmem>>
      %154 = tpu.memref_squeeze %153 : memref<1x1x32xf32, #tpu.memory_space<vmem>> -> memref<1x32xf32, #tpu.memory_space<vmem>>
      %155 = tpu.memref_slice %arg6[%1, %c18_i32_43] : memref<2x32x!tpu.dma_semaphore, #tpu.memory_space<semaphore_mem>> -> memref<1x1x!tpu.dma_semaphore, #tpu.memory_space<semaphore_mem>>
      %156 = tpu.memref_squeeze %155 : memref<1x1x!tpu.dma_semaphore, #tpu.memory_space<semaphore_mem>> -> memref<!tpu.dma_semaphore, #tpu.memory_space<semaphore_mem>>
      tpu.wait_dma2 semaphore(%156 : memref<!tpu.dma_semaphore, #tpu.memory_space<semaphore_mem>>) src(%152 : memref<1x32xf32, #tpu.memory_space<any>>) dst(%154 : memref<1x32xf32, #tpu.memory_space<vmem>>)
    } else {
    }
    %c19_i32 = arith.constant 19 : i32
    %86 = arith.addi %9, %c19_i32 : i32
    %87 = arith.cmpi slt, %86, %0 : i32
    %88 = arith.extui %87 : i1 to i32
    %c0_i32_25 = arith.constant 0 : i32
    %89 = arith.cmpi ne, %88, %c0_i32_25 : i32
    scf.if %89 {
      %c19_i32_43 = arith.constant 19 : i32
      %c0_i32_44 = arith.constant 0 : i32
      %c0_i32_45 = arith.constant 0 : i32
      %152 = tpu.memref_slice %arg3[%c0_i32_44, %c0_i32_45] : memref<32x32xf32, #tpu.memory_space<any>> -> memref<1x32xf32, #tpu.memory_space<any>>
      %c19_i32_46 = arith.constant 19 : i32
      %c0_i32_47 = arith.constant 0 : i32
      %153 = tpu.memref_slice %arg5[%1, %c19_i32_46, %c0_i32_47] : memref<2x32x32xf32, #tpu.memory_space<vmem>> -> memref<1x1x32xf32, #tpu.memory_space<vmem>>
      %154 = tpu.memref_squeeze %153 : memref<1x1x32xf32, #tpu.memory_space<vmem>> -> memref<1x32xf32, #tpu.memory_space<vmem>>
      %155 = tpu.memref_slice %arg6[%1, %c19_i32_43] : memref<2x32x!tpu.dma_semaphore, #tpu.memory_space<semaphore_mem>> -> memref<1x1x!tpu.dma_semaphore, #tpu.memory_space<semaphore_mem>>
      %156 = tpu.memref_squeeze %155 : memref<1x1x!tpu.dma_semaphore, #tpu.memory_space<semaphore_mem>> -> memref<!tpu.dma_semaphore, #tpu.memory_space<semaphore_mem>>
      tpu.wait_dma2 semaphore(%156 : memref<!tpu.dma_semaphore, #tpu.memory_space<semaphore_mem>>) src(%152 : memref<1x32xf32, #tpu.memory_space<any>>) dst(%154 : memref<1x32xf32, #tpu.memory_space<vmem>>)
    } else {
    }
    %c20_i32 = arith.constant 20 : i32
    %90 = arith.addi %9, %c20_i32 : i32
    %91 = arith.cmpi slt, %90, %0 : i32
    %92 = arith.extui %91 : i1 to i32
    %c0_i32_26 = arith.constant 0 : i32
    %93 = arith.cmpi ne, %92, %c0_i32_26 : i32
    scf.if %93 {
      %c20_i32_43 = arith.constant 20 : i32
      %c0_i32_44 = arith.constant 0 : i32
      %c0_i32_45 = arith.constant 0 : i32
      %152 = tpu.memref_slice %arg3[%c0_i32_44, %c0_i32_45] : memref<32x32xf32, #tpu.memory_space<any>> -> memref<1x32xf32, #tpu.memory_space<any>>
      %c20_i32_46 = arith.constant 20 : i32
      %c0_i32_47 = arith.constant 0 : i32
      %153 = tpu.memref_slice %arg5[%1, %c20_i32_46, %c0_i32_47] : memref<2x32x32xf32, #tpu.memory_space<vmem>> -> memref<1x1x32xf32, #tpu.memory_space<vmem>>
      %154 = tpu.memref_squeeze %153 : memref<1x1x32xf32, #tpu.memory_space<vmem>> -> memref<1x32xf32, #tpu.memory_space<vmem>>
      %155 = tpu.memref_slice %arg6[%1, %c20_i32_43] : memref<2x32x!tpu.dma_semaphore, #tpu.memory_space<semaphore_mem>> -> memref<1x1x!tpu.dma_semaphore, #tpu.memory_space<semaphore_mem>>
      %156 = tpu.memref_squeeze %155 : memref<1x1x!tpu.dma_semaphore, #tpu.memory_space<semaphore_mem>> -> memref<!tpu.dma_semaphore, #tpu.memory_space<semaphore_mem>>
      tpu.wait_dma2 semaphore(%156 : memref<!tpu.dma_semaphore, #tpu.memory_space<semaphore_mem>>) src(%152 : memref<1x32xf32, #tpu.memory_space<any>>) dst(%154 : memref<1x32xf32, #tpu.memory_space<vmem>>)
    } else {
    }
    %c21_i32 = arith.constant 21 : i32
    %94 = arith.addi %9, %c21_i32 : i32
    %95 = arith.cmpi slt, %94, %0 : i32
    %96 = arith.extui %95 : i1 to i32
    %c0_i32_27 = arith.constant 0 : i32
    %97 = arith.cmpi ne, %96, %c0_i32_27 : i32
    scf.if %97 {
      %c21_i32_43 = arith.constant 21 : i32
      %c0_i32_44 = arith.constant 0 : i32
      %c0_i32_45 = arith.constant 0 : i32
      %152 = tpu.memref_slice %arg3[%c0_i32_44, %c0_i32_45] : memref<32x32xf32, #tpu.memory_space<any>> -> memref<1x32xf32, #tpu.memory_space<any>>
      %c21_i32_46 = arith.constant 21 : i32
      %c0_i32_47 = arith.constant 0 : i32
      %153 = tpu.memref_slice %arg5[%1, %c21_i32_46, %c0_i32_47] : memref<2x32x32xf32, #tpu.memory_space<vmem>> -> memref<1x1x32xf32, #tpu.memory_space<vmem>>
      %154 = tpu.memref_squeeze %153 : memref<1x1x32xf32, #tpu.memory_space<vmem>> -> memref<1x32xf32, #tpu.memory_space<vmem>>
      %155 = tpu.memref_slice %arg6[%1, %c21_i32_43] : memref<2x32x!tpu.dma_semaphore, #tpu.memory_space<semaphore_mem>> -> memref<1x1x!tpu.dma_semaphore, #tpu.memory_space<semaphore_mem>>
      %156 = tpu.memref_squeeze %155 : memref<1x1x!tpu.dma_semaphore, #tpu.memory_space<semaphore_mem>> -> memref<!tpu.dma_semaphore, #tpu.memory_space<semaphore_mem>>
      tpu.wait_dma2 semaphore(%156 : memref<!tpu.dma_semaphore, #tpu.memory_space<semaphore_mem>>) src(%152 : memref<1x32xf32, #tpu.memory_space<any>>) dst(%154 : memref<1x32xf32, #tpu.memory_space<vmem>>)
    } else {
    }
    %c22_i32 = arith.constant 22 : i32
    %98 = arith.addi %9, %c22_i32 : i32
    %99 = arith.cmpi slt, %98, %0 : i32
    %100 = arith.extui %99 : i1 to i32
    %c0_i32_28 = arith.constant 0 : i32
    %101 = arith.cmpi ne, %100, %c0_i32_28 : i32
    scf.if %101 {
      %c22_i32_43 = arith.constant 22 : i32
      %c0_i32_44 = arith.constant 0 : i32
      %c0_i32_45 = arith.constant 0 : i32
      %152 = tpu.memref_slice %arg3[%c0_i32_44, %c0_i32_45] : memref<32x32xf32, #tpu.memory_space<any>> -> memref<1x32xf32, #tpu.memory_space<any>>
      %c22_i32_46 = arith.constant 22 : i32
      %c0_i32_47 = arith.constant 0 : i32
      %153 = tpu.memref_slice %arg5[%1, %c22_i32_46, %c0_i32_47] : memref<2x32x32xf32, #tpu.memory_space<vmem>> -> memref<1x1x32xf32, #tpu.memory_space<vmem>>
      %154 = tpu.memref_squeeze %153 : memref<1x1x32xf32, #tpu.memory_space<vmem>> -> memref<1x32xf32, #tpu.memory_space<vmem>>
      %155 = tpu.memref_slice %arg6[%1, %c22_i32_43] : memref<2x32x!tpu.dma_semaphore, #tpu.memory_space<semaphore_mem>> -> memref<1x1x!tpu.dma_semaphore, #tpu.memory_space<semaphore_mem>>
      %156 = tpu.memref_squeeze %155 : memref<1x1x!tpu.dma_semaphore, #tpu.memory_space<semaphore_mem>> -> memref<!tpu.dma_semaphore, #tpu.memory_space<semaphore_mem>>
      tpu.wait_dma2 semaphore(%156 : memref<!tpu.dma_semaphore, #tpu.memory_space<semaphore_mem>>) src(%152 : memref<1x32xf32, #tpu.memory_space<any>>) dst(%154 : memref<1x32xf32, #tpu.memory_space<vmem>>)
    } else {
    }
    %c23_i32 = arith.constant 23 : i32
    %102 = arith.addi %9, %c23_i32 : i32
    %103 = arith.cmpi slt, %102, %0 : i32
    %104 = arith.extui %103 : i1 to i32
    %c0_i32_29 = arith.constant 0 : i32
    %105 = arith.cmpi ne, %104, %c0_i32_29 : i32
    scf.if %105 {
      %c23_i32_43 = arith.constant 23 : i32
      %c0_i32_44 = arith.constant 0 : i32
      %c0_i32_45 = arith.constant 0 : i32
      %152 = tpu.memref_slice %arg3[%c0_i32_44, %c0_i32_45] : memref<32x32xf32, #tpu.memory_space<any>> -> memref<1x32xf32, #tpu.memory_space<any>>
      %c23_i32_46 = arith.constant 23 : i32
      %c0_i32_47 = arith.constant 0 : i32
      %153 = tpu.memref_slice %arg5[%1, %c23_i32_46, %c0_i32_47] : memref<2x32x32xf32, #tpu.memory_space<vmem>> -> memref<1x1x32xf32, #tpu.memory_space<vmem>>
      %154 = tpu.memref_squeeze %153 : memref<1x1x32xf32, #tpu.memory_space<vmem>> -> memref<1x32xf32, #tpu.memory_space<vmem>>
      %155 = tpu.memref_slice %arg6[%1, %c23_i32_43] : memref<2x32x!tpu.dma_semaphore, #tpu.memory_space<semaphore_mem>> -> memref<1x1x!tpu.dma_semaphore, #tpu.memory_space<semaphore_mem>>
      %156 = tpu.memref_squeeze %155 : memref<1x1x!tpu.dma_semaphore, #tpu.memory_space<semaphore_mem>> -> memref<!tpu.dma_semaphore, #tpu.memory_space<semaphore_mem>>
      tpu.wait_dma2 semaphore(%156 : memref<!tpu.dma_semaphore, #tpu.memory_space<semaphore_mem>>) src(%152 : memref<1x32xf32, #tpu.memory_space<any>>) dst(%154 : memref<1x32xf32, #tpu.memory_space<vmem>>)
    } else {
    }
    %c24_i32 = arith.constant 24 : i32
    %106 = arith.addi %9, %c24_i32 : i32
    %107 = arith.cmpi slt, %106, %0 : i32
    %108 = arith.extui %107 : i1 to i32
    %c0_i32_30 = arith.constant 0 : i32
    %109 = arith.cmpi ne, %108, %c0_i32_30 : i32
    scf.if %109 {
      %c24_i32_43 = arith.constant 24 : i32
      %c0_i32_44 = arith.constant 0 : i32
      %c0_i32_45 = arith.constant 0 : i32
      %152 = tpu.memref_slice %arg3[%c0_i32_44, %c0_i32_45] : memref<32x32xf32, #tpu.memory_space<any>> -> memref<1x32xf32, #tpu.memory_space<any>>
      %c24_i32_46 = arith.constant 24 : i32
      %c0_i32_47 = arith.constant 0 : i32
      %153 = tpu.memref_slice %arg5[%1, %c24_i32_46, %c0_i32_47] : memref<2x32x32xf32, #tpu.memory_space<vmem>> -> memref<1x1x32xf32, #tpu.memory_space<vmem>>
      %154 = tpu.memref_squeeze %153 : memref<1x1x32xf32, #tpu.memory_space<vmem>> -> memref<1x32xf32, #tpu.memory_space<vmem>>
      %155 = tpu.memref_slice %arg6[%1, %c24_i32_43] : memref<2x32x!tpu.dma_semaphore, #tpu.memory_space<semaphore_mem>> -> memref<1x1x!tpu.dma_semaphore, #tpu.memory_space<semaphore_mem>>
      %156 = tpu.memref_squeeze %155 : memref<1x1x!tpu.dma_semaphore, #tpu.memory_space<semaphore_mem>> -> memref<!tpu.dma_semaphore, #tpu.memory_space<semaphore_mem>>
      tpu.wait_dma2 semaphore(%156 : memref<!tpu.dma_semaphore, #tpu.memory_space<semaphore_mem>>) src(%152 : memref<1x32xf32, #tpu.memory_space<any>>) dst(%154 : memref<1x32xf32, #tpu.memory_space<vmem>>)
    } else {
    }
    %c25_i32 = arith.constant 25 : i32
    %110 = arith.addi %9, %c25_i32 : i32
    %111 = arith.cmpi slt, %110, %0 : i32
    %112 = arith.extui %111 : i1 to i32
    %c0_i32_31 = arith.constant 0 : i32
    %113 = arith.cmpi ne, %112, %c0_i32_31 : i32
    scf.if %113 {
      %c25_i32_43 = arith.constant 25 : i32
      %c0_i32_44 = arith.constant 0 : i32
      %c0_i32_45 = arith.constant 0 : i32
      %152 = tpu.memref_slice %arg3[%c0_i32_44, %c0_i32_45] : memref<32x32xf32, #tpu.memory_space<any>> -> memref<1x32xf32, #tpu.memory_space<any>>
      %c25_i32_46 = arith.constant 25 : i32
      %c0_i32_47 = arith.constant 0 : i32
      %153 = tpu.memref_slice %arg5[%1, %c25_i32_46, %c0_i32_47] : memref<2x32x32xf32, #tpu.memory_space<vmem>> -> memref<1x1x32xf32, #tpu.memory_space<vmem>>
      %154 = tpu.memref_squeeze %153 : memref<1x1x32xf32, #tpu.memory_space<vmem>> -> memref<1x32xf32, #tpu.memory_space<vmem>>
      %155 = tpu.memref_slice %arg6[%1, %c25_i32_43] : memref<2x32x!tpu.dma_semaphore, #tpu.memory_space<semaphore_mem>> -> memref<1x1x!tpu.dma_semaphore, #tpu.memory_space<semaphore_mem>>
      %156 = tpu.memref_squeeze %155 : memref<1x1x!tpu.dma_semaphore, #tpu.memory_space<semaphore_mem>> -> memref<!tpu.dma_semaphore, #tpu.memory_space<semaphore_mem>>
      tpu.wait_dma2 semaphore(%156 : memref<!tpu.dma_semaphore, #tpu.memory_space<semaphore_mem>>) src(%152 : memref<1x32xf32, #tpu.memory_space<any>>) dst(%154 : memref<1x32xf32, #tpu.memory_space<vmem>>)
    } else {
    }
    %c26_i32 = arith.constant 26 : i32
    %114 = arith.addi %9, %c26_i32 : i32
    %115 = arith.cmpi slt, %114, %0 : i32
    %116 = arith.extui %115 : i1 to i32
    %c0_i32_32 = arith.constant 0 : i32
    %117 = arith.cmpi ne, %116, %c0_i32_32 : i32
    scf.if %117 {
      %c26_i32_43 = arith.constant 26 : i32
      %c0_i32_44 = arith.constant 0 : i32
      %c0_i32_45 = arith.constant 0 : i32
      %152 = tpu.memref_slice %arg3[%c0_i32_44, %c0_i32_45] : memref<32x32xf32, #tpu.memory_space<any>> -> memref<1x32xf32, #tpu.memory_space<any>>
      %c26_i32_46 = arith.constant 26 : i32
      %c0_i32_47 = arith.constant 0 : i32
      %153 = tpu.memref_slice %arg5[%1, %c26_i32_46, %c0_i32_47] : memref<2x32x32xf32, #tpu.memory_space<vmem>> -> memref<1x1x32xf32, #tpu.memory_space<vmem>>
      %154 = tpu.memref_squeeze %153 : memref<1x1x32xf32, #tpu.memory_space<vmem>> -> memref<1x32xf32, #tpu.memory_space<vmem>>
      %155 = tpu.memref_slice %arg6[%1, %c26_i32_43] : memref<2x32x!tpu.dma_semaphore, #tpu.memory_space<semaphore_mem>> -> memref<1x1x!tpu.dma_semaphore, #tpu.memory_space<semaphore_mem>>
      %156 = tpu.memref_squeeze %155 : memref<1x1x!tpu.dma_semaphore, #tpu.memory_space<semaphore_mem>> -> memref<!tpu.dma_semaphore, #tpu.memory_space<semaphore_mem>>
      tpu.wait_dma2 semaphore(%156 : memref<!tpu.dma_semaphore, #tpu.memory_space<semaphore_mem>>) src(%152 : memref<1x32xf32, #tpu.memory_space<any>>) dst(%154 : memref<1x32xf32, #tpu.memory_space<vmem>>)
    } else {
    }
    %c27_i32 = arith.constant 27 : i32
    %118 = arith.addi %9, %c27_i32 : i32
    %119 = arith.cmpi slt, %118, %0 : i32
    %120 = arith.extui %119 : i1 to i32
    %c0_i32_33 = arith.constant 0 : i32
    %121 = arith.cmpi ne, %120, %c0_i32_33 : i32
    scf.if %121 {
      %c27_i32_43 = arith.constant 27 : i32
      %c0_i32_44 = arith.constant 0 : i32
      %c0_i32_45 = arith.constant 0 : i32
      %152 = tpu.memref_slice %arg3[%c0_i32_44, %c0_i32_45] : memref<32x32xf32, #tpu.memory_space<any>> -> memref<1x32xf32, #tpu.memory_space<any>>
      %c27_i32_46 = arith.constant 27 : i32
      %c0_i32_47 = arith.constant 0 : i32
      %153 = tpu.memref_slice %arg5[%1, %c27_i32_46, %c0_i32_47] : memref<2x32x32xf32, #tpu.memory_space<vmem>> -> memref<1x1x32xf32, #tpu.memory_space<vmem>>
      %154 = tpu.memref_squeeze %153 : memref<1x1x32xf32, #tpu.memory_space<vmem>> -> memref<1x32xf32, #tpu.memory_space<vmem>>
      %155 = tpu.memref_slice %arg6[%1, %c27_i32_43] : memref<2x32x!tpu.dma_semaphore, #tpu.memory_space<semaphore_mem>> -> memref<1x1x!tpu.dma_semaphore, #tpu.memory_space<semaphore_mem>>
      %156 = tpu.memref_squeeze %155 : memref<1x1x!tpu.dma_semaphore, #tpu.memory_space<semaphore_mem>> -> memref<!tpu.dma_semaphore, #tpu.memory_space<semaphore_mem>>
      tpu.wait_dma2 semaphore(%156 : memref<!tpu.dma_semaphore, #tpu.memory_space<semaphore_mem>>) src(%152 : memref<1x32xf32, #tpu.memory_space<any>>) dst(%154 : memref<1x32xf32, #tpu.memory_space<vmem>>)
    } else {
    }
    %c28_i32 = arith.constant 28 : i32
    %122 = arith.addi %9, %c28_i32 : i32
    %123 = arith.cmpi slt, %122, %0 : i32
    %124 = arith.extui %123 : i1 to i32
    %c0_i32_34 = arith.constant 0 : i32
    %125 = arith.cmpi ne, %124, %c0_i32_34 : i32
    scf.if %125 {
      %c28_i32_43 = arith.constant 28 : i32
      %c0_i32_44 = arith.constant 0 : i32
      %c0_i32_45 = arith.constant 0 : i32
      %152 = tpu.memref_slice %arg3[%c0_i32_44, %c0_i32_45] : memref<32x32xf32, #tpu.memory_space<any>> -> memref<1x32xf32, #tpu.memory_space<any>>
      %c28_i32_46 = arith.constant 28 : i32
      %c0_i32_47 = arith.constant 0 : i32
      %153 = tpu.memref_slice %arg5[%1, %c28_i32_46, %c0_i32_47] : memref<2x32x32xf32, #tpu.memory_space<vmem>> -> memref<1x1x32xf32, #tpu.memory_space<vmem>>
      %154 = tpu.memref_squeeze %153 : memref<1x1x32xf32, #tpu.memory_space<vmem>> -> memref<1x32xf32, #tpu.memory_space<vmem>>
      %155 = tpu.memref_slice %arg6[%1, %c28_i32_43] : memref<2x32x!tpu.dma_semaphore, #tpu.memory_space<semaphore_mem>> -> memref<1x1x!tpu.dma_semaphore, #tpu.memory_space<semaphore_mem>>
      %156 = tpu.memref_squeeze %155 : memref<1x1x!tpu.dma_semaphore, #tpu.memory_space<semaphore_mem>> -> memref<!tpu.dma_semaphore, #tpu.memory_space<semaphore_mem>>
      tpu.wait_dma2 semaphore(%156 : memref<!tpu.dma_semaphore, #tpu.memory_space<semaphore_mem>>) src(%152 : memref<1x32xf32, #tpu.memory_space<any>>) dst(%154 : memref<1x32xf32, #tpu.memory_space<vmem>>)
    } else {
    }
    %c29_i32 = arith.constant 29 : i32
    %126 = arith.addi %9, %c29_i32 : i32
    %127 = arith.cmpi slt, %126, %0 : i32
    %128 = arith.extui %127 : i1 to i32
    %c0_i32_35 = arith.constant 0 : i32
    %129 = arith.cmpi ne, %128, %c0_i32_35 : i32
    scf.if %129 {
      %c29_i32_43 = arith.constant 29 : i32
      %c0_i32_44 = arith.constant 0 : i32
      %c0_i32_45 = arith.constant 0 : i32
      %152 = tpu.memref_slice %arg3[%c0_i32_44, %c0_i32_45] : memref<32x32xf32, #tpu.memory_space<any>> -> memref<1x32xf32, #tpu.memory_space<any>>
      %c29_i32_46 = arith.constant 29 : i32
      %c0_i32_47 = arith.constant 0 : i32
      %153 = tpu.memref_slice %arg5[%1, %c29_i32_46, %c0_i32_47] : memref<2x32x32xf32, #tpu.memory_space<vmem>> -> memref<1x1x32xf32, #tpu.memory_space<vmem>>
      %154 = tpu.memref_squeeze %153 : memref<1x1x32xf32, #tpu.memory_space<vmem>> -> memref<1x32xf32, #tpu.memory_space<vmem>>
      %155 = tpu.memref_slice %arg6[%1, %c29_i32_43] : memref<2x32x!tpu.dma_semaphore, #tpu.memory_space<semaphore_mem>> -> memref<1x1x!tpu.dma_semaphore, #tpu.memory_space<semaphore_mem>>
      %156 = tpu.memref_squeeze %155 : memref<1x1x!tpu.dma_semaphore, #tpu.memory_space<semaphore_mem>> -> memref<!tpu.dma_semaphore, #tpu.memory_space<semaphore_mem>>
      tpu.wait_dma2 semaphore(%156 : memref<!tpu.dma_semaphore, #tpu.memory_space<semaphore_mem>>) src(%152 : memref<1x32xf32, #tpu.memory_space<any>>) dst(%154 : memref<1x32xf32, #tpu.memory_space<vmem>>)
    } else {
    }
    %c30_i32 = arith.constant 30 : i32
    %130 = arith.addi %9, %c30_i32 : i32
    %131 = arith.cmpi slt, %130, %0 : i32
    %132 = arith.extui %131 : i1 to i32
    %c0_i32_36 = arith.constant 0 : i32
    %133 = arith.cmpi ne, %132, %c0_i32_36 : i32
    scf.if %133 {
      %c30_i32_43 = arith.constant 30 : i32
      %c0_i32_44 = arith.constant 0 : i32
      %c0_i32_45 = arith.constant 0 : i32
      %152 = tpu.memref_slice %arg3[%c0_i32_44, %c0_i32_45] : memref<32x32xf32, #tpu.memory_space<any>> -> memref<1x32xf32, #tpu.memory_space<any>>
      %c30_i32_46 = arith.constant 30 : i32
      %c0_i32_47 = arith.constant 0 : i32
      %153 = tpu.memref_slice %arg5[%1, %c30_i32_46, %c0_i32_47] : memref<2x32x32xf32, #tpu.memory_space<vmem>> -> memref<1x1x32xf32, #tpu.memory_space<vmem>>
      %154 = tpu.memref_squeeze %153 : memref<1x1x32xf32, #tpu.memory_space<vmem>> -> memref<1x32xf32, #tpu.memory_space<vmem>>
      %155 = tpu.memref_slice %arg6[%1, %c30_i32_43] : memref<2x32x!tpu.dma_semaphore, #tpu.memory_space<semaphore_mem>> -> memref<1x1x!tpu.dma_semaphore, #tpu.memory_space<semaphore_mem>>
      %156 = tpu.memref_squeeze %155 : memref<1x1x!tpu.dma_semaphore, #tpu.memory_space<semaphore_mem>> -> memref<!tpu.dma_semaphore, #tpu.memory_space<semaphore_mem>>
      tpu.wait_dma2 semaphore(%156 : memref<!tpu.dma_semaphore, #tpu.memory_space<semaphore_mem>>) src(%152 : memref<1x32xf32, #tpu.memory_space<any>>) dst(%154 : memref<1x32xf32, #tpu.memory_space<vmem>>)
    } else {
    }
    %c31_i32 = arith.constant 31 : i32
    %134 = arith.addi %9, %c31_i32 : i32
    %135 = arith.cmpi slt, %134, %0 : i32
    %136 = arith.extui %135 : i1 to i32
    %c0_i32_37 = arith.constant 0 : i32
    %137 = arith.cmpi ne, %136, %c0_i32_37 : i32
    scf.if %137 {
      %c31_i32_43 = arith.constant 31 : i32
      %c0_i32_44 = arith.constant 0 : i32
      %c0_i32_45 = arith.constant 0 : i32
      %152 = tpu.memref_slice %arg3[%c0_i32_44, %c0_i32_45] : memref<32x32xf32, #tpu.memory_space<any>> -> memref<1x32xf32, #tpu.memory_space<any>>
      %c31_i32_46 = arith.constant 31 : i32
      %c0_i32_47 = arith.constant 0 : i32
      %153 = tpu.memref_slice %arg5[%1, %c31_i32_46, %c0_i32_47] : memref<2x32x32xf32, #tpu.memory_space<vmem>> -> memref<1x1x32xf32, #tpu.memory_space<vmem>>
      %154 = tpu.memref_squeeze %153 : memref<1x1x32xf32, #tpu.memory_space<vmem>> -> memref<1x32xf32, #tpu.memory_space<vmem>>
      %155 = tpu.memref_slice %arg6[%1, %c31_i32_43] : memref<2x32x!tpu.dma_semaphore, #tpu.memory_space<semaphore_mem>> -> memref<1x1x!tpu.dma_semaphore, #tpu.memory_space<semaphore_mem>>
      %156 = tpu.memref_squeeze %155 : memref<1x1x!tpu.dma_semaphore, #tpu.memory_space<semaphore_mem>> -> memref<!tpu.dma_semaphore, #tpu.memory_space<semaphore_mem>>
      tpu.wait_dma2 semaphore(%156 : memref<!tpu.dma_semaphore, #tpu.memory_space<semaphore_mem>>) src(%152 : memref<1x32xf32, #tpu.memory_space<any>>) dst(%154 : memref<1x32xf32, #tpu.memory_space<vmem>>)
    } else {
    }
    %c32_i32_38 = arith.constant 32 : i32
    %138 = arith.muli %arg0, %c32_i32_38 : i32
    %139 = tpu.iota {dimensions = array<i32: 0>} : vector<32x1xi32>
    %140 = vector.broadcast %138 : i32 to vector<32x1xi32>
    %141 = arith.addi %140, %139 : vector<32x1xi32>
    %142 = vector.broadcast %0 : i32 to vector<32x1xi32>
    %143 = arith.cmpi slt, %141, %142 : vector<32x1xi32>
    %144 = arith.index_cast %1 : i32 to index
    %c0_39 = arith.constant 0 : index
    %c0_40 = arith.constant 0 : index
    %145 = vector.load %arg5[%144, %c0_39, %c0_40] : memref<2x32x32xf32, #tpu.memory_space<vmem>>, vector<1x32x32xf32>
    %146 = vector.shape_cast %145 : vector<1x32x32xf32> to vector<32x32xf32>
    %cst = arith.constant 0.000000e+00 : f32
    %147 = vector.shape_cast %143 : vector<32x1xi1> to vector<32x1xi1>
    %148 = vector.broadcast %147 : vector<32x1xi1> to vector<32x32xi1>
    %149 = vector.broadcast %cst : f32 to vector<32x32xf32>
    %150 = arith.select %148, %146, %149 : vector<32x32xi1>, vector<32x32xf32>
    %c0_41 = arith.constant 0 : index
    %c0_42 = arith.constant 0 : index
    %151 = vector.load %arg4[%c0_41, %c0_42] : memref<32x32xf32, #tpu.memory_space<vmem>>, vector<32x32xf32>
    tpu.vector_store %arg4[%c0_41, %c0_42], %150 {strides = array<i32>} : memref<32x32xf32, #tpu.memory_space<vmem>>, vector<32x32xf32>,
    return
  }
  func.func @transform_1(%arg0: i32, %arg1: memref<32xi32, #tpu.memory_space<smem>>, %arg2: memref<1xi32, #tpu.memory_space<smem>>) -> (i32, i32) {
    %c0_i32 = arith.constant 0 : i32
    %c0_i32_0 = arith.constant 0 : i32
    return %arg0, %c0_i32 : i32, i32
  }
}

</mosaic_0001>

<bundles_post_ra>
// kernel: custom-call.1
= control target key start
LH: loop header
LB: loop body
LE: loop exit
PB: predicated region body
PF: predicated region fallthrough
CT: control target
= control target key end

     0   :  { %s6_s0 = inlined_call_operand.vmem [shape: u32[32], index: 0, kind: output, shape index: {}]  }

// kernel: neg.1
= control target key start
LH: loop header
LB: loop body
LE: loop exit
PB: predicated region body
PF: predicated region fallthrough
CT: control target
= control target key end

     0   :  { %s24_s0 = inlined_call_operand.vmem [shape: s32[4], index: 0, kind: input, shape index: {}]   ;;  %s25_s1 = inlined_call_operand.vmem [shape: s32[4], index: 1, kind: output, shape index: {}]  }
   0x1   :  { %v2_v0 = vld [vmem:[%s24_s0] sm:$0x1] }
   0x2   :  { %v5_v1 = vsub.s32 0, %v2_v0 }
   0x4   :  { %7 = vst [vmem:[%s25_s1] sm:$0x1] %v5_v1 }

// kernel: pack_sequence.1
= control target key start
LH: loop header
LB: loop body
LE: loop exit
PB: predicated region body
PF: predicated region fallthrough
CT: control target
= control target key end

     0   :  { %s6176_s0 = inlined_call_operand.vmem [shape: s32[32], index: 0, kind: input, shape index: {}]   ;;  %s6177_s1 = inlined_call_operand.<no memory space> [shape: s32[1], index: 1, kind: input, shape index: {}]   ;;  %s6178_s2 = inlined_call_operand.vmem [shape: f32[32,32], index: 2, kind: input, shape index: {}]   ;;  %s6179_s3 = inlined_call_operand.hbm [shape: f32[32,32], index: 3, kind: output, shape index: {}]  }
   0x1   :  { %s8_s14 = sshll.u32 %s6176_s0, 4  ;;  %s9_s14 = int_to_ptr.vmem [resolvable:$true] %s8_s14 }
   0x2   :  { %s5676_s15 = scalar_lea.vmem %s9_s14, 16  ;;  %p5681_p1 = scmp.lt.s32.totalorder %s9_s14, %s9_s14 }
   0x3   :  { %p5677_p0 = scmp.ne.s32.totalorder %s9_s14, %s5676_s15  ;;  %p5682_p2 = scmp.lt.s32.totalorder %s5676_s15, %s5676_s15 }
   0x5   :  { %p5683_p3 = por %p5682_p2, %p5681_p1 }
   0x7   :  { %p5684_p4 = pnand %p5683_p3, %p5677_p0 }
   0x9   :  { %5687 = shalt.err (!%p5684_p4)  }
   0xa   :  { %s5842_s16 = smov [#allocation5]  }
   0xb   :  { %11 = dma.vmem_to_smem %s9_s14, 16, %s5842_s16, [#allocation4] }
   0xc   :  { %5710 = dma.done.wait [#allocation4], 16 }
   0xd   :  { %5711 = vsyncadd [#allocation4], 4294967280 }
   0xe   :  { %14 = sfence }
   0xf   :  { %15 = vsyncpa [#allocation8], 0  ;;  %p5289_p5 = scmp.le.s32.totalorder %s6177_s1, 0 }
  0x10   :  { %s27_s0 = sld [smem:[#allocation5]] (!%p5289_p5) }
  0x11   :  { %26 = sbr.rel (%p5289_p5) target bundleno = 26 (0x1a), region = 9 }
  0x16   :  { %s28_s21 = scalar_lea.vmem (!%p5289_p5), %s6178_s2, %s27_s0 }
  0x17   :  { %v46_v0 = vld [vmem:[%s28_s21] sm:$0x1] (!%p5289_p5) }
  0x18   :  { %47 = vst [vmem:[#allocation2] sm:$0x1] %v46_v0 }
  0x19   :  { %72 = vsyncadd [#allocation3], 16 }
  0x1a PF:  { %p5290_p6 = scmp.le.s32.totalorder %s6177_s1, 1 }
  0x1b   :  { %s5291_s24 = sld [smem:[#allocation5 + $0x1]] (!%p5290_p6) }
  0x1c   :  { %76 = sbr.rel (%p5290_p6) target bundleno = 37 (0x25), region = 43 }
  0x21   :  { %s78_s27 = scalar_lea.vmem (!%p5290_p6), %s6178_s2, %s5291_s24 }
  0x22   :  { %v98_v1 = vld [vmem:[%s78_s27] sm:$0x1] (!%p5290_p6) }
  0x23   :  { %99 = vst [vmem:[#allocation2 + $0x1] sm:$0x1] %v98_v1 }
  0x24   :  { %124 = vsyncadd [#allocation3 + $0x1], 16 }
  0x25 PF:  { %p5292_p7 = scmp.le.s32.totalorder %s6177_s1, 2 }
  0x26   :  { %s5293_s30 = sld [smem:[#allocation5 + $0x2]] (!%p5292_p7) }
  0x27   :  { %128 = sbr.rel (%p5292_p7) target bundleno = 48 (0x30), region = 77 }
  0x2c   :  { %s130_s6 = scalar_lea.vmem (!%p5292_p7), %s6178_s2, %s5293_s30 }
  0x2d   :  { %v150_v2 = vld [vmem:[%s130_s6] sm:$0x1] (!%p5292_p7) }
  0x2e   :  { %151 = vst [vmem:[#allocation2 + $0x2] sm:$0x1] %v150_v2 }
  0x2f   :  { %176 = vsyncadd [#allocation3 + $0x2], 16 }
  0x30 PF:  { %p5294_p8 = scmp.le.s32.totalorder %s6177_s1, 3 }
  0x31   :  { %s5295_s9 = sld [smem:[#allocation5 + $0x3]] (!%p5294_p8) }
  0x32   :  { %180 = sbr.rel (%p5294_p8) target bundleno = 59 (0x3b), region = 111 }
  0x37   :  { %s182_s12 = scalar_lea.vmem (!%p5294_p8), %s6178_s2, %s5295_s9 }
  0x38   :  { %v202_v3 = vld [vmem:[%s182_s12] sm:$0x1] (!%p5294_p8) }
  0x39   :  { %203 = vst [vmem:[#allocation2 + $0x3] sm:$0x1] %v202_v3 }
  0x3a   :  { %228 = vsyncadd [#allocation3 + $0x3], 16 }
  0x3b PF:  { %p5296_p9 = scmp.le.s32.totalorder %s6177_s1, 4 }
  0x3c   :  { %s5297_s15 = sld [smem:[#allocation5 + $0x4]] (!%p5296_p9) }
  0x3d   :  { %232 = sbr.rel (%p5296_p9) target bundleno = 70 (0x46), region = 145 }
  0x42   :  { %s234_s18 = scalar_lea.vmem (!%p5296_p9), %s6178_s2, %s5297_s15 }
  0x43   :  { %v254_v4 = vld [vmem:[%s234_s18] sm:$0x1] (!%p5296_p9) }
  0x44   :  { %255 = vst [vmem:[#allocation2 + $0x4] sm:$0x1] %v254_v4 }
  0x45   :  { %280 = vsyncadd [#allocation3 + $0x4], 16 }
  0x46 PF:  { %p5298_p10 = scmp.le.s32.totalorder %s6177_s1, 5 }
  0x47   :  { %s5299_s20 = sld [smem:[#allocation5 + $0x5]] (!%p5298_p10) }
  0x48   :  { %284 = sbr.rel (%p5298_p10) target bundleno = 81 (0x51), region = 179 }
  0x4d   :  { %s286_s23 = scalar_lea.vmem (!%p5298_p10), %s6178_s2, %s5299_s20 }
  0x4e   :  { %v306_v5 = vld [vmem:[%s286_s23] sm:$0x1] (!%p5298_p10) }
  0x4f   :  { %307 = vst [vmem:[#allocation2 + $0x5] sm:$0x1] %v306_v5 }
  0x50   :  { %332 = vsyncadd [#allocation3 + $0x5], 16 }
  0x51 PF:  { %p5300_p11 = scmp.le.s32.totalorder %s6177_s1, 6 }
  0x52   :  { %s5301_s26 = sld [smem:[#allocation5 + $0x6]] (!%p5300_p11) }
  0x53   :  { %336 = sbr.rel (%p5300_p11) target bundleno = 92 (0x5c), region = 213 }
  0x58   :  { %s338_s29 = scalar_lea.vmem (!%p5300_p11), %s6178_s2, %s5301_s26 }
  0x59   :  { %v358_v6 = vld [vmem:[%s338_s29] sm:$0x1] (!%p5300_p11) }
  0x5a   :  { %359 = vst [vmem:[#allocation2 + $0x6] sm:$0x1] %v358_v6 }
  0x5b   :  { %384 = vsyncadd [#allocation3 + $0x6], 16 }
  0x5c PF:  { %p5302_p12 = scmp.le.s32.totalorder %s6177_s1, 7 }
  0x5d   :  { %s5303_s5 = sld [smem:[#allocation5 + $0x7]] (!%p5302_p12) }
  0x5e   :  { %388 = sbr.rel (%p5302_p12) target bundleno = 103 (0x67), region = 247 }
  0x63   :  { %s390_s8 = scalar_lea.vmem (!%p5302_p12), %s6178_s2, %s5303_s5 }
  0x64   :  { %v410_v7 = vld [vmem:[%s390_s8] sm:$0x1] (!%p5302_p12) }
  0x65   :  { %411 = vst [vmem:[#allocation2 + $0x7] sm:$0x1] %v410_v7 }
  0x66   :  { %436 = vsyncadd [#allocation3 + $0x7], 16 }
  0x67 PF:  { %p5304_p13 = scmp.le.s32.totalorder %s6177_s1, 8 }
  0x68   :  { %s5305_s11 = sld [smem:[#allocation5 + $0x8]] (!%p5304_p13) }
  0x69   :  { %440 = sbr.rel (%p5304_p13) target bundleno = 114 (0x72), region = 281 }
  0x6e   :  { %s442_s14 = scalar_lea.vmem (!%p5304_p13), %s6178_s2, %s5305_s11 }
  0x6f   :  { %v462_v8 = vld [vmem:[%s442_s14] sm:$0x1] (!%p5304_p13) }
  0x70   :  { %463 = vst [vmem:[#allocation2 + $0x8] sm:$0x1] %v462_v8 }
  0x71   :  { %488 = vsyncadd [#allocation3 + $0x8], 16 }
  0x72 PF:  { %p5306_p0 = scmp.le.s32.totalorder %s6177_s1, 9 }
  0x73   :  { %s5307_s17 = sld [smem:[#allocation5 + $0x9]] (!%p5306_p0) }
  0x74   :  { %492 = sbr.rel (%p5306_p0) target bundleno = 125 (0x7d), region = 315 }
  0x79   :  { %s494_s19 = scalar_lea.vmem (!%p5306_p0), %s6178_s2, %s5307_s17 }
  0x7a   :  { %v514_v9 = vld [vmem:[%s494_s19] sm:$0x1] (!%p5306_p0) }
  0x7b   :  { %515 = vst [vmem:[#allocation2 + $0x9] sm:$0x1] %v514_v9 }
  0x7c   :  { %540 = vsyncadd [#allocation3 + $0x9], 16 }
  0x7d PF:  { %p5308_p1 = scmp.le.s32.totalorder %s6177_s1, 10 }
  0x7e   :  { %s5309_s22 = sld [smem:[#allocation5 + $0xa]] (!%p5308_p1) }
  0x7f   :  { %544 = sbr.rel (%p5308_p1) target bundleno = 136 (0x88), region = 349 }
  0x84   :  { %s546_s25 = scalar_lea.vmem (!%p5308_p1), %s6178_s2, %s5309_s22 }
  0x85   :  { %v566_v10 = vld [vmem:[%s546_s25] sm:$0x1] (!%p5308_p1) }
  0x86   :  { %567 = vst [vmem:[#allocation2 + $0xa] sm:$0x1] %v566_v10 }
  0x87   :  { %592 = vsyncadd [#allocation3 + $0xa], 16 }
  0x88 PF:  { %p5310_p2 = scmp.le.s32.totalorder %s6177_s1, 11 }
  0x89   :  { %s5311_s28 = sld [smem:[#allocation5 + $0xb]] (!%p5310_p2) }
  0x8a   :  { %596 = sbr.rel (%p5310_p2) target bundleno = 147 (0x93), region = 383 }
  0x8f   :  { %s598_s4 = scalar_lea.vmem (!%p5310_p2), %s6178_s2, %s5311_s28 }
  0x90   :  { %v618_v11 = vld [vmem:[%s598_s4] sm:$0x1] (!%p5310_p2) }
  0x91   :  { %619 = vst [vmem:[#allocation2 + $0xb] sm:$0x1] %v618_v11 }
  0x92   :  { %644 = vsyncadd [#allocation3 + $0xb], 16 }
  0x93 PF:  { %p5312_p3 = scmp.le.s32.totalorder %s6177_s1, 12 }
  0x94   :  { %s5313_s7 = sld [smem:[#allocation5 + $0xc]] (!%p5312_p3) }
  0x95   :  { %648 = sbr.rel (%p5312_p3) target bundleno = 158 (0x9e), region = 417 }
  0x9a   :  { %s650_s10 = scalar_lea.vmem (!%p5312_p3), %s6178_s2, %s5313_s7 }
  0x9b   :  { %v670_v12 = vld [vmem:[%s650_s10] sm:$0x1] (!%p5312_p3) }
  0x9c   :  { %671 = vst [vmem:[#allocation2 + $0xc] sm:$0x1] %v670_v12 }
  0x9d   :  { %696 = vsyncadd [#allocation3 + $0xc], 16 }
  0x9e PF:  { %p5314_p4 = scmp.le.s32.totalorder %s6177_s1, 13 }
  0x9f   :  { %s5315_s13 = sld [smem:[#allocation5 + $0xd]] (!%p5314_p4) }
  0xa0   :  { %700 = sbr.rel (%p5314_p4) target bundleno = 169 (0xa9), region = 451 }
  0xa5   :  { %s702_s16 = scalar_lea.vmem (!%p5314_p4), %s6178_s2, %s5315_s13 }
  0xa6   :  { %v722_v13 = vld [vmem:[%s702_s16] sm:$0x1] (!%p5314_p4) }
  0xa7   :  { %723 = vst [vmem:[#allocation2 + $0xd] sm:$0x1] %v722_v13 }
  0xa8   :  { %748 = vsyncadd [#allocation3 + $0xd], 16 }
  0xa9 PF:  { %p5316_p5 = scmp.le.s32.totalorder %s6177_s1, 14 }
  0xaa   :  { %s5317_s0 = sld [smem:[#allocation5 + $0xe]] (!%p5316_p5) }
  0xab   :  { %752 = sbr.rel (%p5316_p5) target bundleno = 180 (0xb4), region = 485 }
  0xb0   :  { %s754_s21 = scalar_lea.vmem (!%p5316_p5), %s6178_s2, %s5317_s0 }
  0xb1   :  { %v774_v14 = vld [vmem:[%s754_s21] sm:$0x1] (!%p5316_p5) }
  0xb2   :  { %775 = vst [vmem:[#allocation2 + $0xe] sm:$0x1] %v774_v14 }
  0xb3   :  { %800 = vsyncadd [#allocation3 + $0xe], 16 }
  0xb4 PF:  { %p5318_p6 = scmp.le.s32.totalorder %s6177_s1, 15 }
  0xb5   :  { %s5319_s24 = sld [smem:[#allocation5 + $0xf]] (!%p5318_p6) }
  0xb6   :  { %804 = sbr.rel (%p5318_p6) target bundleno = 191 (0xbf), region = 519 }
  0xbb   :  { %s806_s27 = scalar_lea.vmem (!%p5318_p6), %s6178_s2, %s5319_s24 }
  0xbc   :  { %v826_v15 = vld [vmem:[%s806_s27] sm:$0x1] (!%p5318_p6) }
  0xbd   :  { %827 = vst [vmem:[#allocation2 + $0xf] sm:$0x1] %v826_v15 }
  0xbe   :  { %852 = vsyncadd [#allocation3 + $0xf], 16 }
  0xbf PF:  { %p5320_p7 = scmp.le.s32.totalorder %s6177_s1, 16 }
  0xc0   :  { %s5321_s30 = sld [smem:[#allocation5 + $0x10]] (!%p5320_p7) }
  0xc1   :  { %856 = sbr.rel (%p5320_p7) target bundleno = 202 (0xca), region = 553 }
  0xc6   :  { %s858_s6 = scalar_lea.vmem (!%p5320_p7), %s6178_s2, %s5321_s30 }
  0xc7   :  { %v878_v16 = vld [vmem:[%s858_s6] sm:$0x1] (!%p5320_p7) }
  0xc8   :  { %879 = vst [vmem:[#allocation2 + $0x10] sm:$0x1] %v878_v16 }
  0xc9   :  { %904 = vsyncadd [#allocation3 + $0x10], 16 }
  0xca PF:  { %p5322_p8 = scmp.le.s32.totalorder %s6177_s1, 17 }
  0xcb   :  { %s5323_s9 = sld [smem:[#allocation5 + $0x11]] (!%p5322_p8) }
  0xcc   :  { %908 = sbr.rel (%p5322_p8) target bundleno = 213 (0xd5), region = 587 }
  0xd1   :  { %s910_s12 = scalar_lea.vmem (!%p5322_p8), %s6178_s2, %s5323_s9 }
  0xd2   :  { %v930_v17 = vld [vmem:[%s910_s12] sm:$0x1] (!%p5322_p8) }
  0xd3   :  { %931 = vst [vmem:[#allocation2 + $0x11] sm:$0x1] %v930_v17 }
  0xd4   :  { %956 = vsyncadd [#allocation3 + $0x11], 16 }
  0xd5 PF:  { %p5324_p9 = scmp.le.s32.totalorder %s6177_s1, 18 }
  0xd6   :  { %s5325_s15 = sld [smem:[#allocation5 + $0x12]] (!%p5324_p9) }
  0xd7   :  { %960 = sbr.rel (%p5324_p9) target bundleno = 224 (0xe0), region = 621 }
  0xdc   :  { %s962_s18 = scalar_lea.vmem (!%p5324_p9), %s6178_s2, %s5325_s15 }
  0xdd   :  { %v982_v18 = vld [vmem:[%s962_s18] sm:$0x1] (!%p5324_p9) }
  0xde   :  { %983 = vst [vmem:[#allocation2 + $0x12] sm:$0x1] %v982_v18 }
  0xdf   :  { %1008 = vsyncadd [#allocation3 + $0x12], 16 }
  0xe0 PF:  { %p5326_p10 = scmp.le.s32.totalorder %s6177_s1, 19 }
  0xe1   :  { %s5327_s20 = sld [smem:[#allocation5 + $0x13]] (!%p5326_p10) }
  0xe2   :  { %1012 = sbr.rel (%p5326_p10) target bundleno = 235 (0xeb), region = 655 }
  0xe7   :  { %s1014_s23 = scalar_lea.vmem (!%p5326_p10), %s6178_s2, %s5327_s20 }
  0xe8   :  { %v1034_v19 = vld [vmem:[%s1014_s23] sm:$0x1] (!%p5326_p10) }
  0xe9   :  { %1035 = vst [vmem:[#allocation2 + $0x13] sm:$0x1] %v1034_v19 }
  0xea   :  { %1060 = vsyncadd [#allocation3 + $0x13], 16 }
  0xeb PF:  { %p5328_p11 = scmp.le.s32.totalorder %s6177_s1, 20 }
  0xec   :  { %s5329_s26 = sld [smem:[#allocation5 + $0x14]] (!%p5328_p11) }
  0xed   :  { %1064 = sbr.rel (%p5328_p11) target bundleno = 246 (0xf6), region = 689 }
  0xf2   :  { %s1066_s29 = scalar_lea.vmem (!%p5328_p11), %s6178_s2, %s5329_s26 }
  0xf3   :  { %v1086_v20 = vld [vmem:[%s1066_s29] sm:$0x1] (!%p5328_p11) }
  0xf4   :  { %1087 = vst [vmem:[#allocation2 + $0x14] sm:$0x1] %v1086_v20 }
  0xf5   :  { %1112 = vsyncadd [#allocation3 + $0x14], 16 }
  0xf6 PF:  { %p5330_p12 = scmp.le.s32.totalorder %s6177_s1, 21 }
  0xf7   :  { %s5331_s5 = sld [smem:[#allocation5 + $0x15]] (!%p5330_p12) }
  0xf8   :  { %1116 = sbr.rel (%p5330_p12) target bundleno = 257 (0x101), region = 723 }
  0xfd   :  { %s1118_s8 = scalar_lea.vmem (!%p5330_p12), %s6178_s2, %s5331_s5 }
  0xfe   :  { %v1138_v21 = vld [vmem:[%s1118_s8] sm:$0x1] (!%p5330_p12) }
  0xff   :  { %1139 = vst [vmem:[#allocation2 + $0x15] sm:$0x1] %v1138_v21 }
 0x100   :  { %1164 = vsyncadd [#allocation3 + $0x15], 16 }
 0x101 PF:  { %p5332_p13 = scmp.le.s32.totalorder %s6177_s1, 22 }
 0x102   :  { %s5333_s11 = sld [smem:[#allocation5 + $0x16]] (!%p5332_p13) }
 0x103   :  { %1168 = sbr.rel (%p5332_p13) target bundleno = 268 (0x10c), region = 757 }
 0x108   :  { %s1170_s14 = scalar_lea.vmem (!%p5332_p13), %s6178_s2, %s5333_s11 }
 0x109   :  { %v1190_v22 = vld [vmem:[%s1170_s14] sm:$0x1] (!%p5332_p13) }
 0x10a   :  { %1191 = vst [vmem:[#allocation2 + $0x16] sm:$0x1] %v1190_v22 }
 0x10b   :  { %1216 = vsyncadd [#allocation3 + $0x16], 16 }
 0x10c PF:  { %p5334_p0 = scmp.le.s32.totalorder %s6177_s1, 23 }
 0x10d   :  { %s5335_s17 = sld [smem:[#allocation5 + $0x17]] (!%p5334_p0) }
 0x10e   :  { %1220 = sbr.rel (%p5334_p0) target bundleno = 279 (0x117), region = 791 }
 0x113   :  { %s1222_s19 = scalar_lea.vmem (!%p5334_p0), %s6178_s2, %s5335_s17 }
 0x114   :  { %v1242_v23 = vld [vmem:[%s1222_s19] sm:$0x1] (!%p5334_p0) }
 0x115   :  { %1243 = vst [vmem:[#allocation2 + $0x17] sm:$0x1] %v1242_v23 }
 0x116   :  { %1268 = vsyncadd [#allocation3 + $0x17], 16 }
 0x117 PF:  { %p5336_p1 = scmp.le.s32.totalorder %s6177_s1, 24 }
 0x118   :  { %s5337_s22 = sld [smem:[#allocation5 + $0x18]] (!%p5336_p1) }
 0x119   :  { %1272 = sbr.rel (%p5336_p1) target bundleno = 290 (0x122), region = 825 }
 0x11e   :  { %s1274_s25 = scalar_lea.vmem (!%p5336_p1), %s6178_s2, %s5337_s22 }
 0x11f   :  { %v1294_v24 = vld [vmem:[%s1274_s25] sm:$0x1] (!%p5336_p1) }
 0x120   :  { %1295 = vst [vmem:[#allocation2 + $0x18] sm:$0x1] %v1294_v24 }
 0x121   :  { %1320 = vsyncadd [#allocation3 + $0x18], 16 }
 0x122 PF:  { %p5338_p2 = scmp.le.s32.totalorder %s6177_s1, 25 }
 0x123   :  { %s5339_s28 = sld [smem:[#allocation5 + $0x19]] (!%p5338_p2) }
 0x124   :  { %1324 = sbr.rel (%p5338_p2) target bundleno = 301 (0x12d), region = 859 }
 0x129   :  { %s1326_s4 = scalar_lea.vmem (!%p5338_p2), %s6178_s2, %s5339_s28 }
 0x12a   :  { %v1346_v25 = vld [vmem:[%s1326_s4] sm:$0x1] (!%p5338_p2) }
 0x12b   :  { %1347 = vst [vmem:[#allocation2 + $0x19] sm:$0x1] %v1346_v25 }
 0x12c   :  { %1372 = vsyncadd [#allocation3 + $0x19], 16 }
 0x12d PF:  { %p5340_p3 = scmp.le.s32.totalorder %s6177_s1, 26 }
 0x12e   :  { %s5341_s7 = sld [smem:[#allocation5 + $0x1a]] (!%p5340_p3) }
 0x12f   :  { %1376 = sbr.rel (%p5340_p3) target bundleno = 312 (0x138), region = 893 }
 0x134   :  { %s1378_s10 = scalar_lea.vmem (!%p5340_p3), %s6178_s2, %s5341_s7 }
 0x135   :  { %v1398_v26 = vld [vmem:[%s1378_s10] sm:$0x1] (!%p5340_p3) }
 0x136   :  { %1399 = vst [vmem:[#allocation2 + $0x1a] sm:$0x1] %v1398_v26 }
 0x137   :  { %1424 = vsyncadd [#allocation3 + $0x1a], 16 }
 0x138 PF:  { %p5342_p4 = scmp.le.s32.totalorder %s6177_s1, 27 }
 0x139   :  { %s5343_s13 = sld [smem:[#allocation5 + $0x1b]] (!%p5342_p4) }
 0x13a   :  { %1428 = sbr.rel (%p5342_p4) target bundleno = 323 (0x143), region = 927 }
 0x13f   :  { %s1430_s16 = scalar_lea.vmem (!%p5342_p4), %s6178_s2, %s5343_s13 }
 0x140   :  { %v1450_v27 = vld [vmem:[%s1430_s16] sm:$0x1] (!%p5342_p4) }
 0x141   :  { %1451 = vst [vmem:[#allocation2 + $0x1b] sm:$0x1] %v1450_v27 }
 0x142   :  { %1476 = vsyncadd [#allocation3 + $0x1b], 16 }
 0x143 PF:  { %p5344_p5 = scmp.le.s32.totalorder %s6177_s1, 28 }
 0x144   :  { %s5345_s0 = sld [smem:[#allocation5 + $0x1c]] (!%p5344_p5) }
 0x145   :  { %1480 = sbr.rel (%p5344_p5) target bundleno = 334 (0x14e), region = 961 }
 0x14a   :  { %s1482_s21 = scalar_lea.vmem (!%p5344_p5), %s6178_s2, %s5345_s0 }
 0x14b   :  { %v1502_v28 = vld [vmem:[%s1482_s21] sm:$0x1] (!%p5344_p5) }
 0x14c   :  { %1503 = vst [vmem:[#allocation2 + $0x1c] sm:$0x1] %v1502_v28 }
 0x14d   :  { %1528 = vsyncadd [#allocation3 + $0x1c], 16 }
 0x14e PF:  { %p5346_p6 = scmp.le.s32.totalorder %s6177_s1, 29 }
 0x14f   :  { %s5347_s24 = sld [smem:[#allocation5 + $0x1d]] (!%p5346_p6) }
 0x150   :  { %1532 = sbr.rel (%p5346_p6) target bundleno = 345 (0x159), region = 995 }
 0x155   :  { %s1534_s27 = scalar_lea.vmem (!%p5346_p6), %s6178_s2, %s5347_s24 }
 0x156   :  { %v1554_v29 = vld [vmem:[%s1534_s27] sm:$0x1] (!%p5346_p6) }
 0x157   :  { %1555 = vst [vmem:[#allocation2 + $0x1d] sm:$0x1] %v1554_v29 }
 0x158   :  { %1580 = vsyncadd [#allocation3 + $0x1d], 16 }
 0x159 PF:  { %p5348_p7 = scmp.le.s32.totalorder %s6177_s1, 30 }
 0x15a   :  { %s5349_s30 = sld [smem:[#allocation5 + $0x1e]] (!%p5348_p7) }
 0x15b   :  { %1584 = sbr.rel (%p5348_p7) target bundleno = 356 (0x164), region = 1029 }
 0x160   :  { %s1586_s6 = scalar_lea.vmem (!%p5348_p7), %s6178_s2, %s5349_s30 }
 0x161   :  { %v1606_v30 = vld [vmem:[%s1586_s6] sm:$0x1] (!%p5348_p7) }
 0x162   :  { %1607 = vst [vmem:[#allocation2 + $0x1e] sm:$0x1] %v1606_v30 }
 0x163   :  { %1632 = vsyncadd [#allocation3 + $0x1e], 16 }
 0x164 PF:  { %p5350_p8 = scmp.le.s32.totalorder %s6177_s1, 31 }
 0x165   :  { %s5351_s9 = sld [smem:[#allocation5 + $0x1f]] (!%p5350_p8) }
 0x166   :  { %1636 = sbr.rel (%p5350_p8) target bundleno = 367 (0x16f), region = 1063 }
 0x16b   :  { %s1638_s12 = scalar_lea.vmem (!%p5350_p8), %s6178_s2, %s5351_s9 }
 0x16c   :  { %v1658_v31 = vld [vmem:[%s1638_s12] sm:$0x1] (!%p5350_p8) }
 0x16d   :  { %1659 = vst [vmem:[#allocation2 + $0x1f] sm:$0x1] %v1658_v31 }
 0x16e   :  { %1684 = vsyncadd [#allocation3 + $0x1f], 16 }
 0x16f PF:  { %p5640_p9 = scmp.gt.s32.totalorder %s6177_s1, 0 }
 0x171   :  { %5713 = dma.done.wait (%p5640_p9), [#allocation3], 16 }
 0x172   :  { %5715 = vsyncadd (%p5640_p9), [#allocation3], 4294967280  ;;  %p5641_p10 = scmp.gt.s32.totalorder %s6177_s1, 1 }
 0x174   :  { %5717 = dma.done.wait (%p5641_p10), [#allocation3 + $0x1], 16 }
 0x175   :  { %5719 = vsyncadd (%p5641_p10), [#allocation3 + $0x1], 4294967280  ;;  %p5642_p11 = scmp.gt.s32.totalorder %s6177_s1, 2 }
 0x177   :  { %5721 = dma.done.wait (%p5642_p11), [#allocation3 + $0x2], 16 }
 0x178   :  { %5723 = vsyncadd (%p5642_p11), [#allocation3 + $0x2], 4294967280  ;;  %p5643_p12 = scmp.gt.s32.totalorder %s6177_s1, 3 }
 0x17a   :  { %5725 = dma.done.wait (%p5643_p12), [#allocation3 + $0x3], 16 }
 0x17b   :  { %5727 = vsyncadd (%p5643_p12), [#allocation3 + $0x3], 4294967280  ;;  %p5644_p13 = scmp.gt.s32.totalorder %s6177_s1, 4 }
 0x17d   :  { %5729 = dma.done.wait (%p5644_p13), [#allocation3 + $0x4], 16 }
 0x17e   :  { %5731 = vsyncadd (%p5644_p13), [#allocation3 + $0x4], 4294967280  ;;  %p5645_p0 = scmp.gt.s32.totalorder %s6177_s1, 5 }
 0x180   :  { %5733 = dma.done.wait (%p5645_p0), [#allocation3 + $0x5], 16 }
 0x181   :  { %5735 = vsyncadd (%p5645_p0), [#allocation3 + $0x5], 4294967280  ;;  %p5646_p1 = scmp.gt.s32.totalorder %s6177_s1, 6 }
 0x183   :  { %5737 = dma.done.wait (%p5646_p1), [#allocation3 + $0x6], 16 }
 0x184   :  { %5739 = vsyncadd (%p5646_p1), [#allocation3 + $0x6], 4294967280  ;;  %p5647_p2 = scmp.gt.s32.totalorder %s6177_s1, 7 }
 0x186   :  { %5741 = dma.done.wait (%p5647_p2), [#allocation3 + $0x7], 16 }
 0x187   :  { %5743 = vsyncadd (%p5647_p2), [#allocation3 + $0x7], 4294967280  ;;  %p5648_p3 = scmp.gt.s32.totalorder %s6177_s1, 8 }
 0x189   :  { %5745 = dma.done.wait (%p5648_p3), [#allocation3 + $0x8], 16 }
 0x18a   :  { %5747 = vsyncadd (%p5648_p3), [#allocation3 + $0x8], 4294967280  ;;  %p5649_p4 = scmp.gt.s32.totalorder %s6177_s1, 9 }
 0x18c   :  { %5749 = dma.done.wait (%p5649_p4), [#allocation3 + $0x9], 16 }
 0x18d   :  { %5751 = vsyncadd (%p5649_p4), [#allocation3 + $0x9], 4294967280  ;;  %p5650_p5 = scmp.gt.s32.totalorder %s6177_s1, 10 }
 0x18f   :  { %5753 = dma.done.wait (%p5650_p5), [#allocation3 + $0xa], 16 }
 0x190   :  { %5755 = vsyncadd (%p5650_p5), [#allocation3 + $0xa], 4294967280  ;;  %p5651_p6 = scmp.gt.s32.totalorder %s6177_s1, 11 }
 0x192   :  { %5757 = dma.done.wait (%p5651_p6), [#allocation3 + $0xb], 16 }
 0x193   :  { %5759 = vsyncadd (%p5651_p6), [#allocation3 + $0xb], 4294967280  ;;  %p5652_p7 = scmp.gt.s32.totalorder %s6177_s1, 12 }
 0x195   :  { %5761 = dma.done.wait (%p5652_p7), [#allocation3 + $0xc], 16 }
 0x196   :  { %5763 = vsyncadd (%p5652_p7), [#allocation3 + $0xc], 4294967280  ;;  %p5653_p8 = scmp.gt.s32.totalorder %s6177_s1, 13 }
 0x198   :  { %5765 = dma.done.wait (%p5653_p8), [#allocation3 + $0xd], 16 }
 0x199   :  { %5767 = vsyncadd (%p5653_p8), [#allocation3 + $0xd], 4294967280  ;;  %p5654_p9 = scmp.gt.s32.totalorder %s6177_s1, 14 }
 0x19b   :  { %5769 = dma.done.wait (%p5654_p9), [#allocation3 + $0xe], 16 }
 0x19c   :  { %5771 = vsyncadd (%p5654_p9), [#allocation3 + $0xe], 4294967280  ;;  %p5655_p10 = scmp.gt.s32.totalorder %s6177_s1, 15 }
 0x19e   :  { %5773 = dma.done.wait (%p5655_p10), [#allocation3 + $0xf], 16 }
 0x19f   :  { %5775 = vsyncadd (%p5655_p10), [#allocation3 + $0xf], 4294967280  ;;  %p5656_p11 = scmp.gt.s32.totalorder %s6177_s1, 16 }
 0x1a1   :  { %5777 = dma.done.wait (%p5656_p11), [#allocation3 + $0x10], 16 }
 0x1a2   :  { %5779 = vsyncadd (%p5656_p11), [#allocation3 + $0x10], 4294967280  ;;  %p5657_p12 = scmp.gt.s32.totalorder %s6177_s1, 17 }
 0x1a4   :  { %5781 = dma.done.wait (%p5657_p12), [#allocation3 + $0x11], 16 }
 0x1a5   :  { %5783 = vsyncadd (%p5657_p12), [#allocation3 + $0x11], 4294967280  ;;  %p5658_p13 = scmp.gt.s32.totalorder %s6177_s1, 18 }
 0x1a7   :  { %5785 = dma.done.wait (%p5658_p13), [#allocation3 + $0x12], 16 }
 0x1a8   :  { %5787 = vsyncadd (%p5658_p13), [#allocation3 + $0x12], 4294967280  ;;  %p5659_p0 = scmp.gt.s32.totalorder %s6177_s1, 19 }
 0x1aa   :  { %5789 = dma.done.wait (%p5659_p0), [#allocation3 + $0x13], 16 }
 0x1ab   :  { %5791 = vsyncadd (%p5659_p0), [#allocation3 + $0x13], 4294967280  ;;  %p5660_p1 = scmp.gt.s32.totalorder %s6177_s1, 20 }
 0x1ad   :  { %5793 = dma.done.wait (%p5660_p1), [#allocation3 + $0x14], 16 }
 0x1ae   :  { %5795 = vsyncadd (%p5660_p1), [#allocation3 + $0x14], 4294967280  ;;  %p5661_p2 = scmp.gt.s32.totalorder %s6177_s1, 21 }
 0x1b0   :  { %5797 = dma.done.wait (%p5661_p2), [#allocation3 + $0x15], 16 }
 0x1b1   :  { %5799 = vsyncadd (%p5661_p2), [#allocation3 + $0x15], 4294967280  ;;  %p5662_p3 = scmp.gt.s32.totalorder %s6177_s1, 22 }
 0x1b3   :  { %5801 = dma.done.wait (%p5662_p3), [#allocation3 + $0x16], 16 }
 0x1b4   :  { %5803 = vsyncadd (%p5662_p3), [#allocation3 + $0x16], 4294967280  ;;  %p5663_p4 = scmp.gt.s32.totalorder %s6177_s1, 23 }
 0x1b6   :  { %5805 = dma.done.wait (%p5663_p4), [#allocation3 + $0x17], 16 }
 0x1b7   :  { %5807 = vsyncadd (%p5663_p4), [#allocation3 + $0x17], 4294967280  ;;  %p5664_p5 = scmp.gt.s32.totalorder %s6177_s1, 24 }
 0x1b9   :  { %5809 = dma.done.wait (%p5664_p5), [#allocation3 + $0x18], 16 }
 0x1ba   :  { %5811 = vsyncadd (%p5664_p5), [#allocation3 + $0x18], 4294967280  ;;  %p5665_p6 = scmp.gt.s32.totalorder %s6177_s1, 25 }
 0x1bc   :  { %5813 = dma.done.wait (%p5665_p6), [#allocation3 + $0x19], 16 }
 0x1bd   :  { %5815 = vsyncadd (%p5665_p6), [#allocation3 + $0x19], 4294967280  ;;  %p5666_p7 = scmp.gt.s32.totalorder %s6177_s1, 26 }
 0x1bf   :  { %5817 = dma.done.wait (%p5666_p7), [#allocation3 + $0x1a], 16 }
 0x1c0   :  { %5819 = vsyncadd (%p5666_p7), [#allocation3 + $0x1a], 4294967280  ;;  %p5667_p8 = scmp.gt.s32.totalorder %s6177_s1, 27 }
 0x1c2   :  { %5821 = dma.done.wait (%p5667_p8), [#allocation3 + $0x1b], 16 }
 0x1c3   :  { %5823 = vsyncadd (%p5667_p8), [#allocation3 + $0x1b], 4294967280  ;;  %p5668_p9 = scmp.gt.s32.totalorder %s6177_s1, 28 }
 0x1c5   :  { %5825 = dma.done.wait (%p5668_p9), [#allocation3 + $0x1c], 16 }
 0x1c6   :  { %5827 = vsyncadd (%p5668_p9), [#allocation3 + $0x1c], 4294967280  ;;  %p5669_p10 = scmp.gt.s32.totalorder %s6177_s1, 29 }
 0x1c8   :  { %5829 = dma.done.wait (%p5669_p10), [#allocation3 + $0x1d], 16 }
 0x1c9   :  { %5831 = vsyncadd (%p5669_p10), [#allocation3 + $0x1d], 4294967280  ;;  %p5670_p11 = scmp.gt.s32.totalorder %s6177_s1, 30 }
 0x1cb   :  { %5833 = dma.done.wait (%p5670_p11), [#allocation3 + $0x1e], 16 }
 0x1cc   :  { %5835 = vsyncadd (%p5670_p11), [#allocation3 + $0x1e], 4294967280  ;;  %p5671_p12 = scmp.gt.s32.totalorder %s6177_s1, 31 }
 0x1ce   :  { %5837 = dma.done.wait (%p5671_p12), [#allocation3 + $0x1f], 16 }
 0x1cf   :  { %5839 = vsyncadd (%p5671_p12), [#allocation3 + $0x1f], 4294967280  ;;  %v3801_v32 = vlaneseq  ;;  %v3811_v34 = vstv %s6177_s1  ;;  %s5843_s19 = smov [#allocation7]   ;;  %vm3834_vm1 = vcmask 261120   ;;  %v3818_v38 = vld [vmem:[#allocation2] sm:$0xff]  ;;  %v3819_v39 = vld [vmem:[#allocation2 + $0x8] sm:$0xff] }
 0x1d0   :  { %s3844_s20 = sshll.u32 %s5843_s19, 4  ;;  %v3820_v40 = vld [vmem:[#allocation2 + $0x10] sm:$0xff]  ;;  %v3821_v44 = vld [vmem:[#allocation2 + $0x18] sm:$0xff]  ;;  %s3845_s20 = int_to_ptr.vmem [resolvable:$true] %s3844_s20 }
 0x1d1   :  { %v3802_v33 = vshrl.u32 %v3801_v32, 7  ;;  %s5688_s1 = scalar_lea.vmem %s3845_s20, 512  ;;  %p5693_p0 = scmp.lt.s32.totalorder %s3845_s20, %s3845_s20 }
 0x1d2   :  { %p5689_p13 = scmp.ne.s32.totalorder %s3845_s20, %s5688_s1  ;;  %p5694_p1 = scmp.lt.s32.totalorder %s5688_s1, %s5688_s1 }
 0x1d3   :  { %v3803_v35 = vadd.s32 8, %v3802_v33  ;;  %v3804_v36 = vadd.s32 16, %v3802_v33  ;;  %v3805_v37 = vadd.s32 24, %v3802_v33  ;;  %vm3812_vm0 = vcmp.lt.s32.totalorder %v3802_v33, %v3811_v34 }
 0x1d4   :  { %v3830_v41 = vsel %vm3812_vm0, %v3818_v38, 0.0  ;;  %p5695_p2 = por %p5694_p1, %p5693_p0 }
 0x1d5   :  { %vm3813_vm2 = vcmp.lt.s32.totalorder %v3803_v35, %v3811_v34  ;;  %vm3814_vm3 = vcmp.lt.s32.totalorder %v3804_v36, %v3811_v34  ;;  %vm3815_vm4 = vcmp.lt.s32.totalorder %v3805_v37, %v3811_v34  ;;  %3835 = vst.msk [vmem:[#allocation7] sm:$0xff] %vm3834_vm1, %v3830_v41 }
 0x1d6   :  { %v3831_v42 = vsel %vm3813_vm2, %v3819_v39, 0.0  ;;  %v3832_v43 = vsel %vm3814_vm3, %v3820_v40, 0.0  ;;  %v3833_v45 = vsel %vm3815_vm4, %v3821_v44, 0.0  ;;  %p5696_p3 = pnand %p5695_p2, %p5689_p13 }
 0x1d7   :  { %3836 = vst.msk [vmem:[#allocation7 + $0x8] sm:$0xff] %vm3834_vm1, %v3831_v42  ;;  %3837 = vst.msk [vmem:[#allocation7 + $0x10] sm:$0xff] %vm3834_vm1, %v3832_v43 }
 0x1d8   :  { %3838 = vst.msk [vmem:[#allocation7 + $0x18] sm:$0xff] %vm3834_vm1, %v3833_v45 }
 0x1d9   :  { %5699 = shalt.err (!%p5696_p3)
}
 0x1da   :  { %s5700_s23 = scalar_lea.hbm %s6179_s3, 512 }
 0x1db   :  { %p5701_p4 = scmp.ne.s32.totalorder %s6179_s3, %s5700_s23  ;;  %p5704_p5 = scmp.lt.u32.totalorder %s5700_s23, %s6179_s3 }
 0x1dd   :  { %p5706_p6 = pnand %p5704_p5, %p5701_p4 }
 0x1df   :  { %5709 = shalt.err (!%p5706_p6)
}
 0x1e0   :  { %s5844_s28 = smov 128   ;;  %s5845_s29 = smov 8  }
 0x1e1   :  { %3850 = dma.vmem_to_hbm [thread:$0]  %s3845_s20, 512, %s6179_s3, [#allocation8], %s5844_s28, %s5844_s28, %s5845_s29  }
 0x1e2   :  { %5840 = dma.done.wait [#allocation8], 512  }
 0x1e3   :  { %5841 = vsyncadd [#allocation8], 4294966784 }
 0x1e4   :  { %3854 = vsyncpa [#allocation8], 1 }
 0x1e5   :  { %3855 = vsyncmov [#allocation3] }
 0x1e8   :  { %s3856_s5 = vpop.sfrf %3855 }
 0x1e9   :  { %p5512_p7 = scmp.ne.s32.totalorder %s3856_s5, 0 }
 0x1eb   :  { %3860 = shalt.err (%p5512_p7)  }
 0x1ec   :  { %3862 = vsyncmov [#allocation3 + $0x1] }
 0x1ef   :  { %s3863_s6 = vpop.sfrf %3862 }
 0x1f0   :  { %p5513_p8 = scmp.ne.s32.totalorder %s3863_s6, 0 }
 0x1f2   :  { %3867 = shalt.err (%p5513_p8)  }
 0x1f3   :  { %3869 = vsyncmov [#allocation3 + $0x2] }
 0x1f6   :  { %s3870_s7 = vpop.sfrf %3869 }
 0x1f7   :  { %p5514_p9 = scmp.ne.s32.totalorder %s3870_s7, 0 }
 0x1f9   :  { %3874 = shalt.err (%p5514_p9)  }
 0x1fa   :  { %3876 = vsyncmov [#allocation3 + $0x3] }
 0x1fd   :  { %s3877_s8 = vpop.sfrf %3876 }
 0x1fe   :  { %p5515_p10 = scmp.ne.s32.totalorder %s3877_s8, 0 }
 0x200   :  { %3881 = shalt.err (%p5515_p10)  }
 0x201   :  { %3883 = vsyncmov [#allocation3 + $0x4] }
 0x204   :  { %s3884_s3 = vpop.sfrf %3883 }
 0x205   :  { %p5516_p11 = scmp.ne.s32.totalorder %s3884_s3, 0 }
 0x207   :  { %3888 = shalt.err (%p5516_p11)  }
 0x208   :  { %3890 = vsyncmov [#allocation3 + $0x5] }
 0x20b   :  { %s3891_s9 = vpop.sfrf %3890 }
 0x20c   :  { %p5517_p12 = scmp.ne.s32.totalorder %s3891_s9, 0 }
 0x20e   :  { %3895 = shalt.err (%p5517_p12)  }
 0x20f   :  { %3897 = vsyncmov [#allocation3 + $0x6] }
 0x212   :  { %s3898_s10 = vpop.sfrf %3897 }
 0x213   :  { %p5518_p13 = scmp.ne.s32.totalorder %s3898_s10, 0 }
 0x215   :  { %3902 = shalt.err (%p5518_p13)  }
 0x216   :  { %3904 = vsyncmov [#allocation3 + $0x7] }
 0x219   :  { %s3905_s11 = vpop.sfrf %3904 }
 0x21a   :  { %p5519_p0 = scmp.ne.s32.totalorder %s3905_s11, 0 }
 0x21c   :  { %3909 = shalt.err (%p5519_p0)  }
 0x21d   :  { %3911 = vsyncmov [#allocation3 + $0x8] }
 0x220   :  { %s3912_s12 = vpop.sfrf %3911 }
 0x221   :  { %p5520_p1 = scmp.ne.s32.totalorder %s3912_s12, 0 }
 0x223   :  { %3916 = shalt.err (%p5520_p1)  }
 0x224   :  { %3918 = vsyncmov [#allocation3 + $0x9] }
 0x227   :  { %s3919_s13 = vpop.sfrf %3918 }
 0x228   :  { %p5521_p2 = scmp.ne.s32.totalorder %s3919_s13, 0 }
 0x22a   :  { %3923 = shalt.err (%p5521_p2)  }
 0x22b   :  { %3925 = vsyncmov [#allocation3 + $0xa] }
 0x22e   :  { %s3926_s14 = vpop.sfrf %3925 }
 0x22f   :  { %p5522_p3 = scmp.ne.s32.totalorder %s3926_s14, 0 }
 0x231   :  { %3930 = shalt.err (%p5522_p3)  }
 0x232   :  { %3932 = vsyncmov [#allocation3 + $0xb] }
 0x235   :  { %s3933_s15 = vpop.sfrf %3932 }
 0x236   :  { %p5523_p4 = scmp.ne.s32.totalorder %s3933_s15, 0 }
 0x238   :  { %3937 = shalt.err (%p5523_p4)  }
 0x239   :  { %3939 = vsyncmov [#allocation3 + $0xc] }
 0x23c   :  { %s3940_s16 = vpop.sfrf %3939 }
 0x23d   :  { %p5524_p5 = scmp.ne.s32.totalorder %s3940_s16, 0 }
 0x23f   :  { %3944 = shalt.err (%p5524_p5)  }
 0x240   :  { %3946 = vsyncmov [#allocation3 + $0xd] }
 0x243   :  { %s3947_s17 = vpop.sfrf %3946 }
 0x244   :  { %p5525_p6 = scmp.ne.s32.totalorder %s3947_s17, 0 }
 0x246   :  { %3951 = shalt.err (%p5525_p6)  }
 0x247   :  { %3953 = vsyncmov [#allocation3 + $0xe] }
 0x24a   :  { %s3954_s18 = vpop.sfrf %3953 }
 0x24b   :  { %p5526_p7 = scmp.ne.s32.totalorder %s3954_s18, 0 }
 0x24d   :  { %3958 = shalt.err (%p5526_p7)  }
 0x24e   :  { %3960 = vsyncmov [#allocation3 + $0xf] }
 0x251   :  { %s3961_s2 = vpop.sfrf %3960 }
 0x252   :  { %p5527_p8 = scmp.ne.s32.totalorder %s3961_s2, 0 }
 0x254   :  { %3965 = shalt.err (%p5527_p8)  }
 0x255   :  { %3967 = vsyncmov [#allocation3 + $0x10] }
 0x258   :  { %s3968_s0 = vpop.sfrf %3967 }
 0x259   :  { %p5528_p9 = scmp.ne.s32.totalorder %s3968_s0, 0 }
 0x25b   :  { %3972 = shalt.err (%p5528_p9)  }
 0x25c   :  { %3974 = vsyncmov [#allocation3 + $0x11] }
 0x25f   :  { %s3975_s19 = vpop.sfrf %3974 }
 0x260   :  { %p5529_p10 = scmp.ne.s32.totalorder %s3975_s19, 0 }
 0x262   :  { %3979 = shalt.err (%p5529_p10)  }
 0x263   :  { %3981 = vsyncmov [#allocation3 + $0x12] }
 0x266   :  { %s3982_s20 = vpop.sfrf %3981 }
 0x267   :  { %p5530_p11 = scmp.ne.s32.totalorder %s3982_s20, 0 }
 0x269   :  { %3986 = shalt.err (%p5530_p11)  }
 0x26a   :  { %3988 = vsyncmov [#allocation3 + $0x13] }
 0x26d   :  { %s3989_s1 = vpop.sfrf %3988 }
 0x26e   :  { %p5531_p12 = scmp.ne.s32.totalorder %s3989_s1, 0 }
 0x270   :  { %3993 = shalt.err (%p5531_p12)  }
 0x271   :  { %3995 = vsyncmov [#allocation3 + $0x14] }
 0x274   :  { %s3996_s21 = vpop.sfrf %3995 }
 0x275   :  { %p5532_p13 = scmp.ne.s32.totalorder %s3996_s21, 0 }
 0x277   :  { %4000 = shalt.err (%p5532_p13)  }
 0x278   :  { %4002 = vsyncmov [#allocation3 + $0x15] }
 0x27b   :  { %s4003_s22 = vpop.sfrf %4002 }
 0x27c   :  { %p5533_p0 = scmp.ne.s32.totalorder %s4003_s22, 0 }
 0x27e   :  { %4007 = shalt.err (%p5533_p0)  }
 0x27f   :  { %4009 = vsyncmov [#allocation3 + $0x16] }
 0x282   :  { %s4010_s23 = vpop.sfrf %4009 }
 0x283   :  { %p5534_p1 = scmp.ne.s32.totalorder %s4010_s23, 0 }
 0x285   :  { %4014 = shalt.err (%p5534_p1)  }
 0x286   :  { %4016 = vsyncmov [#allocation3 + $0x17] }
 0x289   :  { %s4017_s24 = vpop.sfrf %4016 }
 0x28a   :  { %p5535_p2 = scmp.ne.s32.totalorder %s4017_s24, 0 }
 0x28c   :  { %4021 = shalt.err (%p5535_p2)  }
 0x28d   :  { %4023 = vsyncmov [#allocation3 + $0x18] }
 0x290   :  { %s4024_s25 = vpop.sfrf %4023 }
 0x291   :  { %p5536_p3 = scmp.ne.s32.totalorder %s4024_s25, 0 }
 0x293   :  { %4028 = shalt.err (%p5536_p3)  }
 0x294   :  { %4030 = vsyncmov [#allocation3 + $0x19] }
 0x297   :  { %s4031_s26 = vpop.sfrf %4030 }
 0x298   :  { %p5537_p4 = scmp.ne.s32.totalorder %s4031_s26, 0 }
 0x29a   :  { %4035 = shalt.err (%p5537_p4)  }
 0x29b   :  { %4037 = vsyncmov [#allocation3 + $0x1a] }
 0x29e   :  { %s4038_s27 = vpop.sfrf %4037 }
 0x29f   :  { %p5538_p5 = scmp.ne.s32.totalorder %s4038_s27, 0 }
 0x2a1   :  { %4042 = shalt.err (%p5538_p5)  }
 0x2a2   :  { %4044 = vsyncmov [#allocation3 + $0x1b] }
 0x2a5   :  { %s4045_s28 = vpop.sfrf %4044 }
 0x2a6   :  { %p5539_p6 = scmp.ne.s32.totalorder %s4045_s28, 0 }
 0x2a8   :  { %4049 = shalt.err (%p5539_p6)  }
 0x2a9   :  { %4051 = vsyncmov [#allocation3 + $0x1c] }
 0x2ac   :  { %s4052_s29 = vpop.sfrf %4051 }
 0x2ad   :  { %p5540_p7 = scmp.ne.s32.totalorder %s4052_s29, 0 }
 0x2af   :  { %4056 = shalt.err (%p5540_p7)  }
 0x2b0   :  { %4058 = vsyncmov [#allocation3 + $0x1d] }
 0x2b3   :  { %s4059_s30 = vpop.sfrf %4058 }
 0x2b4   :  { %p5541_p8 = scmp.ne.s32.totalorder %s4059_s30, 0 }
 0x2b6   :  { %4063 = shalt.err (%p5541_p8)  }
 0x2b7   :  { %4065 = vsyncmov [#allocation3 + $0x1e] }
 0x2ba   :  { %s4066_s4 = vpop.sfrf %4065 }
 0x2bb   :  { %p5542_p9 = scmp.ne.s32.totalorder %s4066_s4, 0 }
 0x2bd   :  { %4070 = shalt.err (%p5542_p9)  }
 0x2be   :  { %4072 = vsyncmov [#allocation3 + $0x1f] }
 0x2c1   :  { %s4073_s5 = vpop.sfrf %4072 }
 0x2c2   :  { %p5543_p10 = scmp.ne.s32.totalorder %s4073_s5, 0 }
 0x2c4   :  { %4077 = shalt.err (%p5543_p10)  }
 0x2c5   :  { %4079 = vsyncmov [#allocation3 + $0x20] }
 0x2c8   :  { %s4080_s6 = vpop.sfrf %4079 }
 0x2c9   :  { %p5544_p11 = scmp.ne.s32.totalorder %s4080_s6, 0 }
 0x2cb   :  { %4084 = shalt.err (%p5544_p11)  }
 0x2cc   :  { %4086 = vsyncmov [#allocation3 + $0x21] }
 0x2cf   :  { %s4087_s7 = vpop.sfrf %4086 }
 0x2d0   :  { %p5545_p12 = scmp.ne.s32.totalorder %s4087_s7, 0 }
 0x2d2   :  { %4091 = shalt.err (%p5545_p12)  }
 0x2d3   :  { %4093 = vsyncmov [#allocation3 + $0x22] }
 0x2d6   :  { %s4094_s8 = vpop.sfrf %4093 }
 0x2d7   :  { %p5546_p13 = scmp.ne.s32.totalorder %s4094_s8, 0 }
 0x2d9   :  { %4098 = shalt.err (%p5546_p13)  }
 0x2da   :  { %4100 = vsyncmov [#allocation3 + $0x23] }
 0x2dd   :  { %s4101_s3 = vpop.sfrf %4100 }
 0x2de   :  { %p5547_p0 = scmp.ne.s32.totalorder %s4101_s3, 0 }
 0x2e0   :  { %4105 = shalt.err (%p5547_p0)  }
 0x2e1   :  { %4107 = vsyncmov [#allocation3 + $0x24] }
 0x2e4   :  { %s4108_s9 = vpop.sfrf %4107 }
 0x2e5   :  { %p5548_p1 = scmp.ne.s32.totalorder %s4108_s9, 0 }
 0x2e7   :  { %4112 = shalt.err (%p5548_p1)  }
 0x2e8   :  { %4114 = vsyncmov [#allocation3 + $0x25] }
 0x2eb   :  { %s4115_s10 = vpop.sfrf %4114 }
 0x2ec   :  { %p5549_p2 = scmp.ne.s32.totalorder %s4115_s10, 0 }
 0x2ee   :  { %4119 = shalt.err (%p5549_p2)  }
 0x2ef   :  { %4121 = vsyncmov [#allocation3 + $0x26] }
 0x2f2   :  { %s4122_s11 = vpop.sfrf %4121 }
 0x2f3   :  { %p5550_p3 = scmp.ne.s32.totalorder %s4122_s11, 0 }
 0x2f5   :  { %4126 = shalt.err (%p5550_p3)  }
 0x2f6   :  { %4128 = vsyncmov [#allocation3 + $0x27] }
 0x2f9   :  { %s4129_s12 = vpop.sfrf %4128 }
 0x2fa   :  { %p5551_p4 = scmp.ne.s32.totalorder %s4129_s12, 0 }
 0x2fc   :  { %4133 = shalt.err (%p5551_p4)  }
 0x2fd   :  { %4135 = vsyncmov [#allocation3 + $0x28] }
 0x300   :  { %s4136_s13 = vpop.sfrf %4135 }
 0x301   :  { %p5552_p5 = scmp.ne.s32.totalorder %s4136_s13, 0 }
 0x303   :  { %4140 = shalt.err (%p5552_p5)  }
 0x304   :  { %4142 = vsyncmov [#allocation3 + $0x29] }
 0x307   :  { %s4143_s14 = vpop.sfrf %4142 }
 0x308   :  { %p5553_p6 = scmp.ne.s32.totalorder %s4143_s14, 0 }
 0x30a   :  { %4147 = shalt.err (%p5553_p6)  }
 0x30b   :  { %4149 = vsyncmov [#allocation3 + $0x2a] }
 0x30e   :  { %s4150_s15 = vpop.sfrf %4149 }
 0x30f   :  { %p5554_p7 = scmp.ne.s32.totalorder %s4150_s15, 0 }
 0x311   :  { %4154 = shalt.err (%p5554_p7)  }
 0x312   :  { %4156 = vsyncmov [#allocation3 + $0x2b] }
 0x315   :  { %s4157_s16 = vpop.sfrf %4156 }
 0x316   :  { %p5555_p8 = scmp.ne.s32.totalorder %s4157_s16, 0 }
 0x318   :  { %4161 = shalt.err (%p5555_p8)  }
 0x319   :  { %4163 = vsyncmov [#allocation3 + $0x2c] }
 0x31c   :  { %s4164_s17 = vpop.sfrf %4163 }
 0x31d   :  { %p5556_p9 = scmp.ne.s32.totalorder %s4164_s17, 0 }
 0x31f   :  { %4168 = shalt.err (%p5556_p9)  }
 0x320   :  { %4170 = vsyncmov [#allocation3 + $0x2d] }
 0x323   :  { %s4171_s18 = vpop.sfrf %4170 }
 0x324   :  { %p5557_p10 = scmp.ne.s32.totalorder %s4171_s18, 0 }
 0x326   :  { %4175 = shalt.err (%p5557_p10)  }
 0x327   :  { %4177 = vsyncmov [#allocation3 + $0x2e] }
 0x32a   :  { %s4178_s2 = vpop.sfrf %4177 }
 0x32b   :  { %p5558_p11 = scmp.ne.s32.totalorder %s4178_s2, 0 }
 0x32d   :  { %4182 = shalt.err (%p5558_p11)  }
 0x32e   :  { %4184 = vsyncmov [#allocation3 + $0x2f] }
 0x331   :  { %s4185_s0 = vpop.sfrf %4184 }
 0x332   :  { %p5559_p12 = scmp.ne.s32.totalorder %s4185_s0, 0 }
 0x334   :  { %4189 = shalt.err (%p5559_p12)  }
 0x335   :  { %4191 = vsyncmov [#allocation3 + $0x30] }
 0x338   :  { %s4192_s19 = vpop.sfrf %4191 }
 0x339   :  { %p5560_p13 = scmp.ne.s32.totalorder %s4192_s19, 0 }
 0x33b   :  { %4196 = shalt.err (%p5560_p13)  }
 0x33c   :  { %4198 = vsyncmov [#allocation3 + $0x31] }
 0x33f   :  { %s4199_s20 = vpop.sfrf %4198 }
 0x340   :  { %p5561_p0 = scmp.ne.s32.totalorder %s4199_s20, 0 }
 0x342   :  { %4203 = shalt.err (%p5561_p0)  }
 0x343   :  { %4205 = vsyncmov [#allocation3 + $0x32] }
 0x346   :  { %s4206_s1 = vpop.sfrf %4205 }
 0x347   :  { %p5562_p1 = scmp.ne.s32.totalorder %s4206_s1, 0 }
 0x349   :  { %4210 = shalt.err (%p5562_p1)  }
 0x34a   :  { %4212 = vsyncmov [#allocation3 + $0x33] }
 0x34d   :  { %s4213_s21 = vpop.sfrf %4212 }
 0x34e   :  { %p5563_p2 = scmp.ne.s32.totalorder %s4213_s21, 0 }
 0x350   :  { %4217 = shalt.err (%p5563_p2)  }
 0x351   :  { %4219 = vsyncmov [#allocation3 + $0x34] }
 0x354   :  { %s4220_s22 = vpop.sfrf %4219 }
 0x355   :  { %p5564_p3 = scmp.ne.s32.totalorder %s4220_s22, 0 }
 0x357   :  { %4224 = shalt.err (%p5564_p3)  }
 0x358   :  { %4226 = vsyncmov [#allocation3 + $0x35] }
 0x35b   :  { %s4227_s23 = vpop.sfrf %4226 }
 0x35c   :  { %p5565_p4 = scmp.ne.s32.totalorder %s4227_s23, 0 }
 0x35e   :  { %4231 = shalt.err (%p5565_p4)  }
 0x35f   :  { %4233 = vsyncmov [#allocation3 + $0x36] }
 0x362   :  { %s4234_s24 = vpop.sfrf %4233 }
 0x363   :  { %p5566_p5 = scmp.ne.s32.totalorder %s4234_s24, 0 }
 0x365   :  { %4238 = shalt.err (%p5566_p5)  }
 0x366   :  { %4240 = vsyncmov [#allocation3 + $0x37] }
 0x369   :  { %s4241_s25 = vpop.sfrf %4240 }
 0x36a   :  { %p5567_p6 = scmp.ne.s32.totalorder %s4241_s25, 0 }
 0x36c   :  { %4245 = shalt.err (%p5567_p6)  }
 0x36d   :  { %4247 = vsyncmov [#allocation3 + $0x38] }
 0x370   :  { %s4248_s26 = vpop.sfrf %4247 }
 0x371   :  { %p5568_p7 = scmp.ne.s32.totalorder %s4248_s26, 0 }
 0x373   :  { %4252 = shalt.err (%p5568_p7)  }
 0x374   :  { %4254 = vsyncmov [#allocation3 + $0x39] }
 0x377   :  { %s4255_s27 = vpop.sfrf %4254 }
 0x378   :  { %p5569_p8 = scmp.ne.s32.totalorder %s4255_s27, 0 }
 0x37a   :  { %4259 = shalt.err (%p5569_p8)  }
 0x37b   :  { %4261 = vsyncmov [#allocation3 + $0x3a] }
 0x37e   :  { %s4262_s28 = vpop.sfrf %4261 }
 0x37f   :  { %p5570_p9 = scmp.ne.s32.totalorder %s4262_s28, 0 }
 0x381   :  { %4266 = shalt.err (%p5570_p9)  }
 0x382   :  { %4268 = vsyncmov [#allocation3 + $0x3b] }
 0x385   :  { %s4269_s29 = vpop.sfrf %4268 }
 0x386   :  { %p5571_p10 = scmp.ne.s32.totalorder %s4269_s29, 0 }
 0x388   :  { %4273 = shalt.err (%p5571_p10)  }
 0x389   :  { %4275 = vsyncmov [#allocation3 + $0x3c] }
 0x38c   :  { %s4276_s30 = vpop.sfrf %4275 }
 0x38d   :  { %p5572_p11 = scmp.ne.s32.totalorder %s4276_s30, 0 }
 0x38f   :  { %4280 = shalt.err (%p5572_p11)  }
 0x390   :  { %4282 = vsyncmov [#allocation3 + $0x3d] }
 0x393   :  { %s4283_s4 = vpop.sfrf %4282 }
 0x394   :  { %p5573_p12 = scmp.ne.s32.totalorder %s4283_s4, 0 }
 0x396   :  { %4287 = shalt.err (%p5573_p12)  }
 0x397   :  { %4289 = vsyncmov [#allocation3 + $0x3e] }
 0x39a   :  { %s4290_s5 = vpop.sfrf %4289 }
 0x39b   :  { %p5574_p13 = scmp.ne.s32.totalorder %s4290_s5, 0 }
 0x39d   :  { %4294 = shalt.err (%p5574_p13)  }
 0x39e   :  { %4296 = vsyncmov [#allocation3 + $0x3f] }
 0x3a1   :  { %s4297_s6 = vpop.sfrf %4296 }
 0x3a2   :  { %p5575_p0 = scmp.ne.s32.totalorder %s4297_s6, 0 }
 0x3a4   :  { %4301 = shalt.err (%p5575_p0)  }

</bundles_post_ra>
